<compile_context>
chip_gen: v5e
topology: v5e:2x2
jax: 0.10.0
libtpu: 0.0.40
codegen_flags: <defaults>
</compile_context>

<pallas_src>
import math
import functools

import jax
import jax.numpy as jnp
from jax.experimental import pallas as pl
from jax.experimental.pallas import tpu as pltpu


# ---------------------------------------------------------------------------
# Fused decoder-stack kernel (one grid step = one batch element, all layers)
# ---------------------------------------------------------------------------
def _decoder_stack_kernel(
    x_ref, mem_ref, sbias_ref, cbias_ref,
    wqkv_ref, bqkv_ref, wo_ref, bo_ref,
    cwq_ref, cbq_ref, cwkv_ref, cbkv_ref, cwo_ref, cbo_ref,
    w1_ref, b1_ref, w2_ref, b2_ref,
    lng_ref, lnb_ref,
    o_ref,
    *, n_layers, n_heads, d_model, d_head, scale, eps):
    f32 = jnp.float32
    bf16 = jnp.bfloat16

    x = x_ref[...]          # [T, D]  f32 activations (stay resident in VMEM/vregs)
    sbias = sbias_ref[...]  # [T, T]  additive self-attention mask (0 / -1e9)
    cbias = cbias_ref[...]  # [T, S]  additive cross-attention mask

    def layer_norm(v, idx):
        g = lng_ref[idx:idx + 1, :]          # [1, D]
        b = lnb_ref[idx:idx + 1, :]
        mu = jnp.mean(v, axis=-1, keepdims=True)
        var = jnp.mean((v - mu) ** 2, axis=-1, keepdims=True)
        return (v - mu) * jax.lax.rsqrt(var + eps) * g + b

    def matmul(a, w, b=None):
        # bf16 operands, f32 MXU accumulation.
        r = jax.lax.dot_general(a.astype(bf16), w, (((1,), (0,)), ((), ())),
                                preferred_element_type=f32)
        return r if b is None else r + b

    def mha(q_lin, kv_lin, bias):
        # q_lin: [Tq, D]; kv_lin: [Tk, 2D] laid out as [K | V]; bias: [Tq, Tk] additive.
        heads = []
        for h in range(n_heads):                       # static unrolled head loop,
            lo, hi = h * d_head, (h + 1) * d_head      # lane-slice heads in place
            q = q_lin[:, lo:hi].astype(bf16)                          # [Tq, dk]
            k = kv_lin[:, lo:hi].astype(bf16)                         # [Tk, dk]
            v = kv_lin[:, d_model + lo:d_model + hi].astype(bf16)     # [Tk, dk]
            s = jax.lax.dot_general(q, k, (((1,), (1,)), ((), ())),   # q @ k^T
                                    preferred_element_type=f32)
            s = s * scale + bias
            m = jnp.max(s, axis=-1, keepdims=True)
            e = jnp.exp(s - m)
            p = e * pl.reciprocal(jnp.sum(e, axis=-1, keepdims=True), approx=True)
            heads.append(jax.lax.dot_general(p.astype(bf16), v,
                                             (((1,), (0,)), ((), ())),
                                             preferred_element_type=f32))
        return jnp.concatenate(heads, axis=-1)         # [Tq, D]

    # Encoder-memory K/V projection: deepcopy-cloned layers share identical weights
    # and memory is constant across layers -> project once, reuse for every layer.
    kv_mem = matmul(mem_ref[...], cwkv_ref[...], cbkv_ref[...])       # [S, 2D]

    for _ in range(n_layers):   # static, unrolled (deepcopy layers share weights)
        # sublayer 0: masked multi-head self-attention (pre-norm residual)
        y = layer_norm(x, 0)
        qkv = matmul(y, wqkv_ref[...], bqkv_ref[...])                 # [T, 3D]
        ctx = mha(qkv[:, :d_model], qkv[:, d_model:], sbias)
        x = x + matmul(ctx, wo_ref[...], bo_ref[...])

        # sublayer 1: multi-head cross-attention over encoder memory
        y = layer_norm(x, 1)
        q = matmul(y, cwq_ref[...], cbq_ref[...])
        ctx = mha(q, kv_mem, cbias)
        x = x + matmul(ctx, cwo_ref[...], cbo_ref[...])

        # sublayer 2: position-wise feed-forward
        y = layer_norm(x, 2)
        h1 = jnp.maximum(matmul(y, w1_ref[...], b1_ref[...]), 0.0)    # ReLU
        x = x + matmul(h1, w2_ref[...], b2_ref[...])

    o_ref[...] = x


# ---------------------------------------------------------------------------
# Wrapper: one pallas_call for the whole decoder stack
# ---------------------------------------------------------------------------
def r2l_decoder_forward(params, x, memory, src_mask, trg_mask, *, n_layers, n_heads):
    B, T, D = x.shape
    S = memory.shape[1]
    dk = D // n_heads

    # Additive masks precomputed once: 0 where attend, -1e9 where masked
    # (matches masked_fill(mask == 0, -1e9)).
    self_bias = ((trg_mask - 1.0) * 1e9).astype(jnp.float32)
    cross_bias = ((src_mask - 1.0) * 1e9).astype(jnp.float32)

    kernel = functools.partial(
        _decoder_stack_kernel,
        n_layers=n_layers, n_heads=n_heads, d_model=D, d_head=dk,
        scale=1.0 / math.sqrt(dk), eps=1e-6)

    weight_order = ["wqkv", "bqkv", "wo", "bo",
                    "cwq", "cbq", "cwkv", "cbkv", "cwo", "cbo",
                    "ff_w1", "ff_b1", "ff_w2", "ff_b2",
                    "ln_g", "ln_b"]
    weights = [params[k] for k in weight_order]

    def full_spec(shape):
        n = len(shape)
        # Same block index every grid step -> weights stay resident in VMEM.
        return pl.BlockSpec(shape, lambda b, _n=n: (0,) * _n)

    def batch_spec(d1, d2):
        return pl.BlockSpec((None, d1, d2), lambda b: (b, 0, 0))

    in_specs = ([batch_spec(T, D),    # x
                 batch_spec(S, D),    # memory
                 batch_spec(T, T),    # additive self-attn mask
                 batch_spec(T, S)]    # additive cross-attn mask
                + [full_spec(w.shape) for w in weights])

    return pl.pallas_call(
        kernel,
        out_shape=jax.ShapeDtypeStruct((B, T, D), jnp.float32),
        grid=(B,),
        in_specs=in_specs,
        out_specs=batch_spec(T, D),
        compiler_params=pltpu.CompilerParams(
            dimension_semantics=("parallel",),       # batch rows independent (v7x 2 TCs)
            vmem_limit_bytes=32 * 1024 * 1024,       # safe on v5e/v6e/v7x at these sizes
        ),
    )(x, memory, self_bias, cross_bias, *weights)


# ---------------------------------------------------------------------------
# Deterministic synthetic parameters (PyTorch Linear-style init, fused layouts)
# ---------------------------------------------------------------------------
def _linear(key, din, dout):
    kw, kb = jax.random.split(key)
    bound = 1.0 / math.sqrt(din)
    w = jax.random.uniform(kw, (din, dout), jnp.float32, -bound, bound)
    b = jax.random.uniform(kb, (dout,), jnp.float32, -bound, bound)
    return w, b


def init_decoder_params(key, d_model, d_ff):
    ks = jax.random.split(key, 10)
    wq, bq = _linear(ks[0], d_model, d_model)
    wk, bk = _linear(ks[1], d_model, d_model)
    wv, bv = _linear(ks[2], d_model, d_model)
    wo, bo = _linear(ks[3], d_model, d_model)
    cwq, cbq = _linear(ks[4], d_model, d_model)
    cwk, cbk = _linear(ks[5], d_model, d_model)
    cwv, cbv = _linear(ks[6], d_model, d_model)
    cwo, cbo = _linear(ks[7], d_model, d_model)
    w1, b1 = _linear(ks[8], d_model, d_ff)
    w2, b2 = _linear(ks[9], d_ff, d_model)

    bfw = lambda a: a.astype(jnp.bfloat16)            # matmul weights in bf16
    row = lambda a: a.reshape(1, -1).astype(jnp.float32)  # biases as f32 [1, N]

    return dict(
        wqkv=bfw(jnp.concatenate([wq, wk, wv], axis=1)),      # [D, 3D] fused QKV
        bqkv=row(jnp.concatenate([bq, bk, bv])),              # [1, 3D]
        wo=bfw(wo), bo=row(bo),
        cwq=bfw(cwq), cbq=row(cbq),
        cwkv=bfw(jnp.concatenate([cwk, cwv], axis=1)),        # [D, 2D] fused cross K/V
        cbkv=row(jnp.concatenate([cbk, cbv])),                # [1, 2D]
        cwo=bfw(cwo), cbo=row(cbo),
        ff_w1=bfw(w1), ff_b1=row(b1),
        ff_w2=bfw(w2), ff_b2=row(b2),
        ln_g=jnp.ones((3, d_model), jnp.float32),             # 3 pre-norm LayerNorms
        ln_b=jnp.zeros((3, d_model), jnp.float32),
    )


# ---------------------------------------------------------------------------
# Main
# ---------------------------------------------------------------------------
if __name__ == "__main__":
    B, T, S = 2, 8, 10                 # batch, target seq, encoder-memory seq
    D, H, DFF, N_LAYERS = 32, 4, 64, 2  # d_model, heads, ffn hidden, decoder depth

    root = jax.random.PRNGKey(0)
    k_par, k_x, k_mem = jax.random.split(root, 3)

    params = init_decoder_params(k_par, D, DFF)

    x = jax.random.normal(k_x, (B, T, D), jnp.float32)
    memory = jax.random.normal(k_mem, (B, S, D), jnp.float32)

    # masks: 1 = attend, 0 = masked
    trg_mask = jnp.broadcast_to(jnp.tril(jnp.ones((T, T), jnp.float32)), (B, T, T))
    src_mask = jnp.ones((B, T, S), jnp.float32)

    fwd = jax.jit(functools.partial(r2l_decoder_forward, n_layers=N_LAYERS, n_heads=H))
    out = fwd(params, x, memory, src_mask, trg_mask)
    out = jax.block_until_ready(out)

    assert out.shape == (B, T, D) and out.dtype == jnp.float32
    assert bool(jnp.all(jnp.isfinite(out)))
    print("KERNEL_OK")
</pallas_src>

<mosaic_0001>
module attributes {stable_mosaic.version = 11 : i64} {
  func.func @_decoder_stack_kernel(%arg0: i32, %arg1: memref<1x8x32xf32, #tpu.memory_space<vmem>>, %arg2: memref<1x10x32xf32, #tpu.memory_space<vmem>>, %arg3: memref<1x8x8xf32, #tpu.memory_space<vmem>>, %arg4: memref<1x8x10xf32, #tpu.memory_space<vmem>>, %arg5: memref<32x96xbf16, #tpu.memory_space<vmem>>, %arg6: memref<1x96xf32, #tpu.memory_space<vmem>>, %arg7: memref<32x32xbf16, #tpu.memory_space<vmem>>, %arg8: memref<1x32xf32, #tpu.memory_space<vmem>>, %arg9: memref<32x32xbf16, #tpu.memory_space<vmem>>, %arg10: memref<1x32xf32, #tpu.memory_space<vmem>>, %arg11: memref<32x64xbf16, #tpu.memory_space<vmem>>, %arg12: memref<1x64xf32, #tpu.memory_space<vmem>>, %arg13: memref<32x32xbf16, #tpu.memory_space<vmem>>, %arg14: memref<1x32xf32, #tpu.memory_space<vmem>>, %arg15: memref<32x64xbf16, #tpu.memory_space<vmem>>, %arg16: memref<1x64xf32, #tpu.memory_space<vmem>>, %arg17: memref<64x32xbf16, #tpu.memory_space<vmem>>, %arg18: memref<1x32xf32, #tpu.memory_space<vmem>>, %arg19: memref<3x32xf32, #tpu.memory_space<vmem>>, %arg20: memref<3x32xf32, #tpu.memory_space<vmem>>, %arg21: memref<1x8x32xf32, #tpu.memory_space<vmem>>) attributes {dimension_semantics = [#tpu.dimension_semantics<parallel>], iteration_bounds = array<i64: 2>, scalar_prefetch = 0 : i64, scratch_operands = 0 : i64, tpu.core_type = #tpu.core_type<tc>, window_params = [{transform_indices = @transform_0, window_bounds = array<i64: 1, 8, 32>}, {transform_indices = @transform_1, window_bounds = array<i64: 1, 10, 32>}, {transform_indices = @transform_2, window_bounds = array<i64: 1, 8, 8>}, {transform_indices = @transform_3, window_bounds = array<i64: 1, 8, 10>}, {pipeline_mode = #tpu.pipeline_mode<synchronous>, transform_indices = @transform_4, window_bounds = array<i64: 32, 96>}, {pipeline_mode = #tpu.pipeline_mode<synchronous>, transform_indices = @transform_5, window_bounds = array<i64: 1, 96>}, {pipeline_mode = #tpu.pipeline_mode<synchronous>, transform_indices = @transform_6, window_bounds = array<i64: 32, 32>}, {pipeline_mode = #tpu.pipeline_mode<synchronous>, transform_indices = @transform_7, window_bounds = array<i64: 1, 32>}, {pipeline_mode = #tpu.pipeline_mode<synchronous>, transform_indices = @transform_8, window_bounds = array<i64: 32, 32>}, {pipeline_mode = #tpu.pipeline_mode<synchronous>, transform_indices = @transform_9, window_bounds = array<i64: 1, 32>}, {pipeline_mode = #tpu.pipeline_mode<synchronous>, transform_indices = @transform_10, window_bounds = array<i64: 32, 64>}, {pipeline_mode = #tpu.pipeline_mode<synchronous>, transform_indices = @transform_11, window_bounds = array<i64: 1, 64>}, {pipeline_mode = #tpu.pipeline_mode<synchronous>, transform_indices = @transform_12, window_bounds = array<i64: 32, 32>}, {pipeline_mode = #tpu.pipeline_mode<synchronous>, transform_indices = @transform_13, window_bounds = array<i64: 1, 32>}, {pipeline_mode = #tpu.pipeline_mode<synchronous>, transform_indices = @transform_14, window_bounds = array<i64: 32, 64>}, {pipeline_mode = #tpu.pipeline_mode<synchronous>, transform_indices = @transform_15, window_bounds = array<i64: 1, 64>}, {pipeline_mode = #tpu.pipeline_mode<synchronous>, transform_indices = @transform_16, window_bounds = array<i64: 64, 32>}, {pipeline_mode = #tpu.pipeline_mode<synchronous>, transform_indices = @transform_17, window_bounds = array<i64: 1, 32>}, {pipeline_mode = #tpu.pipeline_mode<synchronous>, transform_indices = @transform_18, window_bounds = array<i64: 3, 32>}, {pipeline_mode = #tpu.pipeline_mode<synchronous>, transform_indices = @transform_19, window_bounds = array<i64: 3, 32>}, {transform_indices = @transform_20, window_bounds = array<i64: 1, 8, 32>}]} {
    %c0 = arith.constant 0 : index
    %c0_0 = arith.constant 0 : index
    %c0_1 = arith.constant 0 : index
    %0 = vector.load %arg1[%c0, %c0_0, %c0_1] : memref<1x8x32xf32, #tpu.memory_space<vmem>>, vector<1x8x32xf32>
    %1 = vector.shape_cast %0 : vector<1x8x32xf32> to vector<8x32xf32>
    %c0_2 = arith.constant 0 : index
    %c0_3 = arith.constant 0 : index
    %c0_4 = arith.constant 0 : index
    %2 = vector.load %arg3[%c0_2, %c0_3, %c0_4] : memref<1x8x8xf32, #tpu.memory_space<vmem>>, vector<1x8x8xf32>
    %3 = vector.shape_cast %2 : vector<1x8x8xf32> to vector<8x8xf32>
    %c0_5 = arith.constant 0 : index
    %c0_6 = arith.constant 0 : index
    %c0_7 = arith.constant 0 : index
    %4 = vector.load %arg4[%c0_5, %c0_6, %c0_7] : memref<1x8x10xf32, #tpu.memory_space<vmem>>, vector<1x8x10xf32>
    %5 = vector.shape_cast %4 : vector<1x8x10xf32> to vector<8x10xf32>
    %c0_8 = arith.constant 0 : index
    %c0_9 = arith.constant 0 : index
    %c0_10 = arith.constant 0 : index
    %6 = vector.load %arg2[%c0_8, %c0_9, %c0_10] : memref<1x10x32xf32, #tpu.memory_space<vmem>>, vector<1x10x32xf32>
    %7 = vector.shape_cast %6 : vector<1x10x32xf32> to vector<10x32xf32>
    %c0_11 = arith.constant 0 : index
    %c0_12 = arith.constant 0 : index
    %8 = vector.load %arg11[%c0_11, %c0_12] : memref<32x64xbf16, #tpu.memory_space<vmem>>, vector<32x64xbf16>
    %c0_13 = arith.constant 0 : index
    %c0_14 = arith.constant 0 : index
    %9 = vector.load %arg12[%c0_13, %c0_14] : memref<1x64xf32, #tpu.memory_space<vmem>>, vector<1x64xf32>
    %10 = arith.truncf %7 : vector<10x32xf32> to vector<10x32xbf16>
    %cst = arith.constant dense<0.000000e+00> : vector<10x64xf32>
    %11 = tpu.matmul %10, %8, %cst {dimension_numbers = #tpu.dot_dimension_numbers<[1], [0], [0], [1], [0, 0, 1, 1], [], []>} : vector<10x32xbf16>, vector<32x64xbf16>, vector<10x64xf32> -> vector<10x64xf32>
    %12 = vector.broadcast %9 : vector<1x64xf32> to vector<10x64xf32>
    %13 = arith.addf %11, %12 : vector<10x64xf32>
    %c0_15 = arith.constant 0 : index
    %c0_16 = arith.constant 0 : index
    %14 = vector.load %arg19[%c0_15, %c0_16] : memref<3x32xf32, #tpu.memory_space<vmem>>, vector<1x32xf32>
    %c0_17 = arith.constant 0 : index
    %c0_18 = arith.constant 0 : index
    %15 = vector.load %arg20[%c0_17, %c0_18] : memref<3x32xf32, #tpu.memory_space<vmem>>, vector<1x32xf32>
    %cst_19 = arith.constant dense<0.000000e+00> : vector<8xf32>
    %16 = vector.multi_reduction <add>, %1, %cst_19 [1] : vector<8x32xf32> to vector<8xf32>
    %17 = vector.shape_cast %16 : vector<8xf32> to vector<8x1xf32>
    %cst_20 = arith.constant 3.200000e+01 : f32
    %18 = vector.broadcast %cst_20 : f32 to vector<8x1xf32>
    %19 = arith.divf %17, %18 : vector<8x1xf32>
    %20 = vector.broadcast %19 : vector<8x1xf32> to vector<8x32xf32>
    %21 = arith.subf %1, %20 : vector<8x32xf32>
    %22 = arith.mulf %21, %21 : vector<8x32xf32>
    %cst_21 = arith.constant dense<0.000000e+00> : vector<8xf32>
    %23 = vector.multi_reduction <add>, %22, %cst_21 [1] : vector<8x32xf32> to vector<8xf32>
    %24 = vector.shape_cast %23 : vector<8xf32> to vector<8x1xf32>
    %cst_22 = arith.constant 3.200000e+01 : f32
    %25 = vector.broadcast %cst_22 : f32 to vector<8x1xf32>
    %26 = arith.divf %24, %25 : vector<8x1xf32>
    %27 = vector.broadcast %19 : vector<8x1xf32> to vector<8x32xf32>
    %28 = arith.subf %1, %27 : vector<8x32xf32>
    %cst_23 = arith.constant 9.99999997E-7 : f32
    %29 = vector.broadcast %cst_23 : f32 to vector<8x1xf32>
    %30 = arith.addf %26, %29 : vector<8x1xf32>
    %31 = math.rsqrt %30 : vector<8x1xf32>
    %32 = vector.broadcast %31 : vector<8x1xf32> to vector<8x32xf32>
    %33 = arith.mulf %28, %32 : vector<8x32xf32>
    %34 = vector.broadcast %14 : vector<1x32xf32> to vector<8x32xf32>
    %35 = arith.mulf %33, %34 : vector<8x32xf32>
    %36 = vector.broadcast %15 : vector<1x32xf32> to vector<8x32xf32>
    %37 = arith.addf %35, %36 : vector<8x32xf32>
    %c0_24 = arith.constant 0 : index
    %c0_25 = arith.constant 0 : index
    %38 = vector.load %arg5[%c0_24, %c0_25] : memref<32x96xbf16, #tpu.memory_space<vmem>>, vector<32x96xbf16>
    %c0_26 = arith.constant 0 : index
    %c0_27 = arith.constant 0 : index
    %39 = vector.load %arg6[%c0_26, %c0_27] : memref<1x96xf32, #tpu.memory_space<vmem>>, vector<1x96xf32>
    %40 = arith.truncf %37 : vector<8x32xf32> to vector<8x32xbf16>
    %cst_28 = arith.constant dense<0.000000e+00> : vector<8x96xf32>
    %41 = tpu.matmul %40, %38, %cst_28 {dimension_numbers = #tpu.dot_dimension_numbers<[1], [0], [0], [1], [0, 0, 1, 1], [], []>} : vector<8x32xbf16>, vector<32x96xbf16>, vector<8x96xf32> -> vector<8x96xf32>
    %42 = vector.broadcast %39 : vector<1x96xf32> to vector<8x96xf32>
    %43 = arith.addf %41, %42 : vector<8x96xf32>
    %44 = vector.extract_strided_slice %43 {offsets = [0, 0], sizes = [8, 32], strides = [1, 1]} : vector<8x96xf32> to vector<8x32xf32>
    %45 = vector.extract_strided_slice %43 {offsets = [0, 32], sizes = [8, 64], strides = [1, 1]} : vector<8x96xf32> to vector<8x64xf32>
    %46 = vector.extract_strided_slice %44 {offsets = [0, 0], sizes = [8, 8], strides = [1, 1]} : vector<8x32xf32> to vector<8x8xf32>
    %47 = arith.truncf %46 : vector<8x8xf32> to vector<8x8xbf16>
    %48 = vector.extract_strided_slice %45 {offsets = [0, 0], sizes = [8, 8], strides = [1, 1]} : vector<8x64xf32> to vector<8x8xf32>
    %49 = arith.truncf %48 : vector<8x8xf32> to vector<8x8xbf16>
    %50 = vector.extract_strided_slice %45 {offsets = [0, 32], sizes = [8, 8], strides = [1, 1]} : vector<8x64xf32> to vector<8x8xf32>
    %51 = arith.truncf %50 : vector<8x8xf32> to vector<8x8xbf16>
    %cst_29 = arith.constant dense<0.000000e+00> : vector<8x8xf32>
    %52 = tpu.matmul %47, %49, %cst_29 {dimension_numbers = #tpu.dot_dimension_numbers<[1], [1], [0], [0], [0, 0, 1, 0], [], []>} : vector<8x8xbf16>, vector<8x8xbf16>, vector<8x8xf32> -> vector<8x8xf32>
    %cst_30 = arith.constant 0.353553385 : f32
    %53 = vector.broadcast %cst_30 : f32 to vector<8x8xf32>
    %54 = arith.mulf %52, %53 : vector<8x8xf32>
    %55 = arith.addf %54, %3 : vector<8x8xf32>
    %cst_31 = arith.constant dense<0xFF800000> : vector<8xf32>
    %56 = vector.multi_reduction <maximumf>, %55, %cst_31 [1] : vector<8x8xf32> to vector<8xf32>
    %57 = vector.shape_cast %56 : vector<8xf32> to vector<8x1xf32>
    %58 = vector.broadcast %57 : vector<8x1xf32> to vector<8x8xf32>
    %59 = arith.subf %55, %58 : vector<8x8xf32>
    %60 = math.exp %59 : vector<8x8xf32>
    %cst_32 = arith.constant dense<0.000000e+00> : vector<8xf32>
    %61 = vector.multi_reduction <add>, %60, %cst_32 [1] : vector<8x8xf32> to vector<8xf32>
    %62 = vector.shape_cast %61 : vector<8xf32> to vector<8x1xf32>
    %63 = tpu.reciprocal %62 {approx = true} : vector<8x1xf32> -> vector<8x1xf32>
    %64 = vector.broadcast %63 : vector<8x1xf32> to vector<8x8xf32>
    %65 = arith.mulf %60, %64 : vector<8x8xf32>
    %66 = arith.truncf %65 : vector<8x8xf32> to vector<8x8xbf16>
    %cst_33 = arith.constant dense<0.000000e+00> : vector<8x8xf32>
    %67 = tpu.matmul %66, %51, %cst_33 {dimension_numbers = #tpu.dot_dimension_numbers<[1], [0], [0], [1], [0, 0, 1, 1], [], []>} : vector<8x8xbf16>, vector<8x8xbf16>, vector<8x8xf32> -> vector<8x8xf32>
    %68 = vector.extract_strided_slice %44 {offsets = [0, 8], sizes = [8, 8], strides = [1, 1]} : vector<8x32xf32> to vector<8x8xf32>
    %69 = arith.truncf %68 : vector<8x8xf32> to vector<8x8xbf16>
    %70 = vector.extract_strided_slice %45 {offsets = [0, 8], sizes = [8, 8], strides = [1, 1]} : vector<8x64xf32> to vector<8x8xf32>
    %71 = arith.truncf %70 : vector<8x8xf32> to vector<8x8xbf16>
    %72 = vector.extract_strided_slice %45 {offsets = [0, 40], sizes = [8, 8], strides = [1, 1]} : vector<8x64xf32> to vector<8x8xf32>
    %73 = arith.truncf %72 : vector<8x8xf32> to vector<8x8xbf16>
    %cst_34 = arith.constant dense<0.000000e+00> : vector<8x8xf32>
    %74 = tpu.matmul %69, %71, %cst_34 {dimension_numbers = #tpu.dot_dimension_numbers<[1], [1], [0], [0], [0, 0, 1, 0], [], []>} : vector<8x8xbf16>, vector<8x8xbf16>, vector<8x8xf32> -> vector<8x8xf32>
    %cst_35 = arith.constant 0.353553385 : f32
    %75 = vector.broadcast %cst_35 : f32 to vector<8x8xf32>
    %76 = arith.mulf %74, %75 : vector<8x8xf32>
    %77 = arith.addf %76, %3 : vector<8x8xf32>
    %cst_36 = arith.constant dense<0xFF800000> : vector<8xf32>
    %78 = vector.multi_reduction <maximumf>, %77, %cst_36 [1] : vector<8x8xf32> to vector<8xf32>
    %79 = vector.shape_cast %78 : vector<8xf32> to vector<8x1xf32>
    %80 = vector.broadcast %79 : vector<8x1xf32> to vector<8x8xf32>
    %81 = arith.subf %77, %80 : vector<8x8xf32>
    %82 = math.exp %81 : vector<8x8xf32>
    %cst_37 = arith.constant dense<0.000000e+00> : vector<8xf32>
    %83 = vector.multi_reduction <add>, %82, %cst_37 [1] : vector<8x8xf32> to vector<8xf32>
    %84 = vector.shape_cast %83 : vector<8xf32> to vector<8x1xf32>
    %85 = tpu.reciprocal %84 {approx = true} : vector<8x1xf32> -> vector<8x1xf32>
    %86 = vector.broadcast %85 : vector<8x1xf32> to vector<8x8xf32>
    %87 = arith.mulf %82, %86 : vector<8x8xf32>
    %88 = arith.truncf %87 : vector<8x8xf32> to vector<8x8xbf16>
    %cst_38 = arith.constant dense<0.000000e+00> : vector<8x8xf32>
    %89 = tpu.matmul %88, %73, %cst_38 {dimension_numbers = #tpu.dot_dimension_numbers<[1], [0], [0], [1], [0, 0, 1, 1], [], []>} : vector<8x8xbf16>, vector<8x8xbf16>, vector<8x8xf32> -> vector<8x8xf32>
    %90 = vector.extract_strided_slice %44 {offsets = [0, 16], sizes = [8, 8], strides = [1, 1]} : vector<8x32xf32> to vector<8x8xf32>
    %91 = arith.truncf %90 : vector<8x8xf32> to vector<8x8xbf16>
    %92 = vector.extract_strided_slice %45 {offsets = [0, 16], sizes = [8, 8], strides = [1, 1]} : vector<8x64xf32> to vector<8x8xf32>
    %93 = arith.truncf %92 : vector<8x8xf32> to vector<8x8xbf16>
    %94 = vector.extract_strided_slice %45 {offsets = [0, 48], sizes = [8, 8], strides = [1, 1]} : vector<8x64xf32> to vector<8x8xf32>
    %95 = arith.truncf %94 : vector<8x8xf32> to vector<8x8xbf16>
    %cst_39 = arith.constant dense<0.000000e+00> : vector<8x8xf32>
    %96 = tpu.matmul %91, %93, %cst_39 {dimension_numbers = #tpu.dot_dimension_numbers<[1], [1], [0], [0], [0, 0, 1, 0], [], []>} : vector<8x8xbf16>, vector<8x8xbf16>, vector<8x8xf32> -> vector<8x8xf32>
    %cst_40 = arith.constant 0.353553385 : f32
    %97 = vector.broadcast %cst_40 : f32 to vector<8x8xf32>
    %98 = arith.mulf %96, %97 : vector<8x8xf32>
    %99 = arith.addf %98, %3 : vector<8x8xf32>
    %cst_41 = arith.constant dense<0xFF800000> : vector<8xf32>
    %100 = vector.multi_reduction <maximumf>, %99, %cst_41 [1] : vector<8x8xf32> to vector<8xf32>
    %101 = vector.shape_cast %100 : vector<8xf32> to vector<8x1xf32>
    %102 = vector.broadcast %101 : vector<8x1xf32> to vector<8x8xf32>
    %103 = arith.subf %99, %102 : vector<8x8xf32>
    %104 = math.exp %103 : vector<8x8xf32>
    %cst_42 = arith.constant dense<0.000000e+00> : vector<8xf32>
    %105 = vector.multi_reduction <add>, %104, %cst_42 [1] : vector<8x8xf32> to vector<8xf32>
    %106 = vector.shape_cast %105 : vector<8xf32> to vector<8x1xf32>
    %107 = tpu.reciprocal %106 {approx = true} : vector<8x1xf32> -> vector<8x1xf32>
    %108 = vector.broadcast %107 : vector<8x1xf32> to vector<8x8xf32>
    %109 = arith.mulf %104, %108 : vector<8x8xf32>
    %110 = arith.truncf %109 : vector<8x8xf32> to vector<8x8xbf16>
    %cst_43 = arith.constant dense<0.000000e+00> : vector<8x8xf32>
    %111 = tpu.matmul %110, %95, %cst_43 {dimension_numbers = #tpu.dot_dimension_numbers<[1], [0], [0], [1], [0, 0, 1, 1], [], []>} : vector<8x8xbf16>, vector<8x8xbf16>, vector<8x8xf32> -> vector<8x8xf32>
    %112 = vector.extract_strided_slice %44 {offsets = [0, 24], sizes = [8, 8], strides = [1, 1]} : vector<8x32xf32> to vector<8x8xf32>
    %113 = arith.truncf %112 : vector<8x8xf32> to vector<8x8xbf16>
    %114 = vector.extract_strided_slice %45 {offsets = [0, 24], sizes = [8, 8], strides = [1, 1]} : vector<8x64xf32> to vector<8x8xf32>
    %115 = arith.truncf %114 : vector<8x8xf32> to vector<8x8xbf16>
    %116 = vector.extract_strided_slice %45 {offsets = [0, 56], sizes = [8, 8], strides = [1, 1]} : vector<8x64xf32> to vector<8x8xf32>
    %117 = arith.truncf %116 : vector<8x8xf32> to vector<8x8xbf16>
    %cst_44 = arith.constant dense<0.000000e+00> : vector<8x8xf32>
    %118 = tpu.matmul %113, %115, %cst_44 {dimension_numbers = #tpu.dot_dimension_numbers<[1], [1], [0], [0], [0, 0, 1, 0], [], []>} : vector<8x8xbf16>, vector<8x8xbf16>, vector<8x8xf32> -> vector<8x8xf32>
    %cst_45 = arith.constant 0.353553385 : f32
    %119 = vector.broadcast %cst_45 : f32 to vector<8x8xf32>
    %120 = arith.mulf %118, %119 : vector<8x8xf32>
    %121 = arith.addf %120, %3 : vector<8x8xf32>
    %cst_46 = arith.constant dense<0xFF800000> : vector<8xf32>
    %122 = vector.multi_reduction <maximumf>, %121, %cst_46 [1] : vector<8x8xf32> to vector<8xf32>
    %123 = vector.shape_cast %122 : vector<8xf32> to vector<8x1xf32>
    %124 = vector.broadcast %123 : vector<8x1xf32> to vector<8x8xf32>
    %125 = arith.subf %121, %124 : vector<8x8xf32>
    %126 = math.exp %125 : vector<8x8xf32>
    %cst_47 = arith.constant dense<0.000000e+00> : vector<8xf32>
    %127 = vector.multi_reduction <add>, %126, %cst_47 [1] : vector<8x8xf32> to vector<8xf32>
    %128 = vector.shape_cast %127 : vector<8xf32> to vector<8x1xf32>
    %129 = tpu.reciprocal %128 {approx = true} : vector<8x1xf32> -> vector<8x1xf32>
    %130 = vector.broadcast %129 : vector<8x1xf32> to vector<8x8xf32>
    %131 = arith.mulf %126, %130 : vector<8x8xf32>
    %132 = arith.truncf %131 : vector<8x8xf32> to vector<8x8xbf16>
    %cst_48 = arith.constant dense<0.000000e+00> : vector<8x8xf32>
    %133 = tpu.matmul %132, %117, %cst_48 {dimension_numbers = #tpu.dot_dimension_numbers<[1], [0], [0], [1], [0, 0, 1, 1], [], []>} : vector<8x8xbf16>, vector<8x8xbf16>, vector<8x8xf32> -> vector<8x8xf32>
    %134 = tpu.concatenate %67, %89, %111, %133 in 1 : vector<8x8xf32>, vector<8x8xf32>, vector<8x8xf32>, vector<8x8xf32> -> vector<8x32xf32>
    %c0_49 = arith.constant 0 : index
    %c0_50 = arith.constant 0 : index
    %135 = vector.load %arg7[%c0_49, %c0_50] : memref<32x32xbf16, #tpu.memory_space<vmem>>, vector<32x32xbf16>
    %c0_51 = arith.constant 0 : index
    %c0_52 = arith.constant 0 : index
    %136 = vector.load %arg8[%c0_51, %c0_52] : memref<1x32xf32, #tpu.memory_space<vmem>>, vector<1x32xf32>
    %137 = arith.truncf %134 : vector<8x32xf32> to vector<8x32xbf16>
    %cst_53 = arith.constant dense<0.000000e+00> : vector<8x32xf32>
    %138 = tpu.matmul %137, %135, %cst_53 {dimension_numbers = #tpu.dot_dimension_numbers<[1], [0], [0], [1], [0, 0, 1, 1], [], []>} : vector<8x32xbf16>, vector<32x32xbf16>, vector<8x32xf32> -> vector<8x32xf32>
    %139 = vector.broadcast %136 : vector<1x32xf32> to vector<8x32xf32>
    %140 = arith.addf %138, %139 : vector<8x32xf32>
    %141 = arith.addf %1, %140 : vector<8x32xf32>
    %c1 = arith.constant 1 : index
    %c0_54 = arith.constant 0 : index
    %142 = vector.load %arg19[%c1, %c0_54] : memref<3x32xf32, #tpu.memory_space<vmem>>, vector<1x32xf32>
    %c1_55 = arith.constant 1 : index
    %c0_56 = arith.constant 0 : index
    %143 = vector.load %arg20[%c1_55, %c0_56] : memref<3x32xf32, #tpu.memory_space<vmem>>, vector<1x32xf32>
    %cst_57 = arith.constant dense<0.000000e+00> : vector<8xf32>
    %144 = vector.multi_reduction <add>, %141, %cst_57 [1] : vector<8x32xf32> to vector<8xf32>
    %145 = vector.shape_cast %144 : vector<8xf32> to vector<8x1xf32>
    %cst_58 = arith.constant 3.200000e+01 : f32
    %146 = vector.broadcast %cst_58 : f32 to vector<8x1xf32>
    %147 = arith.divf %145, %146 : vector<8x1xf32>
    %148 = vector.broadcast %147 : vector<8x1xf32> to vector<8x32xf32>
    %149 = arith.subf %141, %148 : vector<8x32xf32>
    %150 = arith.mulf %149, %149 : vector<8x32xf32>
    %cst_59 = arith.constant dense<0.000000e+00> : vector<8xf32>
    %151 = vector.multi_reduction <add>, %150, %cst_59 [1] : vector<8x32xf32> to vector<8xf32>
    %152 = vector.shape_cast %151 : vector<8xf32> to vector<8x1xf32>
    %cst_60 = arith.constant 3.200000e+01 : f32
    %153 = vector.broadcast %cst_60 : f32 to vector<8x1xf32>
    %154 = arith.divf %152, %153 : vector<8x1xf32>
    %155 = vector.broadcast %147 : vector<8x1xf32> to vector<8x32xf32>
    %156 = arith.subf %141, %155 : vector<8x32xf32>
    %cst_61 = arith.constant 9.99999997E-7 : f32
    %157 = vector.broadcast %cst_61 : f32 to vector<8x1xf32>
    %158 = arith.addf %154, %157 : vector<8x1xf32>
    %159 = math.rsqrt %158 : vector<8x1xf32>
    %160 = vector.broadcast %159 : vector<8x1xf32> to vector<8x32xf32>
    %161 = arith.mulf %156, %160 : vector<8x32xf32>
    %162 = vector.broadcast %142 : vector<1x32xf32> to vector<8x32xf32>
    %163 = arith.mulf %161, %162 : vector<8x32xf32>
    %164 = vector.broadcast %143 : vector<1x32xf32> to vector<8x32xf32>
    %165 = arith.addf %163, %164 : vector<8x32xf32>
    %c0_62 = arith.constant 0 : index
    %c0_63 = arith.constant 0 : index
    %166 = vector.load %arg9[%c0_62, %c0_63] : memref<32x32xbf16, #tpu.memory_space<vmem>>, vector<32x32xbf16>
    %c0_64 = arith.constant 0 : index
    %c0_65 = arith.constant 0 : index
    %167 = vector.load %arg10[%c0_64, %c0_65] : memref<1x32xf32, #tpu.memory_space<vmem>>, vector<1x32xf32>
    %168 = arith.truncf %165 : vector<8x32xf32> to vector<8x32xbf16>
    %cst_66 = arith.constant dense<0.000000e+00> : vector<8x32xf32>
    %169 = tpu.matmul %168, %166, %cst_66 {dimension_numbers = #tpu.dot_dimension_numbers<[1], [0], [0], [1], [0, 0, 1, 1], [], []>} : vector<8x32xbf16>, vector<32x32xbf16>, vector<8x32xf32> -> vector<8x32xf32>
    %170 = vector.broadcast %167 : vector<1x32xf32> to vector<8x32xf32>
    %171 = arith.addf %169, %170 : vector<8x32xf32>
    %172 = vector.extract_strided_slice %171 {offsets = [0, 0], sizes = [8, 8], strides = [1, 1]} : vector<8x32xf32> to vector<8x8xf32>
    %173 = arith.truncf %172 : vector<8x8xf32> to vector<8x8xbf16>
    %174 = vector.extract_strided_slice %13 {offsets = [0, 0], sizes = [10, 8], strides = [1, 1]} : vector<10x64xf32> to vector<10x8xf32>
    %175 = arith.truncf %174 : vector<10x8xf32> to vector<10x8xbf16>
    %176 = vector.extract_strided_slice %13 {offsets = [0, 32], sizes = [10, 8], strides = [1, 1]} : vector<10x64xf32> to vector<10x8xf32>
    %177 = arith.truncf %176 : vector<10x8xf32> to vector<10x8xbf16>
    %cst_67 = arith.constant dense<0.000000e+00> : vector<8x10xf32>
    %178 = tpu.matmul %173, %175, %cst_67 {dimension_numbers = #tpu.dot_dimension_numbers<[1], [1], [0], [0], [0, 0, 1, 0], [], []>} : vector<8x8xbf16>, vector<10x8xbf16>, vector<8x10xf32> -> vector<8x10xf32>
    %cst_68 = arith.constant 0.353553385 : f32
    %179 = vector.broadcast %cst_68 : f32 to vector<8x10xf32>
    %180 = arith.mulf %178, %179 : vector<8x10xf32>
    %181 = arith.addf %180, %5 : vector<8x10xf32>
    %cst_69 = arith.constant dense<0xFF800000> : vector<8xf32>
    %182 = vector.multi_reduction <maximumf>, %181, %cst_69 [1] : vector<8x10xf32> to vector<8xf32>
    %183 = vector.shape_cast %182 : vector<8xf32> to vector<8x1xf32>
    %184 = vector.broadcast %183 : vector<8x1xf32> to vector<8x10xf32>
    %185 = arith.subf %181, %184 : vector<8x10xf32>
    %186 = math.exp %185 : vector<8x10xf32>
    %cst_70 = arith.constant dense<0.000000e+00> : vector<8xf32>
    %187 = vector.multi_reduction <add>, %186, %cst_70 [1] : vector<8x10xf32> to vector<8xf32>
    %188 = vector.shape_cast %187 : vector<8xf32> to vector<8x1xf32>
    %189 = tpu.reciprocal %188 {approx = true} : vector<8x1xf32> -> vector<8x1xf32>
    %190 = vector.broadcast %189 : vector<8x1xf32> to vector<8x10xf32>
    %191 = arith.mulf %186, %190 : vector<8x10xf32>
    %192 = arith.truncf %191 : vector<8x10xf32> to vector<8x10xbf16>
    %cst_71 = arith.constant dense<0.000000e+00> : vector<8x8xf32>
    %193 = tpu.matmul %192, %177, %cst_71 {dimension_numbers = #tpu.dot_dimension_numbers<[1], [0], [0], [1], [0, 0, 1, 1], [], []>} : vector<8x10xbf16>, vector<10x8xbf16>, vector<8x8xf32> -> vector<8x8xf32>
    %194 = vector.extract_strided_slice %171 {offsets = [0, 8], sizes = [8, 8], strides = [1, 1]} : vector<8x32xf32> to vector<8x8xf32>
    %195 = arith.truncf %194 : vector<8x8xf32> to vector<8x8xbf16>
    %196 = vector.extract_strided_slice %13 {offsets = [0, 8], sizes = [10, 8], strides = [1, 1]} : vector<10x64xf32> to vector<10x8xf32>
    %197 = arith.truncf %196 : vector<10x8xf32> to vector<10x8xbf16>
    %198 = vector.extract_strided_slice %13 {offsets = [0, 40], sizes = [10, 8], strides = [1, 1]} : vector<10x64xf32> to vector<10x8xf32>
    %199 = arith.truncf %198 : vector<10x8xf32> to vector<10x8xbf16>
    %cst_72 = arith.constant dense<0.000000e+00> : vector<8x10xf32>
    %200 = tpu.matmul %195, %197, %cst_72 {dimension_numbers = #tpu.dot_dimension_numbers<[1], [1], [0], [0], [0, 0, 1, 0], [], []>} : vector<8x8xbf16>, vector<10x8xbf16>, vector<8x10xf32> -> vector<8x10xf32>
    %cst_73 = arith.constant 0.353553385 : f32
    %201 = vector.broadcast %cst_73 : f32 to vector<8x10xf32>
    %202 = arith.mulf %200, %201 : vector<8x10xf32>
    %203 = arith.addf %202, %5 : vector<8x10xf32>
    %cst_74 = arith.constant dense<0xFF800000> : vector<8xf32>
    %204 = vector.multi_reduction <maximumf>, %203, %cst_74 [1] : vector<8x10xf32> to vector<8xf32>
    %205 = vector.shape_cast %204 : vector<8xf32> to vector<8x1xf32>
    %206 = vector.broadcast %205 : vector<8x1xf32> to vector<8x10xf32>
    %207 = arith.subf %203, %206 : vector<8x10xf32>
    %208 = math.exp %207 : vector<8x10xf32>
    %cst_75 = arith.constant dense<0.000000e+00> : vector<8xf32>
    %209 = vector.multi_reduction <add>, %208, %cst_75 [1] : vector<8x10xf32> to vector<8xf32>
    %210 = vector.shape_cast %209 : vector<8xf32> to vector<8x1xf32>
    %211 = tpu.reciprocal %210 {approx = true} : vector<8x1xf32> -> vector<8x1xf32>
    %212 = vector.broadcast %211 : vector<8x1xf32> to vector<8x10xf32>
    %213 = arith.mulf %208, %212 : vector<8x10xf32>
    %214 = arith.truncf %213 : vector<8x10xf32> to vector<8x10xbf16>
    %cst_76 = arith.constant dense<0.000000e+00> : vector<8x8xf32>
    %215 = tpu.matmul %214, %199, %cst_76 {dimension_numbers = #tpu.dot_dimension_numbers<[1], [0], [0], [1], [0, 0, 1, 1], [], []>} : vector<8x10xbf16>, vector<10x8xbf16>, vector<8x8xf32> -> vector<8x8xf32>
    %216 = vector.extract_strided_slice %171 {offsets = [0, 16], sizes = [8, 8], strides = [1, 1]} : vector<8x32xf32> to vector<8x8xf32>
    %217 = arith.truncf %216 : vector<8x8xf32> to vector<8x8xbf16>
    %218 = vector.extract_strided_slice %13 {offsets = [0, 16], sizes = [10, 8], strides = [1, 1]} : vector<10x64xf32> to vector<10x8xf32>
    %219 = arith.truncf %218 : vector<10x8xf32> to vector<10x8xbf16>
    %220 = vector.extract_strided_slice %13 {offsets = [0, 48], sizes = [10, 8], strides = [1, 1]} : vector<10x64xf32> to vector<10x8xf32>
    %221 = arith.truncf %220 : vector<10x8xf32> to vector<10x8xbf16>
    %cst_77 = arith.constant dense<0.000000e+00> : vector<8x10xf32>
    %222 = tpu.matmul %217, %219, %cst_77 {dimension_numbers = #tpu.dot_dimension_numbers<[1], [1], [0], [0], [0, 0, 1, 0], [], []>} : vector<8x8xbf16>, vector<10x8xbf16>, vector<8x10xf32> -> vector<8x10xf32>
    %cst_78 = arith.constant 0.353553385 : f32
    %223 = vector.broadcast %cst_78 : f32 to vector<8x10xf32>
    %224 = arith.mulf %222, %223 : vector<8x10xf32>
    %225 = arith.addf %224, %5 : vector<8x10xf32>
    %cst_79 = arith.constant dense<0xFF800000> : vector<8xf32>
    %226 = vector.multi_reduction <maximumf>, %225, %cst_79 [1] : vector<8x10xf32> to vector<8xf32>
    %227 = vector.shape_cast %226 : vector<8xf32> to vector<8x1xf32>
    %228 = vector.broadcast %227 : vector<8x1xf32> to vector<8x10xf32>
    %229 = arith.subf %225, %228 : vector<8x10xf32>
    %230 = math.exp %229 : vector<8x10xf32>
    %cst_80 = arith.constant dense<0.000000e+00> : vector<8xf32>
    %231 = vector.multi_reduction <add>, %230, %cst_80 [1] : vector<8x10xf32> to vector<8xf32>
    %232 = vector.shape_cast %231 : vector<8xf32> to vector<8x1xf32>
    %233 = tpu.reciprocal %232 {approx = true} : vector<8x1xf32> -> vector<8x1xf32>
    %234 = vector.broadcast %233 : vector<8x1xf32> to vector<8x10xf32>
    %235 = arith.mulf %230, %234 : vector<8x10xf32>
    %236 = arith.truncf %235 : vector<8x10xf32> to vector<8x10xbf16>
    %cst_81 = arith.constant dense<0.000000e+00> : vector<8x8xf32>
    %237 = tpu.matmul %236, %221, %cst_81 {dimension_numbers = #tpu.dot_dimension_numbers<[1], [0], [0], [1], [0, 0, 1, 1], [], []>} : vector<8x10xbf16>, vector<10x8xbf16>, vector<8x8xf32> -> vector<8x8xf32>
    %238 = vector.extract_strided_slice %171 {offsets = [0, 24], sizes = [8, 8], strides = [1, 1]} : vector<8x32xf32> to vector<8x8xf32>
    %239 = arith.truncf %238 : vector<8x8xf32> to vector<8x8xbf16>
    %240 = vector.extract_strided_slice %13 {offsets = [0, 24], sizes = [10, 8], strides = [1, 1]} : vector<10x64xf32> to vector<10x8xf32>
    %241 = arith.truncf %240 : vector<10x8xf32> to vector<10x8xbf16>
    %242 = vector.extract_strided_slice %13 {offsets = [0, 56], sizes = [10, 8], strides = [1, 1]} : vector<10x64xf32> to vector<10x8xf32>
    %243 = arith.truncf %242 : vector<10x8xf32> to vector<10x8xbf16>
    %cst_82 = arith.constant dense<0.000000e+00> : vector<8x10xf32>
    %244 = tpu.matmul %239, %241, %cst_82 {dimension_numbers = #tpu.dot_dimension_numbers<[1], [1], [0], [0], [0, 0, 1, 0], [], []>} : vector<8x8xbf16>, vector<10x8xbf16>, vector<8x10xf32> -> vector<8x10xf32>
    %cst_83 = arith.constant 0.353553385 : f32
    %245 = vector.broadcast %cst_83 : f32 to vector<8x10xf32>
    %246 = arith.mulf %244, %245 : vector<8x10xf32>
    %247 = arith.addf %246, %5 : vector<8x10xf32>
    %cst_84 = arith.constant dense<0xFF800000> : vector<8xf32>
    %248 = vector.multi_reduction <maximumf>, %247, %cst_84 [1] : vector<8x10xf32> to vector<8xf32>
    %249 = vector.shape_cast %248 : vector<8xf32> to vector<8x1xf32>
    %250 = vector.broadcast %249 : vector<8x1xf32> to vector<8x10xf32>
    %251 = arith.subf %247, %250 : vector<8x10xf32>
    %252 = math.exp %251 : vector<8x10xf32>
    %cst_85 = arith.constant dense<0.000000e+00> : vector<8xf32>
    %253 = vector.multi_reduction <add>, %252, %cst_85 [1] : vector<8x10xf32> to vector<8xf32>
    %254 = vector.shape_cast %253 : vector<8xf32> to vector<8x1xf32>
    %255 = tpu.reciprocal %254 {approx = true} : vector<8x1xf32> -> vector<8x1xf32>
    %256 = vector.broadcast %255 : vector<8x1xf32> to vector<8x10xf32>
    %257 = arith.mulf %252, %256 : vector<8x10xf32>
    %258 = arith.truncf %257 : vector<8x10xf32> to vector<8x10xbf16>
    %cst_86 = arith.constant dense<0.000000e+00> : vector<8x8xf32>
    %259 = tpu.matmul %258, %243, %cst_86 {dimension_numbers = #tpu.dot_dimension_numbers<[1], [0], [0], [1], [0, 0, 1, 1], [], []>} : vector<8x10xbf16>, vector<10x8xbf16>, vector<8x8xf32> -> vector<8x8xf32>
    %260 = tpu.concatenate %193, %215, %237, %259 in 1 : vector<8x8xf32>, vector<8x8xf32>, vector<8x8xf32>, vector<8x8xf32> -> vector<8x32xf32>
    %c0_87 = arith.constant 0 : index
    %c0_88 = arith.constant 0 : index
    %261 = vector.load %arg13[%c0_87, %c0_88] : memref<32x32xbf16, #tpu.memory_space<vmem>>, vector<32x32xbf16>
    %c0_89 = arith.constant 0 : index
    %c0_90 = arith.constant 0 : index
    %262 = vector.load %arg14[%c0_89, %c0_90] : memref<1x32xf32, #tpu.memory_space<vmem>>, vector<1x32xf32>
    %263 = arith.truncf %260 : vector<8x32xf32> to vector<8x32xbf16>
    %cst_91 = arith.constant dense<0.000000e+00> : vector<8x32xf32>
    %264 = tpu.matmul %263, %261, %cst_91 {dimension_numbers = #tpu.dot_dimension_numbers<[1], [0], [0], [1], [0, 0, 1, 1], [], []>} : vector<8x32xbf16>, vector<32x32xbf16>, vector<8x32xf32> -> vector<8x32xf32>
    %265 = vector.broadcast %262 : vector<1x32xf32> to vector<8x32xf32>
    %266 = arith.addf %264, %265 : vector<8x32xf32>
    %267 = arith.addf %141, %266 : vector<8x32xf32>
    %c2 = arith.constant 2 : index
    %c0_92 = arith.constant 0 : index
    %268 = vector.load %arg19[%c2, %c0_92] : memref<3x32xf32, #tpu.memory_space<vmem>>, vector<1x32xf32>
    %c2_93 = arith.constant 2 : index
    %c0_94 = arith.constant 0 : index
    %269 = vector.load %arg20[%c2_93, %c0_94] : memref<3x32xf32, #tpu.memory_space<vmem>>, vector<1x32xf32>
    %cst_95 = arith.constant dense<0.000000e+00> : vector<8xf32>
    %270 = vector.multi_reduction <add>, %267, %cst_95 [1] : vector<8x32xf32> to vector<8xf32>
    %271 = vector.shape_cast %270 : vector<8xf32> to vector<8x1xf32>
    %cst_96 = arith.constant 3.200000e+01 : f32
    %272 = vector.broadcast %cst_96 : f32 to vector<8x1xf32>
    %273 = arith.divf %271, %272 : vector<8x1xf32>
    %274 = vector.broadcast %273 : vector<8x1xf32> to vector<8x32xf32>
    %275 = arith.subf %267, %274 : vector<8x32xf32>
    %276 = arith.mulf %275, %275 : vector<8x32xf32>
    %cst_97 = arith.constant dense<0.000000e+00> : vector<8xf32>
    %277 = vector.multi_reduction <add>, %276, %cst_97 [1] : vector<8x32xf32> to vector<8xf32>
    %278 = vector.shape_cast %277 : vector<8xf32> to vector<8x1xf32>
    %cst_98 = arith.constant 3.200000e+01 : f32
    %279 = vector.broadcast %cst_98 : f32 to vector<8x1xf32>
    %280 = arith.divf %278, %279 : vector<8x1xf32>
    %281 = vector.broadcast %273 : vector<8x1xf32> to vector<8x32xf32>
    %282 = arith.subf %267, %281 : vector<8x32xf32>
    %cst_99 = arith.constant 9.99999997E-7 : f32
    %283 = vector.broadcast %cst_99 : f32 to vector<8x1xf32>
    %284 = arith.addf %280, %283 : vector<8x1xf32>
    %285 = math.rsqrt %284 : vector<8x1xf32>
    %286 = vector.broadcast %285 : vector<8x1xf32> to vector<8x32xf32>
    %287 = arith.mulf %282, %286 : vector<8x32xf32>
    %288 = vector.broadcast %268 : vector<1x32xf32> to vector<8x32xf32>
    %289 = arith.mulf %287, %288 : vector<8x32xf32>
    %290 = vector.broadcast %269 : vector<1x32xf32> to vector<8x32xf32>
    %291 = arith.addf %289, %290 : vector<8x32xf32>
    %c0_100 = arith.constant 0 : index
    %c0_101 = arith.constant 0 : index
    %292 = vector.load %arg15[%c0_100, %c0_101] : memref<32x64xbf16, #tpu.memory_space<vmem>>, vector<32x64xbf16>
    %c0_102 = arith.constant 0 : index
    %c0_103 = arith.constant 0 : index
    %293 = vector.load %arg16[%c0_102, %c0_103] : memref<1x64xf32, #tpu.memory_space<vmem>>, vector<1x64xf32>
    %294 = arith.truncf %291 : vector<8x32xf32> to vector<8x32xbf16>
    %cst_104 = arith.constant dense<0.000000e+00> : vector<8x64xf32>
    %295 = tpu.matmul %294, %292, %cst_104 {dimension_numbers = #tpu.dot_dimension_numbers<[1], [0], [0], [1], [0, 0, 1, 1], [], []>} : vector<8x32xbf16>, vector<32x64xbf16>, vector<8x64xf32> -> vector<8x64xf32>
    %296 = vector.broadcast %293 : vector<1x64xf32> to vector<8x64xf32>
    %297 = arith.addf %295, %296 : vector<8x64xf32>
    %cst_105 = arith.constant 0.000000e+00 : f32
    %298 = vector.broadcast %cst_105 : f32 to vector<8x64xf32>
    %299 = arith.maximumf %297, %298 : vector<8x64xf32>
    %c0_106 = arith.constant 0 : index
    %c0_107 = arith.constant 0 : index
    %300 = vector.load %arg17[%c0_106, %c0_107] : memref<64x32xbf16, #tpu.memory_space<vmem>>, vector<64x32xbf16>
    %c0_108 = arith.constant 0 : index
    %c0_109 = arith.constant 0 : index
    %301 = vector.load %arg18[%c0_108, %c0_109] : memref<1x32xf32, #tpu.memory_space<vmem>>, vector<1x32xf32>
    %302 = arith.truncf %299 : vector<8x64xf32> to vector<8x64xbf16>
    %cst_110 = arith.constant dense<0.000000e+00> : vector<8x32xf32>
    %303 = tpu.matmul %302, %300, %cst_110 {dimension_numbers = #tpu.dot_dimension_numbers<[1], [0], [0], [1], [0, 0, 1, 1], [], []>} : vector<8x64xbf16>, vector<64x32xbf16>, vector<8x32xf32> -> vector<8x32xf32>
    %304 = vector.broadcast %301 : vector<1x32xf32> to vector<8x32xf32>
    %305 = arith.addf %303, %304 : vector<8x32xf32>
    %306 = arith.addf %267, %305 : vector<8x32xf32>
    %c0_111 = arith.constant 0 : index
    %c0_112 = arith.constant 0 : index
    %307 = vector.load %arg19[%c0_111, %c0_112] : memref<3x32xf32, #tpu.memory_space<vmem>>, vector<1x32xf32>
    %c0_113 = arith.constant 0 : index
    %c0_114 = arith.constant 0 : index
    %308 = vector.load %arg20[%c0_113, %c0_114] : memref<3x32xf32, #tpu.memory_space<vmem>>, vector<1x32xf32>
    %cst_115 = arith.constant dense<0.000000e+00> : vector<8xf32>
    %309 = vector.multi_reduction <add>, %306, %cst_115 [1] : vector<8x32xf32> to vector<8xf32>
    %310 = vector.shape_cast %309 : vector<8xf32> to vector<8x1xf32>
    %cst_116 = arith.constant 3.200000e+01 : f32
    %311 = vector.broadcast %cst_116 : f32 to vector<8x1xf32>
    %312 = arith.divf %310, %311 : vector<8x1xf32>
    %313 = vector.broadcast %312 : vector<8x1xf32> to vector<8x32xf32>
    %314 = arith.subf %306, %313 : vector<8x32xf32>
    %315 = arith.mulf %314, %314 : vector<8x32xf32>
    %cst_117 = arith.constant dense<0.000000e+00> : vector<8xf32>
    %316 = vector.multi_reduction <add>, %315, %cst_117 [1] : vector<8x32xf32> to vector<8xf32>
    %317 = vector.shape_cast %316 : vector<8xf32> to vector<8x1xf32>
    %cst_118 = arith.constant 3.200000e+01 : f32
    %318 = vector.broadcast %cst_118 : f32 to vector<8x1xf32>
    %319 = arith.divf %317, %318 : vector<8x1xf32>
    %320 = vector.broadcast %312 : vector<8x1xf32> to vector<8x32xf32>
    %321 = arith.subf %306, %320 : vector<8x32xf32>
    %cst_119 = arith.constant 9.99999997E-7 : f32
    %322 = vector.broadcast %cst_119 : f32 to vector<8x1xf32>
    %323 = arith.addf %319, %322 : vector<8x1xf32>
    %324 = math.rsqrt %323 : vector<8x1xf32>
    %325 = vector.broadcast %324 : vector<8x1xf32> to vector<8x32xf32>
    %326 = arith.mulf %321, %325 : vector<8x32xf32>
    %327 = vector.broadcast %307 : vector<1x32xf32> to vector<8x32xf32>
    %328 = arith.mulf %326, %327 : vector<8x32xf32>
    %329 = vector.broadcast %308 : vector<1x32xf32> to vector<8x32xf32>
    %330 = arith.addf %328, %329 : vector<8x32xf32>
    %c0_120 = arith.constant 0 : index
    %c0_121 = arith.constant 0 : index
    %331 = vector.load %arg5[%c0_120, %c0_121] : memref<32x96xbf16, #tpu.memory_space<vmem>>, vector<32x96xbf16>
    %c0_122 = arith.constant 0 : index
    %c0_123 = arith.constant 0 : index
    %332 = vector.load %arg6[%c0_122, %c0_123] : memref<1x96xf32, #tpu.memory_space<vmem>>, vector<1x96xf32>
    %333 = arith.truncf %330 : vector<8x32xf32> to vector<8x32xbf16>
    %cst_124 = arith.constant dense<0.000000e+00> : vector<8x96xf32>
    %334 = tpu.matmul %333, %331, %cst_124 {dimension_numbers = #tpu.dot_dimension_numbers<[1], [0], [0], [1], [0, 0, 1, 1], [], []>} : vector<8x32xbf16>, vector<32x96xbf16>, vector<8x96xf32> -> vector<8x96xf32>
    %335 = vector.broadcast %332 : vector<1x96xf32> to vector<8x96xf32>
    %336 = arith.addf %334, %335 : vector<8x96xf32>
    %337 = vector.extract_strided_slice %336 {offsets = [0, 0], sizes = [8, 32], strides = [1, 1]} : vector<8x96xf32> to vector<8x32xf32>
    %338 = vector.extract_strided_slice %336 {offsets = [0, 32], sizes = [8, 64], strides = [1, 1]} : vector<8x96xf32> to vector<8x64xf32>
    %339 = vector.extract_strided_slice %337 {offsets = [0, 0], sizes = [8, 8], strides = [1, 1]} : vector<8x32xf32> to vector<8x8xf32>
    %340 = arith.truncf %339 : vector<8x8xf32> to vector<8x8xbf16>
    %341 = vector.extract_strided_slice %338 {offsets = [0, 0], sizes = [8, 8], strides = [1, 1]} : vector<8x64xf32> to vector<8x8xf32>
    %342 = arith.truncf %341 : vector<8x8xf32> to vector<8x8xbf16>
    %343 = vector.extract_strided_slice %338 {offsets = [0, 32], sizes = [8, 8], strides = [1, 1]} : vector<8x64xf32> to vector<8x8xf32>
    %344 = arith.truncf %343 : vector<8x8xf32> to vector<8x8xbf16>
    %cst_125 = arith.constant dense<0.000000e+00> : vector<8x8xf32>
    %345 = tpu.matmul %340, %342, %cst_125 {dimension_numbers = #tpu.dot_dimension_numbers<[1], [1], [0], [0], [0, 0, 1, 0], [], []>} : vector<8x8xbf16>, vector<8x8xbf16>, vector<8x8xf32> -> vector<8x8xf32>
    %cst_126 = arith.constant 0.353553385 : f32
    %346 = vector.broadcast %cst_126 : f32 to vector<8x8xf32>
    %347 = arith.mulf %345, %346 : vector<8x8xf32>
    %348 = arith.addf %347, %3 : vector<8x8xf32>
    %cst_127 = arith.constant dense<0xFF800000> : vector<8xf32>
    %349 = vector.multi_reduction <maximumf>, %348, %cst_127 [1] : vector<8x8xf32> to vector<8xf32>
    %350 = vector.shape_cast %349 : vector<8xf32> to vector<8x1xf32>
    %351 = vector.broadcast %350 : vector<8x1xf32> to vector<8x8xf32>
    %352 = arith.subf %348, %351 : vector<8x8xf32>
    %353 = math.exp %352 : vector<8x8xf32>
    %cst_128 = arith.constant dense<0.000000e+00> : vector<8xf32>
    %354 = vector.multi_reduction <add>, %353, %cst_128 [1] : vector<8x8xf32> to vector<8xf32>
    %355 = vector.shape_cast %354 : vector<8xf32> to vector<8x1xf32>
    %356 = tpu.reciprocal %355 {approx = true} : vector<8x1xf32> -> vector<8x1xf32>
    %357 = vector.broadcast %356 : vector<8x1xf32> to vector<8x8xf32>
    %358 = arith.mulf %353, %357 : vector<8x8xf32>
    %359 = arith.truncf %358 : vector<8x8xf32> to vector<8x8xbf16>
    %cst_129 = arith.constant dense<0.000000e+00> : vector<8x8xf32>
    %360 = tpu.matmul %359, %344, %cst_129 {dimension_numbers = #tpu.dot_dimension_numbers<[1], [0], [0], [1], [0, 0, 1, 1], [], []>} : vector<8x8xbf16>, vector<8x8xbf16>, vector<8x8xf32> -> vector<8x8xf32>
    %361 = vector.extract_strided_slice %337 {offsets = [0, 8], sizes = [8, 8], strides = [1, 1]} : vector<8x32xf32> to vector<8x8xf32>
    %362 = arith.truncf %361 : vector<8x8xf32> to vector<8x8xbf16>
    %363 = vector.extract_strided_slice %338 {offsets = [0, 8], sizes = [8, 8], strides = [1, 1]} : vector<8x64xf32> to vector<8x8xf32>
    %364 = arith.truncf %363 : vector<8x8xf32> to vector<8x8xbf16>
    %365 = vector.extract_strided_slice %338 {offsets = [0, 40], sizes = [8, 8], strides = [1, 1]} : vector<8x64xf32> to vector<8x8xf32>
    %366 = arith.truncf %365 : vector<8x8xf32> to vector<8x8xbf16>
    %cst_130 = arith.constant dense<0.000000e+00> : vector<8x8xf32>
    %367 = tpu.matmul %362, %364, %cst_130 {dimension_numbers = #tpu.dot_dimension_numbers<[1], [1], [0], [0], [0, 0, 1, 0], [], []>} : vector<8x8xbf16>, vector<8x8xbf16>, vector<8x8xf32> -> vector<8x8xf32>
    %cst_131 = arith.constant 0.353553385 : f32
    %368 = vector.broadcast %cst_131 : f32 to vector<8x8xf32>
    %369 = arith.mulf %367, %368 : vector<8x8xf32>
    %370 = arith.addf %369, %3 : vector<8x8xf32>
    %cst_132 = arith.constant dense<0xFF800000> : vector<8xf32>
    %371 = vector.multi_reduction <maximumf>, %370, %cst_132 [1] : vector<8x8xf32> to vector<8xf32>
    %372 = vector.shape_cast %371 : vector<8xf32> to vector<8x1xf32>
    %373 = vector.broadcast %372 : vector<8x1xf32> to vector<8x8xf32>
    %374 = arith.subf %370, %373 : vector<8x8xf32>
    %375 = math.exp %374 : vector<8x8xf32>
    %cst_133 = arith.constant dense<0.000000e+00> : vector<8xf32>
    %376 = vector.multi_reduction <add>, %375, %cst_133 [1] : vector<8x8xf32> to vector<8xf32>
    %377 = vector.shape_cast %376 : vector<8xf32> to vector<8x1xf32>
    %378 = tpu.reciprocal %377 {approx = true} : vector<8x1xf32> -> vector<8x1xf32>
    %379 = vector.broadcast %378 : vector<8x1xf32> to vector<8x8xf32>
    %380 = arith.mulf %375, %379 : vector<8x8xf32>
    %381 = arith.truncf %380 : vector<8x8xf32> to vector<8x8xbf16>
    %cst_134 = arith.constant dense<0.000000e+00> : vector<8x8xf32>
    %382 = tpu.matmul %381, %366, %cst_134 {dimension_numbers = #tpu.dot_dimension_numbers<[1], [0], [0], [1], [0, 0, 1, 1], [], []>} : vector<8x8xbf16>, vector<8x8xbf16>, vector<8x8xf32> -> vector<8x8xf32>
    %383 = vector.extract_strided_slice %337 {offsets = [0, 16], sizes = [8, 8], strides = [1, 1]} : vector<8x32xf32> to vector<8x8xf32>
    %384 = arith.truncf %383 : vector<8x8xf32> to vector<8x8xbf16>
    %385 = vector.extract_strided_slice %338 {offsets = [0, 16], sizes = [8, 8], strides = [1, 1]} : vector<8x64xf32> to vector<8x8xf32>
    %386 = arith.truncf %385 : vector<8x8xf32> to vector<8x8xbf16>
    %387 = vector.extract_strided_slice %338 {offsets = [0, 48], sizes = [8, 8], strides = [1, 1]} : vector<8x64xf32> to vector<8x8xf32>
    %388 = arith.truncf %387 : vector<8x8xf32> to vector<8x8xbf16>
    %cst_135 = arith.constant dense<0.000000e+00> : vector<8x8xf32>
    %389 = tpu.matmul %384, %386, %cst_135 {dimension_numbers = #tpu.dot_dimension_numbers<[1], [1], [0], [0], [0, 0, 1, 0], [], []>} : vector<8x8xbf16>, vector<8x8xbf16>, vector<8x8xf32> -> vector<8x8xf32>
    %cst_136 = arith.constant 0.353553385 : f32
    %390 = vector.broadcast %cst_136 : f32 to vector<8x8xf32>
    %391 = arith.mulf %389, %390 : vector<8x8xf32>
    %392 = arith.addf %391, %3 : vector<8x8xf32>
    %cst_137 = arith.constant dense<0xFF800000> : vector<8xf32>
    %393 = vector.multi_reduction <maximumf>, %392, %cst_137 [1] : vector<8x8xf32> to vector<8xf32>
    %394 = vector.shape_cast %393 : vector<8xf32> to vector<8x1xf32>
    %395 = vector.broadcast %394 : vector<8x1xf32> to vector<8x8xf32>
    %396 = arith.subf %392, %395 : vector<8x8xf32>
    %397 = math.exp %396 : vector<8x8xf32>
    %cst_138 = arith.constant dense<0.000000e+00> : vector<8xf32>
    %398 = vector.multi_reduction <add>, %397, %cst_138 [1] : vector<8x8xf32> to vector<8xf32>
    %399 = vector.shape_cast %398 : vector<8xf32> to vector<8x1xf32>
    %400 = tpu.reciprocal %399 {approx = true} : vector<8x1xf32> -> vector<8x1xf32>
    %401 = vector.broadcast %400 : vector<8x1xf32> to vector<8x8xf32>
    %402 = arith.mulf %397, %401 : vector<8x8xf32>
    %403 = arith.truncf %402 : vector<8x8xf32> to vector<8x8xbf16>
    %cst_139 = arith.constant dense<0.000000e+00> : vector<8x8xf32>
    %404 = tpu.matmul %403, %388, %cst_139 {dimension_numbers = #tpu.dot_dimension_numbers<[1], [0], [0], [1], [0, 0, 1, 1], [], []>} : vector<8x8xbf16>, vector<8x8xbf16>, vector<8x8xf32> -> vector<8x8xf32>
    %405 = vector.extract_strided_slice %337 {offsets = [0, 24], sizes = [8, 8], strides = [1, 1]} : vector<8x32xf32> to vector<8x8xf32>
    %406 = arith.truncf %405 : vector<8x8xf32> to vector<8x8xbf16>
    %407 = vector.extract_strided_slice %338 {offsets = [0, 24], sizes = [8, 8], strides = [1, 1]} : vector<8x64xf32> to vector<8x8xf32>
    %408 = arith.truncf %407 : vector<8x8xf32> to vector<8x8xbf16>
    %409 = vector.extract_strided_slice %338 {offsets = [0, 56], sizes = [8, 8], strides = [1, 1]} : vector<8x64xf32> to vector<8x8xf32>
    %410 = arith.truncf %409 : vector<8x8xf32> to vector<8x8xbf16>
    %cst_140 = arith.constant dense<0.000000e+00> : vector<8x8xf32>
    %411 = tpu.matmul %406, %408, %cst_140 {dimension_numbers = #tpu.dot_dimension_numbers<[1], [1], [0], [0], [0, 0, 1, 0], [], []>} : vector<8x8xbf16>, vector<8x8xbf16>, vector<8x8xf32> -> vector<8x8xf32>
    %cst_141 = arith.constant 0.353553385 : f32
    %412 = vector.broadcast %cst_141 : f32 to vector<8x8xf32>
    %413 = arith.mulf %411, %412 : vector<8x8xf32>
    %414 = arith.addf %413, %3 : vector<8x8xf32>
    %cst_142 = arith.constant dense<0xFF800000> : vector<8xf32>
    %415 = vector.multi_reduction <maximumf>, %414, %cst_142 [1] : vector<8x8xf32> to vector<8xf32>
    %416 = vector.shape_cast %415 : vector<8xf32> to vector<8x1xf32>
    %417 = vector.broadcast %416 : vector<8x1xf32> to vector<8x8xf32>
    %418 = arith.subf %414, %417 : vector<8x8xf32>
    %419 = math.exp %418 : vector<8x8xf32>
    %cst_143 = arith.constant dense<0.000000e+00> : vector<8xf32>
    %420 = vector.multi_reduction <add>, %419, %cst_143 [1] : vector<8x8xf32> to vector<8xf32>
    %421 = vector.shape_cast %420 : vector<8xf32> to vector<8x1xf32>
    %422 = tpu.reciprocal %421 {approx = true} : vector<8x1xf32> -> vector<8x1xf32>
    %423 = vector.broadcast %422 : vector<8x1xf32> to vector<8x8xf32>
    %424 = arith.mulf %419, %423 : vector<8x8xf32>
    %425 = arith.truncf %424 : vector<8x8xf32> to vector<8x8xbf16>
    %cst_144 = arith.constant dense<0.000000e+00> : vector<8x8xf32>
    %426 = tpu.matmul %425, %410, %cst_144 {dimension_numbers = #tpu.dot_dimension_numbers<[1], [0], [0], [1], [0, 0, 1, 1], [], []>} : vector<8x8xbf16>, vector<8x8xbf16>, vector<8x8xf32> -> vector<8x8xf32>
    %427 = tpu.concatenate %360, %382, %404, %426 in 1 : vector<8x8xf32>, vector<8x8xf32>, vector<8x8xf32>, vector<8x8xf32> -> vector<8x32xf32>
    %c0_145 = arith.constant 0 : index
    %c0_146 = arith.constant 0 : index
    %428 = vector.load %arg7[%c0_145, %c0_146] : memref<32x32xbf16, #tpu.memory_space<vmem>>, vector<32x32xbf16>
    %c0_147 = arith.constant 0 : index
    %c0_148 = arith.constant 0 : index
    %429 = vector.load %arg8[%c0_147, %c0_148] : memref<1x32xf32, #tpu.memory_space<vmem>>, vector<1x32xf32>
    %430 = arith.truncf %427 : vector<8x32xf32> to vector<8x32xbf16>
    %cst_149 = arith.constant dense<0.000000e+00> : vector<8x32xf32>
    %431 = tpu.matmul %430, %428, %cst_149 {dimension_numbers = #tpu.dot_dimension_numbers<[1], [0], [0], [1], [0, 0, 1, 1], [], []>} : vector<8x32xbf16>, vector<32x32xbf16>, vector<8x32xf32> -> vector<8x32xf32>
    %432 = vector.broadcast %429 : vector<1x32xf32> to vector<8x32xf32>
    %433 = arith.addf %431, %432 : vector<8x32xf32>
    %434 = arith.addf %306, %433 : vector<8x32xf32>
    %c1_150 = arith.constant 1 : index
    %c0_151 = arith.constant 0 : index
    %435 = vector.load %arg19[%c1_150, %c0_151] : memref<3x32xf32, #tpu.memory_space<vmem>>, vector<1x32xf32>
    %c1_152 = arith.constant 1 : index
    %c0_153 = arith.constant 0 : index
    %436 = vector.load %arg20[%c1_152, %c0_153] : memref<3x32xf32, #tpu.memory_space<vmem>>, vector<1x32xf32>
    %cst_154 = arith.constant dense<0.000000e+00> : vector<8xf32>
    %437 = vector.multi_reduction <add>, %434, %cst_154 [1] : vector<8x32xf32> to vector<8xf32>
    %438 = vector.shape_cast %437 : vector<8xf32> to vector<8x1xf32>
    %cst_155 = arith.constant 3.200000e+01 : f32
    %439 = vector.broadcast %cst_155 : f32 to vector<8x1xf32>
    %440 = arith.divf %438, %439 : vector<8x1xf32>
    %441 = vector.broadcast %440 : vector<8x1xf32> to vector<8x32xf32>
    %442 = arith.subf %434, %441 : vector<8x32xf32>
    %443 = arith.mulf %442, %442 : vector<8x32xf32>
    %cst_156 = arith.constant dense<0.000000e+00> : vector<8xf32>
    %444 = vector.multi_reduction <add>, %443, %cst_156 [1] : vector<8x32xf32> to vector<8xf32>
    %445 = vector.shape_cast %444 : vector<8xf32> to vector<8x1xf32>
    %cst_157 = arith.constant 3.200000e+01 : f32
    %446 = vector.broadcast %cst_157 : f32 to vector<8x1xf32>
    %447 = arith.divf %445, %446 : vector<8x1xf32>
    %448 = vector.broadcast %440 : vector<8x1xf32> to vector<8x32xf32>
    %449 = arith.subf %434, %448 : vector<8x32xf32>
    %cst_158 = arith.constant 9.99999997E-7 : f32
    %450 = vector.broadcast %cst_158 : f32 to vector<8x1xf32>
    %451 = arith.addf %447, %450 : vector<8x1xf32>
    %452 = math.rsqrt %451 : vector<8x1xf32>
    %453 = vector.broadcast %452 : vector<8x1xf32> to vector<8x32xf32>
    %454 = arith.mulf %449, %453 : vector<8x32xf32>
    %455 = vector.broadcast %435 : vector<1x32xf32> to vector<8x32xf32>
    %456 = arith.mulf %454, %455 : vector<8x32xf32>
    %457 = vector.broadcast %436 : vector<1x32xf32> to vector<8x32xf32>
    %458 = arith.addf %456, %457 : vector<8x32xf32>
    %c0_159 = arith.constant 0 : index
    %c0_160 = arith.constant 0 : index
    %459 = vector.load %arg9[%c0_159, %c0_160] : memref<32x32xbf16, #tpu.memory_space<vmem>>, vector<32x32xbf16>
    %c0_161 = arith.constant 0 : index
    %c0_162 = arith.constant 0 : index
    %460 = vector.load %arg10[%c0_161, %c0_162] : memref<1x32xf32, #tpu.memory_space<vmem>>, vector<1x32xf32>
    %461 = arith.truncf %458 : vector<8x32xf32> to vector<8x32xbf16>
    %cst_163 = arith.constant dense<0.000000e+00> : vector<8x32xf32>
    %462 = tpu.matmul %461, %459, %cst_163 {dimension_numbers = #tpu.dot_dimension_numbers<[1], [0], [0], [1], [0, 0, 1, 1], [], []>} : vector<8x32xbf16>, vector<32x32xbf16>, vector<8x32xf32> -> vector<8x32xf32>
    %463 = vector.broadcast %460 : vector<1x32xf32> to vector<8x32xf32>
    %464 = arith.addf %462, %463 : vector<8x32xf32>
    %465 = vector.extract_strided_slice %464 {offsets = [0, 0], sizes = [8, 8], strides = [1, 1]} : vector<8x32xf32> to vector<8x8xf32>
    %466 = arith.truncf %465 : vector<8x8xf32> to vector<8x8xbf16>
    %467 = vector.extract_strided_slice %13 {offsets = [0, 0], sizes = [10, 8], strides = [1, 1]} : vector<10x64xf32> to vector<10x8xf32>
    %468 = arith.truncf %467 : vector<10x8xf32> to vector<10x8xbf16>
    %469 = vector.extract_strided_slice %13 {offsets = [0, 32], sizes = [10, 8], strides = [1, 1]} : vector<10x64xf32> to vector<10x8xf32>
    %470 = arith.truncf %469 : vector<10x8xf32> to vector<10x8xbf16>
    %cst_164 = arith.constant dense<0.000000e+00> : vector<8x10xf32>
    %471 = tpu.matmul %466, %468, %cst_164 {dimension_numbers = #tpu.dot_dimension_numbers<[1], [1], [0], [0], [0, 0, 1, 0], [], []>} : vector<8x8xbf16>, vector<10x8xbf16>, vector<8x10xf32> -> vector<8x10xf32>
    %cst_165 = arith.constant 0.353553385 : f32
    %472 = vector.broadcast %cst_165 : f32 to vector<8x10xf32>
    %473 = arith.mulf %471, %472 : vector<8x10xf32>
    %474 = arith.addf %473, %5 : vector<8x10xf32>
    %cst_166 = arith.constant dense<0xFF800000> : vector<8xf32>
    %475 = vector.multi_reduction <maximumf>, %474, %cst_166 [1] : vector<8x10xf32> to vector<8xf32>
    %476 = vector.shape_cast %475 : vector<8xf32> to vector<8x1xf32>
    %477 = vector.broadcast %476 : vector<8x1xf32> to vector<8x10xf32>
    %478 = arith.subf %474, %477 : vector<8x10xf32>
    %479 = math.exp %478 : vector<8x10xf32>
    %cst_167 = arith.constant dense<0.000000e+00> : vector<8xf32>
    %480 = vector.multi_reduction <add>, %479, %cst_167 [1] : vector<8x10xf32> to vector<8xf32>
    %481 = vector.shape_cast %480 : vector<8xf32> to vector<8x1xf32>
    %482 = tpu.reciprocal %481 {approx = true} : vector<8x1xf32> -> vector<8x1xf32>
    %483 = vector.broadcast %482 : vector<8x1xf32> to vector<8x10xf32>
    %484 = arith.mulf %479, %483 : vector<8x10xf32>
    %485 = arith.truncf %484 : vector<8x10xf32> to vector<8x10xbf16>
    %cst_168 = arith.constant dense<0.000000e+00> : vector<8x8xf32>
    %486 = tpu.matmul %485, %470, %cst_168 {dimension_numbers = #tpu.dot_dimension_numbers<[1], [0], [0], [1], [0, 0, 1, 1], [], []>} : vector<8x10xbf16>, vector<10x8xbf16>, vector<8x8xf32> -> vector<8x8xf32>
    %487 = vector.extract_strided_slice %464 {offsets = [0, 8], sizes = [8, 8], strides = [1, 1]} : vector<8x32xf32> to vector<8x8xf32>
    %488 = arith.truncf %487 : vector<8x8xf32> to vector<8x8xbf16>
    %489 = vector.extract_strided_slice %13 {offsets = [0, 8], sizes = [10, 8], strides = [1, 1]} : vector<10x64xf32> to vector<10x8xf32>
    %490 = arith.truncf %489 : vector<10x8xf32> to vector<10x8xbf16>
    %491 = vector.extract_strided_slice %13 {offsets = [0, 40], sizes = [10, 8], strides = [1, 1]} : vector<10x64xf32> to vector<10x8xf32>
    %492 = arith.truncf %491 : vector<10x8xf32> to vector<10x8xbf16>
    %cst_169 = arith.constant dense<0.000000e+00> : vector<8x10xf32>
    %493 = tpu.matmul %488, %490, %cst_169 {dimension_numbers = #tpu.dot_dimension_numbers<[1], [1], [0], [0], [0, 0, 1, 0], [], []>} : vector<8x8xbf16>, vector<10x8xbf16>, vector<8x10xf32> -> vector<8x10xf32>
    %cst_170 = arith.constant 0.353553385 : f32
    %494 = vector.broadcast %cst_170 : f32 to vector<8x10xf32>
    %495 = arith.mulf %493, %494 : vector<8x10xf32>
    %496 = arith.addf %495, %5 : vector<8x10xf32>
    %cst_171 = arith.constant dense<0xFF800000> : vector<8xf32>
    %497 = vector.multi_reduction <maximumf>, %496, %cst_171 [1] : vector<8x10xf32> to vector<8xf32>
    %498 = vector.shape_cast %497 : vector<8xf32> to vector<8x1xf32>
    %499 = vector.broadcast %498 : vector<8x1xf32> to vector<8x10xf32>
    %500 = arith.subf %496, %499 : vector<8x10xf32>
    %501 = math.exp %500 : vector<8x10xf32>
    %cst_172 = arith.constant dense<0.000000e+00> : vector<8xf32>
    %502 = vector.multi_reduction <add>, %501, %cst_172 [1] : vector<8x10xf32> to vector<8xf32>
    %503 = vector.shape_cast %502 : vector<8xf32> to vector<8x1xf32>
    %504 = tpu.reciprocal %503 {approx = true} : vector<8x1xf32> -> vector<8x1xf32>
    %505 = vector.broadcast %504 : vector<8x1xf32> to vector<8x10xf32>
    %506 = arith.mulf %501, %505 : vector<8x10xf32>
    %507 = arith.truncf %506 : vector<8x10xf32> to vector<8x10xbf16>
    %cst_173 = arith.constant dense<0.000000e+00> : vector<8x8xf32>
    %508 = tpu.matmul %507, %492, %cst_173 {dimension_numbers = #tpu.dot_dimension_numbers<[1], [0], [0], [1], [0, 0, 1, 1], [], []>} : vector<8x10xbf16>, vector<10x8xbf16>, vector<8x8xf32> -> vector<8x8xf32>
    %509 = vector.extract_strided_slice %464 {offsets = [0, 16], sizes = [8, 8], strides = [1, 1]} : vector<8x32xf32> to vector<8x8xf32>
    %510 = arith.truncf %509 : vector<8x8xf32> to vector<8x8xbf16>
    %511 = vector.extract_strided_slice %13 {offsets = [0, 16], sizes = [10, 8], strides = [1, 1]} : vector<10x64xf32> to vector<10x8xf32>
    %512 = arith.truncf %511 : vector<10x8xf32> to vector<10x8xbf16>
    %513 = vector.extract_strided_slice %13 {offsets = [0, 48], sizes = [10, 8], strides = [1, 1]} : vector<10x64xf32> to vector<10x8xf32>
    %514 = arith.truncf %513 : vector<10x8xf32> to vector<10x8xbf16>
    %cst_174 = arith.constant dense<0.000000e+00> : vector<8x10xf32>
    %515 = tpu.matmul %510, %512, %cst_174 {dimension_numbers = #tpu.dot_dimension_numbers<[1], [1], [0], [0], [0, 0, 1, 0], [], []>} : vector<8x8xbf16>, vector<10x8xbf16>, vector<8x10xf32> -> vector<8x10xf32>
    %cst_175 = arith.constant 0.353553385 : f32
    %516 = vector.broadcast %cst_175 : f32 to vector<8x10xf32>
    %517 = arith.mulf %515, %516 : vector<8x10xf32>
    %518 = arith.addf %517, %5 : vector<8x10xf32>
    %cst_176 = arith.constant dense<0xFF800000> : vector<8xf32>
    %519 = vector.multi_reduction <maximumf>, %518, %cst_176 [1] : vector<8x10xf32> to vector<8xf32>
    %520 = vector.shape_cast %519 : vector<8xf32> to vector<8x1xf32>
    %521 = vector.broadcast %520 : vector<8x1xf32> to vector<8x10xf32>
    %522 = arith.subf %518, %521 : vector<8x10xf32>
    %523 = math.exp %522 : vector<8x10xf32>
    %cst_177 = arith.constant dense<0.000000e+00> : vector<8xf32>
    %524 = vector.multi_reduction <add>, %523, %cst_177 [1] : vector<8x10xf32> to vector<8xf32>
    %525 = vector.shape_cast %524 : vector<8xf32> to vector<8x1xf32>
    %526 = tpu.reciprocal %525 {approx = true} : vector<8x1xf32> -> vector<8x1xf32>
    %527 = vector.broadcast %526 : vector<8x1xf32> to vector<8x10xf32>
    %528 = arith.mulf %523, %527 : vector<8x10xf32>
    %529 = arith.truncf %528 : vector<8x10xf32> to vector<8x10xbf16>
    %cst_178 = arith.constant dense<0.000000e+00> : vector<8x8xf32>
    %530 = tpu.matmul %529, %514, %cst_178 {dimension_numbers = #tpu.dot_dimension_numbers<[1], [0], [0], [1], [0, 0, 1, 1], [], []>} : vector<8x10xbf16>, vector<10x8xbf16>, vector<8x8xf32> -> vector<8x8xf32>
    %531 = vector.extract_strided_slice %464 {offsets = [0, 24], sizes = [8, 8], strides = [1, 1]} : vector<8x32xf32> to vector<8x8xf32>
    %532 = arith.truncf %531 : vector<8x8xf32> to vector<8x8xbf16>
    %533 = vector.extract_strided_slice %13 {offsets = [0, 24], sizes = [10, 8], strides = [1, 1]} : vector<10x64xf32> to vector<10x8xf32>
    %534 = arith.truncf %533 : vector<10x8xf32> to vector<10x8xbf16>
    %535 = vector.extract_strided_slice %13 {offsets = [0, 56], sizes = [10, 8], strides = [1, 1]} : vector<10x64xf32> to vector<10x8xf32>
    %536 = arith.truncf %535 : vector<10x8xf32> to vector<10x8xbf16>
    %cst_179 = arith.constant dense<0.000000e+00> : vector<8x10xf32>
    %537 = tpu.matmul %532, %534, %cst_179 {dimension_numbers = #tpu.dot_dimension_numbers<[1], [1], [0], [0], [0, 0, 1, 0], [], []>} : vector<8x8xbf16>, vector<10x8xbf16>, vector<8x10xf32> -> vector<8x10xf32>
    %cst_180 = arith.constant 0.353553385 : f32
    %538 = vector.broadcast %cst_180 : f32 to vector<8x10xf32>
    %539 = arith.mulf %537, %538 : vector<8x10xf32>
    %540 = arith.addf %539, %5 : vector<8x10xf32>
    %cst_181 = arith.constant dense<0xFF800000> : vector<8xf32>
    %541 = vector.multi_reduction <maximumf>, %540, %cst_181 [1] : vector<8x10xf32> to vector<8xf32>
    %542 = vector.shape_cast %541 : vector<8xf32> to vector<8x1xf32>
    %543 = vector.broadcast %542 : vector<8x1xf32> to vector<8x10xf32>
    %544 = arith.subf %540, %543 : vector<8x10xf32>
    %545 = math.exp %544 : vector<8x10xf32>
    %cst_182 = arith.constant dense<0.000000e+00> : vector<8xf32>
    %546 = vector.multi_reduction <add>, %545, %cst_182 [1] : vector<8x10xf32> to vector<8xf32>
    %547 = vector.shape_cast %546 : vector<8xf32> to vector<8x1xf32>
    %548 = tpu.reciprocal %547 {approx = true} : vector<8x1xf32> -> vector<8x1xf32>
    %549 = vector.broadcast %548 : vector<8x1xf32> to vector<8x10xf32>
    %550 = arith.mulf %545, %549 : vector<8x10xf32>
    %551 = arith.truncf %550 : vector<8x10xf32> to vector<8x10xbf16>
    %cst_183 = arith.constant dense<0.000000e+00> : vector<8x8xf32>
    %552 = tpu.matmul %551, %536, %cst_183 {dimension_numbers = #tpu.dot_dimension_numbers<[1], [0], [0], [1], [0, 0, 1, 1], [], []>} : vector<8x10xbf16>, vector<10x8xbf16>, vector<8x8xf32> -> vector<8x8xf32>
    %553 = tpu.concatenate %486, %508, %530, %552 in 1 : vector<8x8xf32>, vector<8x8xf32>, vector<8x8xf32>, vector<8x8xf32> -> vector<8x32xf32>
    %c0_184 = arith.constant 0 : index
    %c0_185 = arith.constant 0 : index
    %554 = vector.load %arg13[%c0_184, %c0_185] : memref<32x32xbf16, #tpu.memory_space<vmem>>, vector<32x32xbf16>
    %c0_186 = arith.constant 0 : index
    %c0_187 = arith.constant 0 : index
    %555 = vector.load %arg14[%c0_186, %c0_187] : memref<1x32xf32, #tpu.memory_space<vmem>>, vector<1x32xf32>
    %556 = arith.truncf %553 : vector<8x32xf32> to vector<8x32xbf16>
    %cst_188 = arith.constant dense<0.000000e+00> : vector<8x32xf32>
    %557 = tpu.matmul %556, %554, %cst_188 {dimension_numbers = #tpu.dot_dimension_numbers<[1], [0], [0], [1], [0, 0, 1, 1], [], []>} : vector<8x32xbf16>, vector<32x32xbf16>, vector<8x32xf32> -> vector<8x32xf32>
    %558 = vector.broadcast %555 : vector<1x32xf32> to vector<8x32xf32>
    %559 = arith.addf %557, %558 : vector<8x32xf32>
    %560 = arith.addf %434, %559 : vector<8x32xf32>
    %c2_189 = arith.constant 2 : index
    %c0_190 = arith.constant 0 : index
    %561 = vector.load %arg19[%c2_189, %c0_190] : memref<3x32xf32, #tpu.memory_space<vmem>>, vector<1x32xf32>
    %c2_191 = arith.constant 2 : index
    %c0_192 = arith.constant 0 : index
    %562 = vector.load %arg20[%c2_191, %c0_192] : memref<3x32xf32, #tpu.memory_space<vmem>>, vector<1x32xf32>
    %cst_193 = arith.constant dense<0.000000e+00> : vector<8xf32>
    %563 = vector.multi_reduction <add>, %560, %cst_193 [1] : vector<8x32xf32> to vector<8xf32>
    %564 = vector.shape_cast %563 : vector<8xf32> to vector<8x1xf32>
    %cst_194 = arith.constant 3.200000e+01 : f32
    %565 = vector.broadcast %cst_194 : f32 to vector<8x1xf32>
    %566 = arith.divf %564, %565 : vector<8x1xf32>
    %567 = vector.broadcast %566 : vector<8x1xf32> to vector<8x32xf32>
    %568 = arith.subf %560, %567 : vector<8x32xf32>
    %569 = arith.mulf %568, %568 : vector<8x32xf32>
    %cst_195 = arith.constant dense<0.000000e+00> : vector<8xf32>
    %570 = vector.multi_reduction <add>, %569, %cst_195 [1] : vector<8x32xf32> to vector<8xf32>
    %571 = vector.shape_cast %570 : vector<8xf32> to vector<8x1xf32>
    %cst_196 = arith.constant 3.200000e+01 : f32
    %572 = vector.broadcast %cst_196 : f32 to vector<8x1xf32>
    %573 = arith.divf %571, %572 : vector<8x1xf32>
    %574 = vector.broadcast %566 : vector<8x1xf32> to vector<8x32xf32>
    %575 = arith.subf %560, %574 : vector<8x32xf32>
    %cst_197 = arith.constant 9.99999997E-7 : f32
    %576 = vector.broadcast %cst_197 : f32 to vector<8x1xf32>
    %577 = arith.addf %573, %576 : vector<8x1xf32>
    %578 = math.rsqrt %577 : vector<8x1xf32>
    %579 = vector.broadcast %578 : vector<8x1xf32> to vector<8x32xf32>
    %580 = arith.mulf %575, %579 : vector<8x32xf32>
    %581 = vector.broadcast %561 : vector<1x32xf32> to vector<8x32xf32>
    %582 = arith.mulf %580, %581 : vector<8x32xf32>
    %583 = vector.broadcast %562 : vector<1x32xf32> to vector<8x32xf32>
    %584 = arith.addf %582, %583 : vector<8x32xf32>
    %c0_198 = arith.constant 0 : index
    %c0_199 = arith.constant 0 : index
    %585 = vector.load %arg15[%c0_198, %c0_199] : memref<32x64xbf16, #tpu.memory_space<vmem>>, vector<32x64xbf16>
    %c0_200 = arith.constant 0 : index
    %c0_201 = arith.constant 0 : index
    %586 = vector.load %arg16[%c0_200, %c0_201] : memref<1x64xf32, #tpu.memory_space<vmem>>, vector<1x64xf32>
    %587 = arith.truncf %584 : vector<8x32xf32> to vector<8x32xbf16>
    %cst_202 = arith.constant dense<0.000000e+00> : vector<8x64xf32>
    %588 = tpu.matmul %587, %585, %cst_202 {dimension_numbers = #tpu.dot_dimension_numbers<[1], [0], [0], [1], [0, 0, 1, 1], [], []>} : vector<8x32xbf16>, vector<32x64xbf16>, vector<8x64xf32> -> vector<8x64xf32>
    %589 = vector.broadcast %586 : vector<1x64xf32> to vector<8x64xf32>
    %590 = arith.addf %588, %589 : vector<8x64xf32>
    %cst_203 = arith.constant 0.000000e+00 : f32
    %591 = vector.broadcast %cst_203 : f32 to vector<8x64xf32>
    %592 = arith.maximumf %590, %591 : vector<8x64xf32>
    %c0_204 = arith.constant 0 : index
    %c0_205 = arith.constant 0 : index
    %593 = vector.load %arg17[%c0_204, %c0_205] : memref<64x32xbf16, #tpu.memory_space<vmem>>, vector<64x32xbf16>
    %c0_206 = arith.constant 0 : index
    %c0_207 = arith.constant 0 : index
    %594 = vector.load %arg18[%c0_206, %c0_207] : memref<1x32xf32, #tpu.memory_space<vmem>>, vector<1x32xf32>
    %595 = arith.truncf %592 : vector<8x64xf32> to vector<8x64xbf16>
    %cst_208 = arith.constant dense<0.000000e+00> : vector<8x32xf32>
    %596 = tpu.matmul %595, %593, %cst_208 {dimension_numbers = #tpu.dot_dimension_numbers<[1], [0], [0], [1], [0, 0, 1, 1], [], []>} : vector<8x64xbf16>, vector<64x32xbf16>, vector<8x32xf32> -> vector<8x32xf32>
    %597 = vector.broadcast %594 : vector<1x32xf32> to vector<8x32xf32>
    %598 = arith.addf %596, %597 : vector<8x32xf32>
    %599 = arith.addf %560, %598 : vector<8x32xf32>
    %c0_209 = arith.constant 0 : index
    %c0_210 = arith.constant 0 : index
    %c0_211 = arith.constant 0 : index
    %600 = vector.load %arg21[%c0_209, %c0_210, %c0_211] : memref<1x8x32xf32, #tpu.memory_space<vmem>>, vector<1x8x32xf32>
    %601 = vector.shape_cast %600 : vector<1x8x32xf32> to vector<8x32xf32>
    %602 = vector.shape_cast %599 : vector<8x32xf32> to vector<1x8x32xf32>
    tpu.vector_store %arg21[%c0_209, %c0_210, %c0_211], %602 {strides = array<i32>} : memref<1x8x32xf32, #tpu.memory_space<vmem>>, vector<1x8x32xf32>,
    return
  }
  func.func @transform_0(%arg0: i32) -> (i32, i32, i32) {
    %c0_i32 = arith.constant 0 : i32
    %c0_i32_0 = arith.constant 0 : i32
    %c0_i32_1 = arith.constant 0 : i32
    return %arg0, %c0_i32, %c0_i32_0 : i32, i32, i32
  }
  func.func @transform_1(%arg0: i32) -> (i32, i32, i32) {
    %c0_i32 = arith.constant 0 : i32
    %c0_i32_0 = arith.constant 0 : i32
    %c0_i32_1 = arith.constant 0 : i32
    return %arg0, %c0_i32, %c0_i32_0 : i32, i32, i32
  }
  func.func @transform_2(%arg0: i32) -> (i32, i32, i32) {
    %c0_i32 = arith.constant 0 : i32
    %c0_i32_0 = arith.constant 0 : i32
    %c0_i32_1 = arith.constant 0 : i32
    return %arg0, %c0_i32, %c0_i32_0 : i32, i32, i32
  }
  func.func @transform_3(%arg0: i32) -> (i32, i32, i32) {
    %c0_i32 = arith.constant 0 : i32
    %c0_i32_0 = arith.constant 0 : i32
    %c0_i32_1 = arith.constant 0 : i32
    return %arg0, %c0_i32, %c0_i32_0 : i32, i32, i32
  }
  func.func @transform_4(%arg0: i32) -> (i32, i32) {
    %c0_i32 = arith.constant 0 : i32
    %c0_i32_0 = arith.constant 0 : i32
    %c0_i32_1 = arith.constant 0 : i32
    return %c0_i32, %c0_i32_0 : i32, i32
  }
  func.func @transform_5(%arg0: i32) -> (i32, i32) {
    %c0_i32 = arith.constant 0 : i32
    %c0_i32_0 = arith.constant 0 : i32
    %c0_i32_1 = arith.constant 0 : i32
    return %c0_i32, %c0_i32_0 : i32, i32
  }
  func.func @transform_6(%arg0: i32) -> (i32, i32) {
    %c0_i32 = arith.constant 0 : i32
    %c0_i32_0 = arith.constant 0 : i32
    %c0_i32_1 = arith.constant 0 : i32
    return %c0_i32, %c0_i32_0 : i32, i32
  }
  func.func @transform_7(%arg0: i32) -> (i32, i32) {
    %c0_i32 = arith.constant 0 : i32
    %c0_i32_0 = arith.constant 0 : i32
    %c0_i32_1 = arith.constant 0 : i32
    return %c0_i32, %c0_i32_0 : i32, i32
  }
  func.func @transform_8(%arg0: i32) -> (i32, i32) {
    %c0_i32 = arith.constant 0 : i32
    %c0_i32_0 = arith.constant 0 : i32
    %c0_i32_1 = arith.constant 0 : i32
    return %c0_i32, %c0_i32_0 : i32, i32
  }
  func.func @transform_9(%arg0: i32) -> (i32, i32) {
    %c0_i32 = arith.constant 0 : i32
    %c0_i32_0 = arith.constant 0 : i32
    %c0_i32_1 = arith.constant 0 : i32
    return %c0_i32, %c0_i32_0 : i32, i32
  }
  func.func @transform_10(%arg0: i32) -> (i32, i32) {
    %c0_i32 = arith.constant 0 : i32
    %c0_i32_0 = arith.constant 0 : i32
    %c0_i32_1 = arith.constant 0 : i32
    return %c0_i32, %c0_i32_0 : i32, i32
  }
  func.func @transform_11(%arg0: i32) -> (i32, i32) {
    %c0_i32 = arith.constant 0 : i32
    %c0_i32_0 = arith.constant 0 : i32
    %c0_i32_1 = arith.constant 0 : i32
    return %c0_i32, %c0_i32_0 : i32, i32
  }
  func.func @transform_12(%arg0: i32) -> (i32, i32) {
    %c0_i32 = arith.constant 0 : i32
    %c0_i32_0 = arith.constant 0 : i32
    %c0_i32_1 = arith.constant 0 : i32
    return %c0_i32, %c0_i32_0 : i32, i32
  }
  func.func @transform_13(%arg0: i32) -> (i32, i32) {
    %c0_i32 = arith.constant 0 : i32
    %c0_i32_0 = arith.constant 0 : i32
    %c0_i32_1 = arith.constant 0 : i32
    return %c0_i32, %c0_i32_0 : i32, i32
  }
  func.func @transform_14(%arg0: i32) -> (i32, i32) {
    %c0_i32 = arith.constant 0 : i32
    %c0_i32_0 = arith.constant 0 : i32
    %c0_i32_1 = arith.constant 0 : i32
    return %c0_i32, %c0_i32_0 : i32, i32
  }
  func.func @transform_15(%arg0: i32) -> (i32, i32) {
    %c0_i32 = arith.constant 0 : i32
    %c0_i32_0 = arith.constant 0 : i32
    %c0_i32_1 = arith.constant 0 : i32
    return %c0_i32, %c0_i32_0 : i32, i32
  }
  func.func @transform_16(%arg0: i32) -> (i32, i32) {
    %c0_i32 = arith.constant 0 : i32
    %c0_i32_0 = arith.constant 0 : i32
    %c0_i32_1 = arith.constant 0 : i32
    return %c0_i32, %c0_i32_0 : i32, i32
  }
  func.func @transform_17(%arg0: i32) -> (i32, i32) {
    %c0_i32 = arith.constant 0 : i32
    %c0_i32_0 = arith.constant 0 : i32
    %c0_i32_1 = arith.constant 0 : i32
    return %c0_i32, %c0_i32_0 : i32, i32
  }
  func.func @transform_18(%arg0: i32) -> (i32, i32) {
    %c0_i32 = arith.constant 0 : i32
    %c0_i32_0 = arith.constant 0 : i32
    %c0_i32_1 = arith.constant 0 : i32
    return %c0_i32, %c0_i32_0 : i32, i32
  }
  func.func @transform_19(%arg0: i32) -> (i32, i32) {
    %c0_i32 = arith.constant 0 : i32
    %c0_i32_0 = arith.constant 0 : i32
    %c0_i32_1 = arith.constant 0 : i32
    return %c0_i32, %c0_i32_0 : i32, i32
  }
  func.func @transform_20(%arg0: i32) -> (i32, i32, i32) {
    %c0_i32 = arith.constant 0 : i32
    %c0_i32_0 = arith.constant 0 : i32
    %c0_i32_1 = arith.constant 0 : i32
    return %arg0, %c0_i32, %c0_i32_0 : i32, i32, i32
  }
}

</mosaic_0001>

<bundles_post_ra>
// kernel: r2l_decoder_forward.1
= control target key start
LH: loop header
LB: loop body
LE: loop exit
PB: predicated region body
PF: predicated region fallthrough
CT: control target
= control target key end

     0   :  { %s3969_s0 = inlined_call_operand.vmem [shape: f32[2,8,32], index: 0, kind: input, shape index: {}]   ;;  %s3970_s1 = inlined_call_operand.vmem [shape: f32[2,10,32], index: 1, kind: input, shape index: {}]   ;;  %s3971_s2 = inlined_call_operand.vmem [shape: f32[2,8,8], index: 2, kind: input, shape index: {}]   ;;  %s3972_s3 = inlined_call_operand.vmem [shape: f32[2,8,10], index: 3, kind: input, shape index: {}]   ;;  %s3973_s4 = inlined_call_operand.vmem [shape: bf16[32,96], index: 4, kind: input, shape index: {}]   ;;  %s3974_s5 = inlined_call_operand.hbm [shape: f32[1,96], index: 5, kind: input, shape index: {}]   ;;  %s3975_s6 = inlined_call_operand.vmem [shape: bf16[32,32], index: 6, kind: input, shape index: {}]   ;;  %s3976_s7 = inlined_call_operand.hbm [shape: f32[1,32], index: 7, kind: input, shape index: {}]   ;;  %s3977_s8 = inlined_call_operand.vmem [shape: bf16[32,32], index: 8, kind: input, shape index: {}]   ;;  %s3978_s9 = inlined_call_operand.vmem [shape: f32[1,32], index: 9, kind: input, shape index: {}]   ;;  %s3979_s10 = inlined_call_operand.vmem [shape: bf16[32,64], index: 10, kind: input, shape index: {}]   ;;  %s3980_s11 = inlined_call_operand.hbm [shape: f32[1,64], index: 11, kind: input, shape index: {}]   ;;  %s3981_s12 = inlined_call_operand.vmem [shape: bf16[32,32], index: 12, kind: input, shape index: {}]   ;;  %s3982_s13 = inlined_call_operand.hbm [shape: f32[1,32], index: 13, kind: input, shape index: {}]   ;;  %s3983_s14 = inlined_call_operand.vmem [shape: bf16[32,64], index: 14, kind: input, shape index: {}]   ;;  %s3984_s15 = inlined_call_operand.hbm [shape: f32[1,64], index: 15, kind: input, shape index: {}]   ;;  %s3985_s16 = inlined_call_operand.vmem [shape: bf16[64,32], index: 16, kind: input, shape index: {}]   ;;  %s3986_s17 = inlined_call_operand.hbm [shape: f32[1,32], index: 17, kind: input, shape index: {}]   ;;  %s3987_s18 = inlined_call_operand.hbm [shape: f32[3,32], index: 18, kind: input, shape index: {}]   ;;  %s3988_s19 = inlined_call_operand.hbm [shape: f32[3,32], index: 19, kind: input, shape index: {}]   ;;  %s3989_s20 = inlined_call_operand.hbm [shape: f32[2,8,32], index: 20, kind: output, shape index: {}]  }
   0x1   :  { %4011 = sst [smem:[#allocation30_spill]] %s3969_s0 }
   0x2   :  { %4012 = sst [smem:[#allocation31_spill]] %s3970_s1 }
   0x3   :  { %4013 = sst [smem:[#allocation32_spill]] %s3971_s2 }
   0x4   :  { %4014 = sst [smem:[#allocation33_spill]] %s3972_s3 }
   0x5   :  { %4015 = sst [smem:[#allocation34_spill]] %s3973_s4 }
   0x6   :  { %4016 = sst [smem:[#allocation35_spill]] %s3976_s7 }
   0x7   :  { %4017 = sst [smem:[#allocation36_spill]] %s3982_s13 }
   0x8   :  { %4018 = sst [smem:[#allocation37_spill]] %s3986_s17 }
   0x9   :  { %25 = vsyncpa [#allocation3], 0 }
   0xa   :  { %26 = vsyncpa [#allocation6], 0 }
   0xb   :  { %27 = vsyncpa [#allocation9], 0 }
   0xc   :  { %28 = vsyncpa [#allocation12], 0 }
   0xd   :  { %29 = vsyncpa [#allocation15], 0 }
   0xe   :  { %30 = vsyncpa [#allocation4], 0 }
   0xf   :  { %32 = vsyncpa [#allocation4 + $0x1], 0  ;;  %s3332_s1 = smov 0   ;;  %s3334_s22 = smov 0  }
  0x10   :  { %s3336_s23 = smov 0   ;;  %s3338_s24 = smov 0  }
  0x11 LB: > { %4019 = sst [smem:[#allocation23_spill]] %s3190_s1  ;;  %s3353_s2 = sadd.s32 4294967295, %s3202_s24   ;;  %s3202_s24 = sphi %s3338_s24, %s4050_s24   ;;  %s3198_s23 = sphi %s3336_s23, %s4052_s23   ;;  %s3194_s22 = sphi %s3334_s22, %s4054_s22   ;;  %s3190_s1 = sphi %s3332_s1, %s4053_s1  }
  0x12   : > { %4020 = sst [smem:[#allocation24_spill]] %s3198_s23  ;;  %s2498_s25 = sadd.s32 4294967294, %s3202_s24  }
  0x13   : > { %4021 = sst [smem:[#allocation25_spill]] %s3202_s24  ;;  %s3357_s3 = sadd.s32 1, %s3202_s24  }
  0x14   : > { %4022 = sst [smem:[#allocation26_spill]] %s3357_s3  ;;  %s485_s26 = sadd.s32 1, %s3198_s23 }
  0x15   : > { %s482_s27 = ssub.s32 %s3202_s24, %s3357_s3  ;;  %p495_p0 = scmp.ne.s32.totalorder %s3198_s23, %s3194_s22 }
  0x16   : > { %p483_p1 = scmp.eq.s32.totalorder %s482_s27, 0  ;;  %p496_p2 = scmp.eq.s32.totalorder %s3353_s2, 1 }
  0x17   : > { %p501_p3 = scmp.ne.s32.totalorder %s3194_s22, %s3190_s1  ;;  %p502_p4 = scmp.eq.s32.totalorder %s2498_s25, 1 }
  0x18   : > { %s3368_s28 = scalar_select %p483_p1, %s3198_s23, %s485_s26  }
  0x19   : > { %p3370_p5 = por %p496_p2, %p495_p0  ;;  %p3374_p6 = por %p502_p4, %p501_p3 }
  0x1a   : > { %4023 = sst [smem:[#allocation27_spill]] %s3368_s28  ;;  %p2499_p7 = scmp.ge.s32.totalorder %s3202_s24, 1 }
  0x1b   : > { %s4024_s4 = scalar_select %p3370_p5, 1, 0 }
  0x1c   : > { %s4026_s29 = scalar_select %p3374_p6, 1, 0 }
  0x1d   : > { %4025 = sst [smem:[#allocation28_spill]] %s4024_s4  ;;  %p509_p8 = scmp.lt.s32.totalorder %s3202_s24, 3 }
  0x1e   : > { %4027 = sst [smem:[#allocation29_spill]] %s4026_s29  ;;  %p2717_p9 = scmp.eq.s32.totalorder %s3353_s2, 0 }
  0x1f   : > { %p3381_p10 = pnand %p2499_p7, %p509_p8  ;;  %s4029_s7 = sld [smem:[#allocation35_spill]] }
  0x20   : > { %s3204_s26 = smov [#allocation5]   ;;  %s4030_s13 = sld [smem:[#allocation36_spill]] }
  0x21   : > { %p2688_p11 = pneg %p3381_p10  ;;  %s541_s27 = sshll.u32 %s3204_s26, 4  ;;  %s542_s27 = int_to_ptr.vmem [resolvable:$true] %s541_s27 }
  0x22   : > { %s4032_s17 = sld [smem:[#allocation37_spill]]  ;;  %s3205_s1 = smov [#allocation8]  }
  0x23   : > { %p3395_p12 = pnand %p2717_p9, %p2688_p11  ;;  %s577_s26 = sshll.u32 %s3205_s1, 4  ;;  %s578_s26 = int_to_ptr.vmem [resolvable:$true] %s577_s26 }
  0x24   : > { %s3206_s24 = smov [#allocation11]   ;;  %s3207_s0 = smov [#allocation2]  }
  0x25   : > { %s539_s25 = sshll.u32 %s4029_s7, 4  ;;  %s607_s4 = sshll.u32 %s3206_s24, 4  ;;  %s540_s25 = int_to_ptr.hbm [resolvable:$true] %s539_s25  ;;  %s608_s4 = int_to_ptr.vmem [resolvable:$true] %s607_s4 }
  0x26   : > { %s575_s3 = sshll.u32 %s4030_s13, 4  ;;  %s524_s13 = sshll.u32 %s3974_s5, 4  ;;  %s576_s3 = int_to_ptr.hbm [resolvable:$true] %s575_s3  ;;  %s525_s13 = int_to_ptr.hbm [resolvable:$true] %s524_s13 }
  0x27   : > { %2694 = dma.hbm_to_vmem [thread:$0]  (!%p3395_p12), %s540_s25, 16, %s542_s27, [#allocation6]  }
  0x28   : > { %s605_s7 = sshll.u32 %s4032_s17, 4  ;;  %s526_s1 = sshll.u32 %s3207_s0, 4  ;;  %s606_s7 = int_to_ptr.hbm [resolvable:$true] %s605_s7  ;;  %s527_s1 = int_to_ptr.vmem [resolvable:$true] %s526_s1 }
  0x29   : > { %2700 = dma.hbm_to_vmem [thread:$0]  (!%p3395_p12), %s576_s3, 16, %s578_s26, [#allocation9]  }
  0x2a   : > { %2706 = dma.hbm_to_vmem [thread:$0]  (!%p3395_p12), %s606_s7, 16, %s608_s4, [#allocation12]  }
  0x2b   : > { %s560_s25 = sshll.u32 %s3980_s11, 4  ;;  %s590_s26 = sshll.u32 %s3984_s15, 4  ;;  %s561_s25 = int_to_ptr.hbm [resolvable:$true] %s560_s25  ;;  %s591_s26 = int_to_ptr.hbm [resolvable:$true] %s590_s26 }
  0x2c   : > { %2691 = dma.hbm_to_vmem [thread:$0]  (!%p3395_p12), %s525_s13, 16, %s527_s1, [#allocation3]  }
  0x2d   : > { %s3208_s24 = smov [#allocation7]   ;;  %s3209_s7 = smov [#allocation10]  }
  0x2e   : > { %s562_s23 = sshll.u32 %s3208_s24, 4  ;;  %s592_s17 = sshll.u32 %s3209_s7, 4  ;;  %s563_s23 = int_to_ptr.vmem [resolvable:$true] %s562_s23  ;;  %s593_s17 = int_to_ptr.vmem [resolvable:$true] %s592_s17 }
  0x2f   : > { %2697 = dma.hbm_to_vmem [thread:$0]  (!%p3395_p12), %s561_s25, 16, %s563_s23, [#allocation6]  }
  0x30   : > { %s617_s0 = sshll.u32 %s3987_s18, 4  ;;  %s629_s21 = sshll.u32 %s3988_s19, 4  ;;  %s618_s0 = int_to_ptr.hbm [resolvable:$true] %s617_s0  ;;  %s630_s21 = int_to_ptr.hbm [resolvable:$true] %s629_s21 }
  0x31   : > { %2703 = dma.hbm_to_vmem [thread:$0]  (!%p3395_p12), %s591_s26, 16, %s593_s17, [#allocation9]  }
  0x32   : > { %s3210_s3 = smov [#allocation13]   ;;  %s3211_s25 = smov [#allocation14]  }
  0x33   : > { %s619_s27 = sshll.u32 %s3210_s3, 4  ;;  %s631_s24 = sshll.u32 %s3211_s25, 4  ;;  %s620_s27 = int_to_ptr.vmem [resolvable:$true] %s619_s27  ;;  %s632_s24 = int_to_ptr.vmem [resolvable:$true] %s631_s24 }
  0x34   : > { %2709 = dma.hbm_to_vmem [thread:$0]  (!%p3395_p12), %s618_s0, 64, %s620_s27, [#allocation12]  }
  0x35   : > { %2712 = dma.hbm_to_vmem [thread:$0]  (!%p3395_p12), %s630_s21, 64, %s632_s24, [#allocation15]  }
  0x36   : > { %673 = sbr.rel (%p3381_p10) target bundleno = 6873 (0x1ad9), region = 100 }
  0x3b   : > { %3165 = dma.done.wait (%p2717_p9), [#allocation3], 16  }
  0x3c   : > { %3167 = vsyncadd (%p2717_p9), [#allocation3], 4294967280 }
  0x3d   : > { %3169 = dma.done.wait (%p2717_p9), [#allocation6], 32  }
  0x3e   : > { %3171 = vsyncadd (%p2717_p9), [#allocation6], 4294967264 }
  0x3f   : > { %3173 = dma.done.wait (%p2717_p9), [#allocation9], 32  }
  0x40   : > { %3175 = vsyncadd (%p2717_p9), [#allocation9], 4294967264 }
  0x41   : > { %3177 = dma.done.wait (%p2717_p9), [#allocation12], 80  }
  0x42   : > { %3179 = vsyncadd (%p2717_p9), [#allocation12], 4294967216 }
  0x43   : > { %3181 = dma.done.wait (%p2717_p9), [#allocation15], 64  }
  0x44   : > { %3183 = vsyncadd (%p2717_p9), [#allocation15], 4294967232  ;;  %p779_p13 = scmp.lt.s32.totalorder %s3353_s2, 1  ;;  %s4033_s7 = sld [smem:[#allocation30_spill]]  ;;  %vm823_vm0 = vcmask 261120   ;;  %v3212_v2 = vmov 32.0  }
  0x45   : > { %2802 = vrcp.f32 %v3212_v2  ;;  %s4034_s0 = sld [smem:[#allocation34_spill]]  ;;  %v3488_v25 = vld [vmem:[#allocation13] ss:$0 sm:$0xff]  ;;  %v3490_v28 = vld [vmem:[#allocation14] ss:$0 sm:$0xff]  ;;  %s4004_s21 = smov 88  }
  0x46   : > { %s3457_s29 = scalar_select %p779_p13, %s3353_s2, 1  ;;  %v3495_v32 = vld [vmem:[#allocation2] ss:$0 sm:$0xff]  ;;  %vm956_vm5 = vcmask 1043456   ;;  %vm917_vm6 = vcmask 64512   ;;  %vm1160_vm7 = vcmask 130048  }
  0x47   : > { %s4000_s3 = smov 64   ;;  %s3215_s27 = smov 96   ;;  %vm1162_vm8 = vcmask 195584   ;;  %vm1290_vm12 = vcmask 80896   ;;  %vm1309_vm13 = vcmask 1044480  }
  0x48   : > { %s3460_s30 = sshll.u32 %s3457_s29, 3  ;;  %s4007_s25 = smov 80  }
  0x49   : > { %s3217_s24 = smov 120   ;;  %s3218_s26 = smov 112  }
  0x4a   : > { %s782_s17 = scalar_lea.vmem %s4033_s7, %s3460_s30  ;;  %s4002_s28 = smov 72  }
  0x4b   : > { %v3466_v0 = vld [vmem:[%s782_s17] sm:$0xff]  ;;  %v2803_v3 = vpop.eup %2802  ;;  %v3478_v14 = vld [vmem:[%s4034_s0 + $0x8] sm:$0xff]  ;;  %s4035_s17 = sld [smem:[#allocation32_spill]]  ;;  %s3220_s13 = smov 104  }
  0x4c   : > { %v843_v1 = vsel %vm823_vm0, %v3466_v0, 0.0  ;;  %v847_v4 = vmul.f32 32.0, %v2803_v3  ;;  %vm851_vm1 = vweird.f32 %v2803_v3  ;;  %906 = vmatpush.bf16.msra.mxu1 %v3478_v14  ;;  %v3484_v15 = vld [vmem:[%s4034_s0] sm:$0xff]  ;;  %s3999_s1 = smov 48   ;;  %s4001_s23 = smov 56  }
  0x4d   : > { %844 = vadd.xlane.f32.xlu0 %v843_v1  ;;  %s4006_s7 = smov 40  }
  0x4e   : > { %v848_v5 = vsub.f32 1.0, %v847_v4 }
  0x50   : > { %v849_v6 = vmul.f32 %v2803_v3, %v848_v5  ;;  %907 = vmatpush.bf16.msra.mxu1 %v3484_v15 }
  0x51   : > { %s791_s4 = scalar_lea.vmem %s4035_s17, %s3460_s30  ;;  %s2637_s17 = sshll.u32 %s3457_s29, 4 }
  0x52   : > { %v850_v7 = vadd.f32 %v2803_v3, %v849_v6  ;;  %v3523_v46 = vld [vmem:[%s791_s4] sm:$0xff]  ;;  %s3224_s29 = smov 8  }
  0x54   : > { %v3470_v8 = vsel %vm851_vm1, %v2803_v3, %v850_v7 }
  0xc0   : > { %v845_v9 = vpop.xlane.xlu0 %844 }
  0xc1   : > { %v853_v10 = vmul.f32 %v3470_v8, %v845_v9 }
  0xc3   : > { %v854_v11 = vsub.f32 %v3466_v0, %v853_v10 }
  0xc5   : > { %v855_v12 = vmul.f32 %v854_v11, %v854_v11 }
  0xc7   : > { %v856_v13 = vsel %vm823_vm0, %v855_v12, 0.0 }
  0xc8   : > { %857 = vadd.xlane.f32.xlu0 %v856_v13 }
 0x13b   : > { %v858_v16 = vpop.xlane.xlu0 %857 }
 0x13c   : > { %v859_v17 = vmul.f32 %v858_v16, %v3470_v8 }
 0x13e   : > { %v860_v18 = vadd.f32 1e-06, %v859_v17 }
 0x140   : > { %2804 = vrsqrt.f32 %v860_v18  ;;  %vm867_vm3 = vweird.f32 %v860_v18 }
 0x146   : > { %v2805_v19 = vpop.eup %2804 }
 0x147   : > { %v862_v20 = vmul.f32 %v2805_v19, %v860_v18  ;;  %vm868_vm2 = vweird.f32 %v2805_v19 }
 0x148   : > { %vm869_vm4 = vmor %vm867_vm3, %vm868_vm2  ;;  %vm1657_vm2 = vcmask 523264  }
 0x149   : > { %v863_v21 = vmul.f32 %v2805_v19, %v862_v20 }
 0x14b   : > { %v864_v22 = vmul.f32 0.5, %v863_v21 }
 0x14d   : > { %v865_v23 = vsub.f32 1.5, %v864_v22 }
 0x14f   : > { %v866_v24 = vmul.f32 %v2805_v19, %v865_v23 }
 0x151   : > { %v870_v26 = vsel %vm869_vm4, %v2805_v19, %v866_v24 }
 0x152   : > { %v871_v27 = vmul.f32 %v870_v26, %v854_v11 }
 0x154   : > { %v873_v29 = vmul.f32 %v3488_v25, %v871_v27 }
 0x156   : > { %v875_v30 = vadd.f32 %v3490_v28, %v873_v29 }
 0x158   : > { %v881_v31 = vpack.c.bf16 %v875_v30, %v875_v30 }
 0x15a   : > { %2541 = vmatmul.msk.bf16.vlgmr.msra.gmra.mxu1 %vm823_vm0, %v881_v31 }
 0x1d7   : > { %v909_v33 = vpop.f32.mrf.mxu1 }
 0x1d8   : > { %v910_v34 = vadd.f32 %v3495_v32, %v909_v33 }
 0x1da   : > { %v3498_v35 = vpack.c.bf16 %v910_v34, %v910_v34 }
 0x1dc   : > { %975 = vrot.lane.b32.xlu0 %v3498_v35, %s4004_s21  ;;  %951 = vrot.lane.b32.xlu2 %v3498_v35, %s4000_s3  ;;  %s4009_s3 = smov 16  }
 0x1dd   : > { %915 = vrot.lane.b32.xlu1 %v3498_v35, %s3215_s27 }
 0x1df   : > { %v911_v36 = vpop.f32.mrf.mxu1 }
 0x1e4   : > { %1033 = vrot.lane.b32.xlu0 %v3498_v35, %s4007_s25  ;;  %973 = vrot.lane.b32.xlu2 %v3498_v35, %s3217_s24  ;;  %s4039_s25 = smov 88  }
 0x1ec   : > { %1031 = vrot.lane.b32.xlu0 %v3498_v35, %s3218_s26 }
 0x236   : > { %v952_v37 = vpop.permute.xlu2 %951 }
 0x237   : > { %v958_v38 = vsel %vm956_vm5, %v952_v37, 0 }
 0x238   : > { %967 = vmatpush.bf16.msra.mxu3 %v958_v38 }
 0x23e   : > { %v974_v62 = vpop.permute.xlu2 %973 }
 0x24e   : > { %v976_v39 = vpop.permute.xlu0 %975 }
 0x24f   : > { %v916_v40 = vpop.permute.xlu1 %915  ;;  %v981_v41 = vsel %vm917_vm6, %v976_v39, 0 }
 0x250   : > { %v922_v42 = vsel %vm917_vm6, %v916_v40, 0  ;;  %990 = vmatpush.bf16.xpose.msrb.mxu3 %v981_v41 }
 0x251   : > { %931 = vmatpush.bf16.xpose.msra.mxu2 %v922_v42 }
 0x256   : > { %v1034_v43 = vpop.permute.xlu0 %1033 }
 0x257   : > { %v1039_v44 = vsel %vm917_vm6, %v1034_v43, 0  ;;  %v2639_v43 = vld [vmem:[%s3979_s10 + $0x8] sm:$0xff] }
 0x258   : > { %2542 = vmatmul.msk.bf16.vlgmr.msra.gmra.mxu2 %vm917_vm6, %v3498_v35  ;;  %1048 = vmatpush.bf16.xpose.msrb.mxu1 %v1039_v44 }
 0x259   : > { %833 = vmatpush.bf16.msra.mxu0 %v2639_v43 }
 0x25e   : > { %v1032_v45 = vpop.permute.xlu0 %1031 }
 0x25f   : > { %2546 = vmatmul.msk.bf16.vlgmr.msrb.gmra.mxu1 %vm917_vm6, %v1032_v45 }
 0x2db   : > { %v933_v47 = vpop.f32.mrf.mxu2 }
 0x2dc   : > { %v937_v48 = vmul.f32 0.35355338, %v933_v47  ;;  %v1050_v49 = vpop.f32.mrf.mxu1 }
 0x2dd   : > { %v1054_v50 = vmul.f32 0.35355338, %v1050_v49 }
 0x2de   : > { %v938_v51 = vadd.f32 %v937_v48, %v3523_v46 }
 0x2df   : > { %v3527_v52 = vadd.f32 %v1054_v50, %v3523_v46 }
 0x2e0   : > { %v939_v53 = vsel %vm917_vm6, %v938_v51, -inf }
 0x2e1   : > { %940 = vmax.xlane.f32.xlu1 %v939_v53  ;;  %v1056_v54 = vsel %vm917_vm6, %v3527_v52, -inf }
 0x2e2   : > { %1057 = vmax.xlane.f32.xlu0 %v1056_v54 }
 0x2e3   : > { %v935_v55 = vpop.f32.mrf.mxu2 }
 0x2e4   : > { %v1052_v56 = vpop.f32.mrf.mxu1 }
 0x354   : > { %v941_v57 = vpop.xlane.xlu1 %940 }
 0x355   : > { %v942_v58 = vsub.f32 %v938_v51, %v941_v57  ;;  %v1058_v38 = vpop.xlane.xlu0 %1057 }
 0x356   : > { %v1059_v39 = vsub.f32 %v3527_v52, %v1058_v38 }
 0x357   : > { %v943_v59 = vmul.f32 1.442695, %v942_v58 }
 0x358   : > { %v1060_v40 = vmul.f32 1.442695, %v1059_v39 }
 0x359   : > { %2806 = vpow2.f32 %v943_v59 }
 0x35f   : > { %v2807_v60 = vpop.eup %2806 }
 0x360   : > { %v945_v61 = vsel %vm917_vm6, %v2807_v60, 0.0 }
 0x361   : > { %946 = vadd.xlane.f32.xlu2 %v945_v61 }
 0x379   : > { %1091 = vrot.lane.b32.xlu2 %v3498_v35, %s4002_s28  ;;  %s4036_s28 = sld [smem:[#allocation31_spill]] }
 0x37f   : > { %s787_s21 = scalar_lea.vmem %s4036_s28, %s2637_s17  ;;  %s4037_s17 = sld [smem:[#allocation33_spill]] }
 0x380   : > { %v800_v44 = vld [vmem:[%s787_s21] sm:$0xff]  ;;  %v801_v45 = vld [vmem:[%s787_s21 + $0x8] sm:$0x3]  ;;  %s3225_s21 = smov 24   ;;  %s4040_s28 = smov 72  }
 0x381   : > { %1089 = vrot.lane.b32.xlu2 %v3498_v35, %s3220_s13  ;;  %v807_v47 = vpack.c.bf16 %v801_v45, %v800_v44 }
 0x385   : > { %s795_s4 = scalar_lea.vmem %s4037_s17, %s3460_s30  ;;  %s4038_s30 = smov 80  }
 0x3d4   : > { %v947_v63 = vpop.xlane.xlu2 %946 }
 0x3d5   : > { %2808 = vrcp.f32 %v947_v63 }
 0x3db   : > { %v2809_v1 = vpop.eup %2808 }
 0x3dc   : > { %v949_v2 = vmul.f32 %v2809_v1, %v2807_v60  ;;  %v1092_v3 = vpop.permute.xlu2 %1091 }
 0x3dd   : > { %v1097_v5 = vsel %vm917_vm6, %v1092_v3, 0  ;;  %v2792_v3 = vld [vmem:[#allocation7] ss:$0 sm:$0xff] }
 0x3de   : > { %v950_v4 = vpack.c.bf16 %v949_v2, %v949_v2 }
 0x3e0   : > { %2543 = vmatmul.msk.bf16.vlgmr.msra.gmra.mxu3 %vm917_vm6, %v950_v4 }
 0x3e1   : > { %1106 = vmatpush.bf16.xpose.msra.mxu3 %v1097_v5 }
 0x3e4   : > { %v1090_v6 = vpop.permute.xlu2 %1089 }
 0x3f0   : > { %2544 = vmatmul.msk.bf16.vlgmr.msrb.gmra.mxu3 %vm917_vm6, %v974_v62 }
 0x400   : > { %2548 = vmatmul.msk.bf16.vlgmr.msra.gmra.mxu3 %vm917_vm6, %v1090_v6 }
 0x463   : > { %v3541_v7 = vpop.f32.mrf.mxu3 }
 0x46b   : > { %v971_v9 = vpop.f32.mrf.mxu3 }
 0x473   : > { %v992_v10 = vpop.f32.mrf.mxu3 }
 0x474   : > { %v996_v11 = vmul.f32 0.35355338, %v992_v10 }
 0x476   : > { %v997_v12 = vadd.f32 %v996_v11, %v3523_v46 }
 0x478   : > { %v998_v13 = vsel %vm917_vm6, %v997_v12, -inf }
 0x479   : > { %999 = vmax.xlane.f32.xlu1 %v998_v13 }
 0x47b   : > { %v994_v16 = vpop.f32.mrf.mxu3 }
 0x483   : > { %v1108_v17 = vpop.f32.mrf.mxu3 }
 0x484   : > { %v1112_v18 = vmul.f32 0.35355338, %v1108_v17 }
 0x486   : > { %v1113_v19 = vadd.f32 %v1112_v18, %v3523_v46  ;;  %v3593_v18 = vld [vmem:[%s3975_s6 + $0x8] sm:$0xff] }
 0x487   : > { %1194 = vmatpush.bf16.msra.mxu1 %v3593_v18 }
 0x488   : > { %v1114_v20 = vsel %vm917_vm6, %v1113_v19, -inf }
 0x489   : > { %1115 = vmax.xlane.f32.xlu2 %v1114_v20  ;;  %v3599_v20 = vld [vmem:[%s3975_s6] sm:$0xff] }
 0x48b   : > { %v1110_v21 = vpop.f32.mrf.mxu3  ;;  %1195 = vmatpush.bf16.msra.mxu1 %v3599_v20 }
 0x4a1   : > { %1068 = vrot.lane.b32.xlu2 %v3498_v35, %s3999_s1 }
 0x4ec   : > { %v1000_v22 = vpop.xlane.xlu1 %999 }
 0x4ed   : > { %v1001_v23 = vsub.f32 %v997_v12, %v1000_v22 }
 0x4ef   : > { %v1002_v24 = vmul.f32 1.442695, %v1001_v23 }
 0x4f1   : > { %2810 = vpow2.f32 %v1002_v24 }
 0x4f7   : > { %v2811_v26 = vpop.eup %2810 }
 0x4f8   : > { %v1004_v27 = vsel %vm917_vm6, %v2811_v26, 0.0 }
 0x4f9   : > { %1005 = vadd.xlane.f32.xlu1 %v1004_v27 }
 0x4fc   : > { %v1116_v29 = vpop.xlane.xlu2 %1115 }
 0x4fd   : > { %v1117_v30 = vsub.f32 %v1113_v19, %v1116_v29 }
 0x4ff   : > { %v1118_v31 = vmul.f32 1.442695, %v1117_v30 }
 0x501   : > { %2812 = vpow2.f32 %v1118_v31 }
 0x502   : > { %2814 = vpow2.f32 %v1060_v40 }
 0x504   : > { %v1069_v33 = vpop.permute.xlu2 %1068 }
 0x505   : > { %v1074_v34 = vsel %vm956_vm5, %v1069_v33, 0 }
 0x506   : > { %1083 = vmatpush.bf16.msrb.mxu2 %v1074_v34 }
 0x507   : > { %v2813_v36 = vpop.eup %2812 }
 0x508   : > { %v1120_v37 = vsel %vm917_vm6, %v2813_v36, 0.0  ;;  %v2815_v41 = vpop.eup %2814 }
 0x509   : > { %1121 = vadd.xlane.f32.xlu0 %v1120_v37  ;;  %v1062_v42 = vsel %vm917_vm6, %v2815_v41, 0.0  ;;  %v3619_v37 = vld [vmem:[#allocation5] ss:$0 sm:$0xff] }
 0x512   : > { %1010 = vrot.lane.b32.xlu1 %v3498_v35, %s4001_s23 }
 0x51d   : > { %1126 = vrot.lane.b32.xlu0 %v3498_v35, %s4006_s7  ;;  %v2638_v35 = vld [vmem:[%s3979_s10] sm:$0xff] }
 0x51e   : > { %834 = vmatpush.bf16.msra.mxu0 %v2638_v35 }
 0x521   : > { %2532 = vmatmul.msk.bf16.vlgmr.msra.gmra.mxu0 %vm823_vm0, %v807_v47  ;;  %v3633_v47 = vld [vmem:[%s3977_s8 + $0x8] sm:$0xff] }
 0x522   : > { %1260 = vmatpush.bf16.msra.mxu2 %v3633_v47 }
 0x53c   : > { %1063 = vadd.xlane.f32.xlu1 %v1062_v42 }
 0x56c   : > { %v1006_v48 = vpop.xlane.xlu1 %1005 }
 0x56d   : > { %2816 = vrcp.f32 %v1006_v48 }
 0x573   : > { %v2817_v49 = vpop.eup %2816 }
 0x574   : > { %v1008_v50 = vmul.f32 %v2817_v49, %v2811_v26 }
 0x576   : > { %v1009_v54 = vpack.c.bf16 %v1008_v50, %v1008_v50 }
 0x57c   : > { %v1122_v53 = vpop.xlane.xlu0 %1121 }
 0x57d   : > { %2818 = vrcp.f32 %v1122_v53 }
 0x583   : > { %v2819_v56 = vpop.eup %2818 }
 0x584   : > { %v1011_v51 = vpop.permute.xlu1 %1010  ;;  %v1124_v58 = vmul.f32 %v2819_v56, %v2813_v36 }
 0x585   : > { %v1016_v52 = vsel %vm956_vm5, %v1011_v51, 0 }
 0x586   : > { %1025 = vmatpush.bf16.msrb.mxu0 %v1016_v52  ;;  %v1125_v59 = vpack.c.bf16 %v1124_v58, %v1124_v58 }
 0x589   : > { %2545 = vmatmul.msk.bf16.vlgmr.msrb.gmra.mxu0 %vm917_vm6, %v1009_v54 }
 0x58f   : > { %v1127_v55 = vpop.permute.xlu0 %1126 }
 0x590   : > { %v1132_v57 = vsel %vm956_vm5, %v1127_v55, 0 }
 0x591   : > { %1141 = vmatpush.bf16.msra.mxu0 %v1132_v57  ;;  %v3643_v57 = vld [vmem:[#allocation13 + $0x1] ss:$0 sm:$0xff] }
 0x599   : > { %2549 = vmatmul.msk.bf16.vlgmr.msra.gmra.mxu0 %vm917_vm6, %v1125_v59 }
 0x59e   : > { %v836_v1 = vpop.f32.mrf.mxu0 }
 0x59f   : > { %v837_v5 = vadd.f32 %v2792_v3, %v836_v1  ;;  %v3653_v1 = vld [vmem:[%s3978_s9] ss:$0 sm:$0xff] }
 0x5a6   : > { %v838_v2 = vpop.f32.mrf.mxu0 }
 0x5a7   : > { %v839_v6 = vadd.f32 %v2792_v3, %v838_v2 }
 0x5a9   : > { %v3575_v9 = vpack.c.bf16 %v839_v6, %v837_v5 }
 0x5ab   : > { %v3579_v11 = vsel %vm917_vm6, %v3575_v9, 0 }
 0x5ac   : > { %1282 = vmatpush.bf16.xpose.msrb.mxu3 %v3579_v11 }
 0x5af   : > { %v1064_v60 = vpop.xlane.xlu1 %1063 }
 0x5b0   : > { %2820 = vrcp.f32 %v1064_v60  ;;  %v3645_v60 = vld [vmem:[#allocation14 + $0x1] ss:$0 sm:$0xff] }
 0x5b6   : > { %v2821_v61 = vpop.eup %2820 }
 0x5b7   : > { %v1066_v62 = vmul.f32 %v2821_v61, %v2815_v41 }
 0x5b9   : > { %v1067_v63 = vpack.c.bf16 %v1066_v62, %v1066_v62 }
 0x5bb   : > { %2547 = vmatmul.msk.bf16.vlgmr.msrb.gmra.mxu2 %vm917_vm6, %v1067_v63 }
 0x606   : > { %v1027_v4 = vpop.f32.mrf.mxu0 }
 0x607   : > { %1148 = vrot.lane.b32.xlu2 %v1027_v4, %s3224_s29 }
 0x60e   : > { %v1029_v10 = vpop.f32.mrf.mxu0 }
 0x616   : > { %v1143_v12 = vpop.f32.mrf.mxu0 }
 0x617   : > { %1156 = vrot.lane.b32.xlu2 %v1143_v12, %s3225_s21 }
 0x61e   : > { %v1145_v13 = vpop.f32.mrf.mxu0 }
 0x61f   : > { %1329 = vrot.lane.b32.xlu2 %v3575_v9, %s3217_s24  ;;  %v3667_v13 = vld [vmem:[%s795_s4] sm:$0xff]  ;;  %s4045_s4 = smov 16  }
 0x627   : > { %1387 = vrot.lane.b32.xlu2 %v3575_v9, %s3218_s26 }
 0x62f   : > { %1445 = vrot.lane.b32.xlu2 %v3575_v9, %s3220_s13 }
 0x63e   : > { %v1085_v16 = vpop.f32.mrf.mxu2 }
 0x63f   : > { %1152 = vrot.lane.b32.xlu0 %v1085_v16, %s4009_s3 }
 0x646   : > { %v1087_v17 = vpop.f32.mrf.mxu2 }
 0x661   : > { %v1149_v19 = vpop.permute.xlu2 %1148 }
 0x662   : > { %v1159_v27 = vsel %vm917_vm6, %v3541_v7, %v1149_v19 }
 0x671   : > { %v1157_v21 = vpop.permute.xlu2 %1156 }
 0x679   : > { %v1330_v22 = vpop.permute.xlu2 %1329 }
 0x67a   : > { %v3603_v23 = vsel %vm917_vm6, %v1330_v22, 0 }
 0x67b   : > { %1344 = vmatpush.bf16.xpose.msrb.mxu1 %v3603_v23 }
 0x681   : > { %v1388_v24 = vpop.permute.xlu2 %1387 }
 0x682   : > { %v3607_v26 = vsel %vm917_vm6, %v1388_v24, 0 }
 0x683   : > { %1402 = vmatpush.bf16.xpose.msra.mxu3 %v3607_v26 }
 0x689   : > { %v1446_v31 = vpop.permute.xlu2 %1445 }
 0x68a   : > { %v3615_v36 = vsel %vm917_vm6, %v1446_v31, 0 }
 0x6b1   : > { %v1153_v29 = vpop.permute.xlu0 %1152 }
 0x6b2   : > { %v1161_v30 = vsel %vm1160_vm7, %v1159_v27, %v1153_v29 }
 0x6b3   : > { %v1163_v33 = vsel %vm1162_vm8, %v1161_v30, %v1157_v21 }
 0x6b4   : > { %v1169_v34 = vpack.c.bf16 %v1163_v33, %v1163_v33 }
 0x6b6   : > { %2558 = vmatmul.msk.bf16.vlgmr.msra.gmra.mxu1 %vm823_vm0, %v1169_v34 }
 0x6b7   : > { %1460 = vmatpush.bf16.xpose.msra.mxu1 %v3615_v36 }
 0x733   : > { %v1197_v38 = vpop.f32.mrf.mxu1 }
 0x734   : > { %v1198_v39 = vadd.f32 %v3619_v37, %v1197_v38 }
 0x736   : > { %v3623_v7 = vadd.f32 %v1198_v39, %v3466_v0  ;;  %v3639_v0 = vld [vmem:[%s3977_s8] sm:$0xff] }
 0x737   : > { %1261 = vmatpush.bf16.msra.mxu2 %v3639_v0 }
 0x738   : > { %v1204_v40 = vsel %vm823_vm0, %v3623_v7, 0.0 }
 0x739   : > { %1205 = vadd.xlane.f32.xlu0 %v1204_v40 }
 0x73b   : > { %v1199_v41 = vpop.f32.mrf.mxu1 }
 0x7ac   : > { %v1206_v42 = vpop.xlane.xlu0 %1205 }
 0x7ad   : > { %v1207_v43 = vmul.f32 %v1206_v42, %v3470_v8 }
 0x7af   : > { %v1208_v35 = vsub.f32 %v3623_v7, %v1207_v43 }
 0x7b1   : > { %v1209_v44 = vmul.f32 %v1208_v35, %v1208_v35 }
 0x7b3   : > { %v1210_v45 = vsel %vm823_vm0, %v1209_v44, 0.0 }
 0x7b4   : > { %1211 = vadd.xlane.f32.xlu1 %v1210_v45 }
 0x827   : > { %v1212_v48 = vpop.xlane.xlu1 %1211 }
 0x828   : > { %v1213_v49 = vmul.f32 %v1212_v48, %v3470_v8 }
 0x82a   : > { %v1214_v50 = vadd.f32 1e-06, %v1213_v49 }
 0x82c   : > { %2822 = vrsqrt.f32 %v1214_v50  ;;  %vm1221_vm10 = vweird.f32 %v1214_v50 }
 0x832   : > { %v2823_v51 = vpop.eup %2822 }
 0x833   : > { %v1216_v52 = vmul.f32 %v2823_v51, %v1214_v50  ;;  %vm1222_vm9 = vweird.f32 %v2823_v51 }
 0x834   : > { %vm1223_vm11 = vmor %vm1221_vm10, %vm1222_vm9 }
 0x835   : > { %v1217_v53 = vmul.f32 %v2823_v51, %v1216_v52 }
 0x837   : > { %v1218_v54 = vmul.f32 0.5, %v1217_v53 }
 0x839   : > { %v1219_v55 = vsub.f32 1.5, %v1218_v54 }
 0x83b   : > { %v1220_v56 = vmul.f32 %v2823_v51, %v1219_v55 }
 0x83d   : > { %v1224_v58 = vsel %vm1223_vm11, %v2823_v51, %v1220_v56 }
 0x83e   : > { %v1225_v59 = vmul.f32 %v1224_v58, %v1208_v35 }
 0x840   : > { %v1227_v61 = vmul.f32 %v3643_v57, %v1225_v59 }
 0x842   : > { %v1229_v62 = vadd.f32 %v3645_v60, %v1227_v61 }
 0x844   : > { %v1235_v63 = vpack.c.bf16 %v1229_v62, %v1229_v62 }
 0x846   : > { %2567 = vmatmul.msk.bf16.vlgmr.msra.gmra.mxu2 %vm823_vm0, %v1235_v63 }
 0x8c9   : > { %v1263_v2 = vpop.f32.mrf.mxu2 }
 0x8ca   : > { %v1264_v3 = vadd.f32 %v3653_v1, %v1263_v2 }
 0x8cc   : > { %v1267_v4 = vpack.c.bf16 %v1264_v3, %v1264_v3 }
 0x8ce   : > { %1385 = vrot.lane.b32.xlu2 %v1267_v4, %s3218_s26  ;;  %1327 = vrot.lane.b32.xlu1 %v1267_v4, %s3217_s24 }
 0x8cf   : > { %2568 = vmatmul.msk.bf16.vlgmr.msrb.gmra.mxu3 %vm917_vm6, %v1267_v4 }
 0x8d1   : > { %v1265_v5 = vpop.f32.mrf.mxu2 }
 0x8d6   : > { %1443 = vrot.lane.b32.xlu1 %v1267_v4, %s3220_s13 }
 0x928   : > { %v1386_v6 = vpop.permute.xlu2 %1385 }
 0x929   : > { %2572 = vmatmul.msk.bf16.vlgmr.msra.gmra.mxu3 %vm917_vm6, %v1386_v6 }
 0x940   : > { %v1328_v10 = vpop.permute.xlu1 %1327 }
 0x941   : > { %2570 = vmatmul.msk.bf16.vlgmr.msrb.gmra.mxu1 %vm917_vm6, %v1328_v10 }
 0x948   : > { %v1444_v12 = vpop.permute.xlu1 %1443 }
 0x951   : > { %2574 = vmatmul.msk.bf16.vlgmr.msra.gmra.mxu1 %vm917_vm6, %v1444_v12 }
 0x952   : > { %v1284_v16 = vpop.f32.mrf.mxu3 }
 0x953   : > { %v1288_v17 = vmul.f32 0.35355338, %v1284_v16 }
 0x955   : > { %v1289_v19 = vadd.f32 %v1288_v17, %v3667_v13 }
 0x957   : > { %v1291_v21 = vsel %vm1290_vm12, %v1289_v19, -inf }
 0x958   : > { %1292 = vmax.xlane.f32.xlu0 %v1291_v21 }
 0x95a   : > { %v1286_v22 = vpop.f32.mrf.mxu3 }
 0x9ac   : > { %v1404_v24 = vpop.f32.mrf.mxu3 }
 0x9ad   : > { %v1408_v27 = vmul.f32 0.35355338, %v1404_v24 }
 0x9af   : > { %v1409_v29 = vadd.f32 %v1408_v27, %v3667_v13 }
 0x9b1   : > { %v1410_v30 = vsel %vm1290_vm12, %v1409_v29, -inf }
 0x9b2   : > { %1411 = vmax.xlane.f32.xlu0 %v1410_v30 }
 0x9b4   : > { %v1406_v31 = vpop.f32.mrf.mxu3 }
 0x9be   : > { %v1346_v33 = vpop.f32.mrf.mxu1 }
 0x9bf   : > { %v1350_v34 = vmul.f32 0.35355338, %v1346_v33 }
 0x9c1   : > { %v1351_v38 = vadd.f32 %v1350_v34, %v3667_v13 }
 0x9c3   : > { %v1352_v39 = vsel %vm1290_vm12, %v1351_v38, -inf }
 0x9c4   : > { %1353 = vmax.xlane.f32.xlu2 %v1352_v39 }
 0x9c6   : > { %v1348_v40 = vpop.f32.mrf.mxu1 }
 0x9cb   : > { %v1293_v41 = vpop.xlane.xlu0 %1292 }
 0x9cc   : > { %v1294_v42 = vsub.f32 %v1289_v19, %v1293_v41 }
 0x9ce   : > { %v1295_v43 = vmul.f32 1.442695, %v1294_v42  ;;  %v1462_v35 = vpop.f32.mrf.mxu1 }
 0x9cf   : > { %v1466_v44 = vmul.f32 0.35355338, %v1462_v35 }
 0x9d0   : > { %2824 = vpow2.f32 %v1295_v43 }
 0x9d1   : > { %v1467_v45 = vadd.f32 %v1466_v44, %v3667_v13 }
 0x9d3   : > { %v1468_v48 = vsel %vm1290_vm12, %v1467_v45, -inf }
 0x9d4   : > { %1469 = vmax.xlane.f32.xlu1 %v1468_v48 }
 0x9d6   : > { %v2825_v49 = vpop.eup %2824  ;;  %v1464_v50 = vpop.f32.mrf.mxu1 }
 0x9d7   : > { %v1297_v51 = vsel %vm1290_vm12, %v2825_v49, 0.0 }
 0x9d8   : > { %1298 = vadd.xlane.f32.xlu0 %v1297_v51 }
 0x9dc   : > { %1304 = vrot.lane.b32.xlu2 %v3575_v9, %s3215_s27 }
 0x9e4   : > { %1422 = vrot.lane.b32.xlu2 %v3575_v9, %s4038_s30 }
 0xa25   : > { %v1412_v59 = vpop.xlane.xlu0 %1411 }
 0xa26   : > { %v1413_v19 = vsub.f32 %v1409_v29, %v1412_v59 }
 0xa28   : > { %v1414_v21 = vmul.f32 1.442695, %v1413_v19 }
 0xa37   : > { %v1354_v52 = vpop.xlane.xlu2 %1353 }
 0xa38   : > { %v1355_v53 = vsub.f32 %v1351_v38, %v1354_v52 }
 0xa3a   : > { %v1356_v54 = vmul.f32 1.442695, %v1355_v53 }
 0xa3c   : > { %2826 = vpow2.f32 %v1356_v54 }
 0xa3f   : > { %v1305_v55 = vpop.permute.xlu2 %1304 }
 0xa40   : > { %v3683_v56 = vsel %vm1309_vm13, %v1305_v55, 0  ;;  %v3723_v55 = vld [vmem:[%s3981_s12] sm:$0xff] }
 0xa41   : > { %1320 = vmatpush.bf16.msrb.mxu0 %v3683_v56 }
 0xa42   : > { %v2827_v58 = vpop.eup %2826 }
 0xa43   : > { %v1358_v61 = vsel %vm1290_vm12, %v2827_v58, 0.0 }
 0xa44   : > { %1359 = vadd.xlane.f32.xlu0 %v1358_v61 }
 0xa47   : > { %v1423_v62 = vpop.permute.xlu2 %1422  ;;  %v1470_v63 = vpop.xlane.xlu1 %1469 }
 0xa48   : > { %v3688_v2 = vsel %vm1309_vm13, %v1423_v62, 0  ;;  %v1471_v3 = vsub.f32 %v1467_v45, %v1470_v63 }
 0xa49   : > { %1437 = vmatpush.bf16.msra.mxu0 %v3688_v2 }
 0xa4a   : > { %v1472_v4 = vmul.f32 1.442695, %v1471_v3 }
 0xa4b   : > { %v1299_v5 = vpop.xlane.xlu0 %1298 }
 0xa4c   : > { %2828 = vpow2.f32 %v1472_v4 }
 0xa4d   : > { %2830 = vrcp.f32 %v1299_v5  ;;  %v3730_v5 = vld [vmem:[#allocation8] ss:$0 sm:$0xff] }
 0xa4e   : > { %2832 = vpow2.f32 %v1414_v21 }
 0xa52   : > { %v2829_v6 = vpop.eup %2828 }
 0xa53   : > { %v2831_v10 = vpop.eup %2830  ;;  %v1474_v12 = vsel %vm1290_vm12, %v2829_v6, 0.0 }
 0xa54   : > { %v1301_v16 = vmul.f32 %v2831_v10, %v2825_v49  ;;  %1475 = vadd.xlane.f32.xlu1 %v1474_v12  ;;  %v2833_v22 = vpop.eup %2832 }
 0xa55   : > { %v1416_v24 = vsel %vm1290_vm12, %v2833_v22, 0.0 }
 0xa56   : > { %v1302_v17 = vpack.c.bf16 %v1301_v16, %v1301_v16 }
 0xa58   : > { %2569 = vmatmul.msk.bf16.vlgmr.msrb.gmra.mxu0 %vm1290_vm12, %v1302_v17  ;;  %1364 = vrot.lane.b32.xlu0 %v3575_v9, %s4039_s25 }
 0xa6d   : > { %1480 = vrot.lane.b32.xlu1 %v3575_v9, %s4040_s28 }
 0xa82   : > { %1417 = vadd.xlane.f32.xlu0 %v1416_v24 }
 0xab7   : > { %v1360_v27 = vpop.xlane.xlu0 %1359 }
 0xab8   : > { %2834 = vrcp.f32 %v1360_v27 }
 0xabe   : > { %v2835_v30 = vpop.eup %2834 }
 0xabf   : > { %v1362_v31 = vmul.f32 %v2835_v30, %v2827_v58  ;;  %v3740_v30 = vld [vmem:[%s3983_s14 + $0x8] sm:$0xff] }
 0xac0   : > { %1612 = vmatpush.bf16.msrb.mxu0 %v3740_v30 }
 0xac1   : > { %v1363_v38 = vpack.c.bf16 %v1362_v31, %v1362_v31  ;;  %v3752_v31 = vld [vmem:[%s3985_s16 + $0x18] sm:$0xff] }
 0xac2   : > { %1665 = vmatpush.bf16.msrb.mxu1 %v3752_v31 }
 0xac7   : > { %v1476_v9 = vpop.xlane.xlu1 %1475 }
 0xac8   : > { %2836 = vrcp.f32 %v1476_v9  ;;  %v3759_v9 = vld [vmem:[%s3985_s16 + $0x10] sm:$0xff] }
 0xac9   : > { %1666 = vmatpush.bf16.msrb.mxu1 %v3759_v9 }
 0xaca   : > { %v1365_v33 = vpop.permute.xlu0 %1364 }
 0xacb   : > { %v3699_v34 = vsel %vm1309_vm13, %v1365_v33, 0 }
 0xacc   : > { %1379 = vmatpush.bf16.msrb.mxu2 %v3699_v34 }
 0xace   : > { %v2837_v39 = vpop.eup %2836 }
 0xacf   : > { %2571 = vmatmul.msk.bf16.vlgmr.msrb.gmra.mxu2 %vm1290_vm12, %v1363_v38  ;;  %v1478_v41 = vmul.f32 %v2837_v39, %v2829_v6 }
 0xad1   : > { %v1479_v35 = vpack.c.bf16 %v1478_v41, %v1478_v41 }
 0xad5   : > { %v1322_v29 = vpop.f32.mrf.mxu0 }
 0xadd   : > { %v1324_v40 = vpop.f32.mrf.mxu0 }
 0xadf   : > { %v1481_v42 = vpop.permute.xlu1 %1480 }
 0xae0   : > { %v3704_v43 = vsel %vm1309_vm13, %v1481_v42, 0 }
 0xae1   : > { %1495 = vmatpush.bf16.msra.mxu2 %v3704_v43 }
 0xae4   : > { %2575 = vmatmul.msk.bf16.vlgmr.msra.gmra.mxu2 %vm1290_vm12, %v1479_v35 }
 0xae5   : > { %1709 = vmatpush.bf16.msrb.mxu2 %v3478_v14 }
 0xae9   : > { %1710 = vmatpush.bf16.msrb.mxu2 %v3484_v15  ;;  %v3717_v15 = vld [vmem:[%s3981_s12 + $0x8] sm:$0xff] }
 0xaea   : > { %1546 = vmatpush.bf16.msrb.mxu3 %v3717_v15 }
 0xaee   : > { %1547 = vmatpush.bf16.msrb.mxu3 %v3723_v55 }
 0xaf5   : > { %v1418_v44 = vpop.xlane.xlu0 %1417 }
 0xaf6   : > { %2838 = vrcp.f32 %v1418_v44 }
 0xafc   : > { %v2839_v45 = vpop.eup %2838 }
 0xafd   : > { %v1420_v48 = vmul.f32 %v2839_v45, %v2833_v22  ;;  %v3762_v45 = vld [vmem:[#allocation13 + $0x2] ss:$0 sm:$0xff] }
 0xaff   : > { %v1421_v49 = vpack.c.bf16 %v1420_v48, %v1420_v48 }
 0xb01   : > { %2573 = vmatmul.msk.bf16.vlgmr.msra.gmra.mxu0 %vm1290_vm12, %v1421_v49 }
 0xb52   : > { %v1381_v50 = vpop.f32.mrf.mxu2 }
 0xb53   : > { %1502 = vrot.lane.b32.xlu2 %v1381_v50, %s3224_s29  ;;  %v3764_v50 = vld [vmem:[#allocation14 + $0x2] ss:$0 sm:$0xff] }
 0xb5a   : > { %v1383_v51 = vpop.f32.mrf.mxu2 }
 0xb67   : > { %v1497_v52 = vpop.f32.mrf.mxu2 }
 0xb68   : > { %1510 = vrot.lane.b32.xlu2 %v1497_v52, %s3225_s21 }
 0xb6f   : > { %v1499_v53 = vpop.f32.mrf.mxu2 }
 0xb7e   : > { %v1439_v14 = vpop.f32.mrf.mxu0 }
 0xb7f   : > { %1506 = vrot.lane.b32.xlu1 %v1439_v14, %s4009_s3  ;;  %v3772_v14 = vld [vmem:[%s3985_s16 + $0x8] sm:$0xff] }
 0xb80   : > { %1667 = vmatpush.bf16.msrb.mxu1 %v3772_v14 }
 0xb86   : > { %v1441_v54 = vpop.f32.mrf.mxu0 }
 0xb87   : > { %v3778_v54 = vld [vmem:[%s3985_s16] sm:$0xff] }
 0xb88   : > { %1668 = vmatpush.bf16.msrb.mxu1 %v3778_v54 }
 0xbad   : > { %v1503_v58 = vpop.permute.xlu2 %1502 }
 0xbae   : > { %v1513_v59 = vsel %vm917_vm6, %v1322_v29, %v1503_v58  ;;  %v3781_v58 = vld [vmem:[#allocation10] ss:$0 sm:$0xff] }
 0xbc2   : > { %v1511_v62 = vpop.permute.xlu2 %1510 }
 0xbf1   : > { %v1507_v61 = vpop.permute.xlu1 %1506 }
 0xbf2   : > { %v1514_v63 = vsel %vm1160_vm7, %v1513_v59, %v1507_v61 }
 0xbf3   : > { %v1515_v3 = vsel %vm1162_vm8, %v1514_v63, %v1511_v62 }
 0xbf4   : > { %v1521_v4 = vpack.c.bf16 %v1515_v3, %v1515_v3 }
 0xbf6   : > { %2584 = vmatmul.msk.bf16.vlgmr.msrb.gmra.mxu3 %vm823_vm0, %v1521_v4  ;;  %v3785_v4 = vld [vmem:[#allocation11] ss:$0 sm:$0xff] }
 0xc79   : > { %v1549_v6 = vpop.f32.mrf.mxu3 }
 0xc7a   : > { %v1550_v10 = vadd.f32 %v3730_v5, %v1549_v6 }
 0xc7c   : > { %v1553_v12 = vadd.f32 %v1550_v10, %v3623_v7  ;;  %v3746_v7 = vld [vmem:[%s3983_s14] sm:$0xff] }
 0xc7d   : > { %1613 = vmatpush.bf16.msrb.mxu0 %v3746_v7 }
 0xc7e   : > { %v1556_v16 = vsel %vm823_vm0, %v1553_v12, 0.0 }
 0xc7f   : > { %1557 = vadd.xlane.f32.xlu1 %v1556_v16 }
 0xc81   : > { %v1551_v17 = vpop.f32.mrf.mxu3 }
 0xcf2   : > { %v1558_v19 = vpop.xlane.xlu1 %1557 }
 0xcf3   : > { %v1559_v21 = vmul.f32 %v1558_v19, %v3470_v8 }
 0xcf5   : > { %v1560_v22 = vsub.f32 %v1553_v12, %v1559_v21 }
 0xcf7   : > { %v1561_v24 = vmul.f32 %v1560_v22, %v1560_v22 }
 0xcf9   : > { %v1562_v27 = vsel %vm823_vm0, %v1561_v24, 0.0 }
 0xcfa   : > { %1563 = vadd.xlane.f32.xlu2 %v1562_v27 }
 0xd6d   : > { %v1564_v33 = vpop.xlane.xlu2 %1563 }
 0xd6e   : > { %v1565_v38 = vmul.f32 %v1564_v33, %v3470_v8 }
 0xd70   : > { %v1566_v29 = vadd.f32 1e-06, %v1565_v38 }
 0xd72   : > { %2840 = vrsqrt.f32 %v1566_v29  ;;  %vm1573_vm15 = vweird.f32 %v1566_v29 }
 0xd78   : > { %v2841_v39 = vpop.eup %2840 }
 0xd79   : > { %v1568_v40 = vmul.f32 %v2841_v39, %v1566_v29  ;;  %vm1574_vm14 = vweird.f32 %v2841_v39 }
 0xd7a   : > { %vm1575_vm1 = vmor %vm1573_vm15, %vm1574_vm14 }
 0xd7b   : > { %v1569_v41 = vmul.f32 %v2841_v39, %v1568_v40 }
 0xd7d   : > { %v1570_v42 = vmul.f32 0.5, %v1569_v41 }
 0xd7f   : > { %v1571_v35 = vsub.f32 1.5, %v1570_v42 }
 0xd81   : > { %v1572_v44 = vmul.f32 %v2841_v39, %v1571_v35 }
 0xd83   : > { %v1576_v48 = vsel %vm1575_vm1, %v2841_v39, %v1572_v44 }
 0xd84   : > { %v1577_v49 = vmul.f32 %v1576_v48, %v1560_v22 }
 0xd86   : > { %v1579_v51 = vmul.f32 %v3762_v45, %v1577_v49 }
 0xd88   : > { %v1581_v52 = vadd.f32 %v3764_v50, %v1579_v51 }
 0xd8a   : > { %v1587_v53 = vpack.c.bf16 %v1581_v52, %v1581_v52 }
 0xd8c   : > { %2593 = vmatmul.msk.bf16.vlgmr.msrb.gmra.mxu0 %vm823_vm0, %v1587_v53 }
 0xe09   : > { %v1615_v59 = vpop.f32.mrf.mxu0 }
 0xe0a   : > { %v1616_v61 = vadd.f32 %v3781_v58, %v1615_v59 }
 0xe0c   : > { %v1619_v62 = vmax.f32 %v1616_v61, 0.0 }
 0xe0e   : > { %v1629_v63 = vpack.c.bf16 %v1619_v62, %v1619_v62 }
 0xe10   : > { %2610 = vmatmul.msk.bf16.vlgmr.msrb.gmra.mxu1 %vm1657_vm2, %v1629_v63 }
 0xe11   : > { %v1617_v3 = vpop.f32.mrf.mxu0 }
 0xe8d   : > { %v1670_v6 = vpop.f32.mrf.mxu1 }
 0xe8e   : > { %v1671_v10 = vadd.f32 %v3785_v4, %v1670_v6 }
 0xe90   : > { %v3788_v16 = vadd.f32 %v1671_v10, %v1553_v12 }
 0xe92   : > { %v1675_v17 = vsel %vm823_vm0, %v3788_v16, 0.0 }
 0xe93   : > { %1676 = vadd.xlane.f32.xlu0 %v1675_v17 }
 0xe95   : > { %v1672_v19 = vpop.f32.mrf.mxu1 }
 0xf06   : > { %v1677_v21 = vpop.xlane.xlu0 %1676 }
 0xf07   : > { %v1678_v22 = vmul.f32 %v1677_v21, %v3470_v8 }
 0xf09   : > { %v1679_v24 = vsub.f32 %v3788_v16, %v1678_v22 }
 0xf0b   : > { %v1680_v27 = vmul.f32 %v1679_v24, %v1679_v24 }
 0xf0d   : > { %v1681_v33 = vsel %vm823_vm0, %v1680_v27, 0.0 }
 0xf0e   : > { %1682 = vadd.xlane.f32.xlu0 %v1681_v33 }
 0xf81   : > { %v1683_v38 = vpop.xlane.xlu0 %1682 }
 0xf82   : > { %v1684_v29 = vmul.f32 %v1683_v38, %v3470_v8 }
 0xf84   : > { %v1685_v39 = vadd.f32 1e-06, %v1684_v29 }
 0xf86   : > { %2842 = vrsqrt.f32 %v1685_v39  ;;  %vm1692_vm4 = vweird.f32 %v1685_v39 }
 0xf8c   : > { %v2843_v12 = vpop.eup %2842 }
 0xf8d   : > { %v1687_v40 = vmul.f32 %v2843_v12, %v1685_v39  ;;  %vm1693_vm3 = vweird.f32 %v2843_v12 }
 0xf8e   : > { %vm1694_vm9 = vmor %vm1692_vm4, %vm1693_vm3 }
 0xf8f   : > { %v1688_v41 = vmul.f32 %v2843_v12, %v1687_v40 }
 0xf91   : > { %v1689_v42 = vmul.f32 0.5, %v1688_v41 }
 0xf93   : > { %v1690_v35 = vsub.f32 1.5, %v1689_v42 }
 0xf95   : > { %v1691_v44 = vmul.f32 %v2843_v12, %v1690_v35 }
 0xf97   : > { %v1695_v48 = vsel %vm1694_vm9, %v2843_v12, %v1691_v44 }
 0xf98   : > { %v1696_v49 = vmul.f32 %v1695_v48, %v1679_v24 }
 0xf9a   : > { %v1697_v51 = vmul.f32 %v3488_v25, %v1696_v49 }
 0xf9c   : > { %v1698_v52 = vadd.f32 %v3490_v28, %v1697_v51 }
 0xf9e   : > { %v1699_v53 = vpack.c.bf16 %v1698_v52, %v1698_v52 }
 0xfa0   : > { %2611 = vmatmul.msk.bf16.vlgmr.msrb.gmra.mxu2 %vm823_vm0, %v1699_v53 }
0x1023   : > { %v1712_v59 = vpop.f32.mrf.mxu2 }
0x1024   : > { %v1713_v61 = vadd.f32 %v3495_v32, %v1712_v59 }
0x1026   : > { %v3800_v62 = vpack.c.bf16 %v1713_v61, %v1713_v61 }
0x1028   : > { %1774 = vrot.lane.b32.xlu2 %v3800_v62, %s3217_s24  ;;  %1776 = vrot.lane.b32.xlu1 %v3800_v62, %s4039_s25  ;;  %s4043_s25 = smov 40  }
0x1029   : > { %1718 = vrot.lane.b32.xlu0 %v3800_v62, %s3215_s27  ;;  %s4041_s27 = smov 64  }
0x102b   : > { %v1714_v25 = vpop.f32.mrf.mxu2 }
0x1030   : > { %1890 = vrot.lane.b32.xlu2 %v3800_v62, %s3220_s13 }
0x1031   : > { %1834 = vrot.lane.b32.xlu0 %v3800_v62, %s4038_s30  ;;  %s4042_s30 = smov 56  }
0x1039   : > { %1892 = vrot.lane.b32.xlu0 %v3800_v62, %s4040_s28  ;;  %s4044_s28 = smov 48  }
0x1041   : > { %1832 = vrot.lane.b32.xlu0 %v3800_v62, %s3218_s26 }
0x1082   : > { %v1775_v6 = vpop.permute.xlu2 %1774 }
0x108a   : > { %v1891_v22 = vpop.permute.xlu2 %1890 }
0x109a   : > { %v1777_v28 = vpop.permute.xlu1 %1776 }
0x109b   : > { %v1782_v32 = vsel %vm917_vm6, %v1777_v28, 0  ;;  %v1719_v63 = vpop.permute.xlu0 %1718 }
0x109c   : > { %v1724_v3 = vsel %vm917_vm6, %v1719_v63, 0  ;;  %1791 = vmatpush.bf16.xpose.msra.mxu1 %v1782_v32 }
0x109d   : > { %1733 = vmatpush.bf16.xpose.msra.mxu3 %v1724_v3 }
0x10a3   : > { %v1835_v10 = vpop.permute.xlu0 %1834  ;;  %2614 = vmatmul.msk.bf16.vlgmr.msra.gmra.mxu1 %vm917_vm6, %v1775_v6 }
0x10a4   : > { %v1840_v17 = vsel %vm917_vm6, %v1835_v10, 0  ;;  %2612 = vmatmul.msk.bf16.vlgmr.msra.gmra.mxu3 %vm917_vm6, %v3800_v62 }
0x10a5   : > { %1849 = vmatpush.bf16.xpose.msrb.mxu3 %v1840_v17 }
0x10ab   : > { %v1893_v19 = vpop.permute.xlu0 %1892 }
0x10ac   : > { %v1898_v21 = vsel %vm917_vm6, %v1893_v19, 0 }
0x10ad   : > { %1973 = vmatpush.bf16.msra.mxu3 %v3593_v18  ;;  %1907 = vmatpush.bf16.xpose.msrb.mxu1 %v1898_v21 }
0x10b1   : > { %1974 = vmatpush.bf16.msra.mxu3 %v3599_v20 }
0x10b3   : > { %v1833_v24 = vpop.permute.xlu0 %1832 }
0x10b4   : > { %2616 = vmatmul.msk.bf16.vlgmr.msrb.gmra.mxu3 %vm917_vm6, %v1833_v24  ;;  %2618 = vmatmul.msk.bf16.vlgmr.msrb.gmra.mxu1 %vm917_vm6, %v1891_v22 }
0x10b5   : > { %2033 = vmatpush.bf16.xpose.msra.mxu1 %v3579_v11  ;;  %2082 = vmatpush.bf16.xpose.msrb.mxu3 %v3603_v23 }
0x10bd   : > { %2130 = vmatpush.bf16.xpose.msrb.mxu1 %v3607_v26 }
0x1120   : > { %v1793_v27 = vpop.f32.mrf.mxu1 }
0x1121   : > { %v1797_v18 = vmul.f32 0.35355338, %v1793_v27 }
0x1123   : > { %v1798_v20 = vadd.f32 %v1797_v18, %v3523_v46 }
0x1125   : > { %v1799_v33 = vsel %vm917_vm6, %v1798_v20, -inf }
0x1126   : > { %1800 = vmax.xlane.f32.xlu1 %v1799_v33 }
0x1127   : > { %v1735_v38 = vpop.f32.mrf.mxu3 }
0x1128   : > { %v1739_v29 = vmul.f32 0.35355338, %v1735_v38  ;;  %v1795_v11 = vpop.f32.mrf.mxu1 }
0x112a   : > { %v1740_v39 = vadd.f32 %v1739_v29, %v3523_v46 }
0x112c   : > { %v1741_v12 = vsel %vm917_vm6, %v1740_v39, -inf }
0x112d   : > { %1742 = vmax.xlane.f32.xlu0 %v1741_v12 }
0x112f   : > { %v1737_v40 = vpop.f32.mrf.mxu3 }
0x1131   : > { %v1909_v41 = vpop.f32.mrf.mxu1 }
0x1132   : > { %v1913_v23 = vmul.f32 0.35355338, %v1909_v41 }
0x1134   : > { %v1914_v26 = vadd.f32 %v1913_v23, %v3523_v46 }
0x1136   : > { %v1915_v42 = vsel %vm917_vm6, %v1914_v26, -inf }
0x1137   : > { %1916 = vmax.xlane.f32.xlu2 %v1915_v42  ;;  %v1851_v35 = vpop.f32.mrf.mxu3 }
0x1138   : > { %v1855_v44 = vmul.f32 0.35355338, %v1851_v35 }
0x1139   : > { %v1911_v48 = vpop.f32.mrf.mxu1 }
0x113a   : > { %v1856_v49 = vadd.f32 %v1855_v44, %v3523_v46 }
0x113c   : > { %v1857_v51 = vsel %vm917_vm6, %v1856_v49, -inf }
0x113d   : > { %1858 = vmax.xlane.f32.xlu1 %v1857_v51 }
0x113f   : > { %v1853_v52 = vpop.f32.mrf.mxu3 }
0x1141   : > { %1753 = vrot.lane.b32.xlu0 %v3800_v62, %s4041_s27 }
0x1156   : > { %1811 = vrot.lane.b32.xlu1 %v3800_v62, %s4042_s30 }
0x1199   : > { %v1801_v53 = vpop.xlane.xlu1 %1800 }
0x119a   : > { %v1802_v59 = vsub.f32 %v1798_v20, %v1801_v53 }
0x119c   : > { %v1803_v61 = vmul.f32 1.442695, %v1802_v59 }
0x119e   : > { %2844 = vpow2.f32 %v1803_v61 }
0x11a0   : > { %v1743_v25 = vpop.xlane.xlu0 %1742 }
0x11a1   : > { %v1744_v28 = vsub.f32 %v1740_v39, %v1743_v25 }
0x11a3   : > { %v1745_v32 = vmul.f32 1.442695, %v1744_v28 }
0x11a4   : > { %v2845_v63 = vpop.eup %2844 }
0x11a5   : > { %2846 = vpow2.f32 %v1745_v32  ;;  %v1805_v46 = vsel %vm917_vm6, %v2845_v63, 0.0 }
0x11a6   : > { %1806 = vadd.xlane.f32.xlu0 %v1805_v46 }
0x11aa   : > { %v1917_v3 = vpop.xlane.xlu2 %1916 }
0x11ab   : > { %v2847_v6 = vpop.eup %2846  ;;  %v1918_v10 = vsub.f32 %v1914_v26, %v1917_v3 }
0x11ac   : > { %v1747_v17 = vsel %vm917_vm6, %v2847_v6, 0.0 }
0x11ad   : > { %v1919_v19 = vmul.f32 1.442695, %v1918_v10  ;;  %1748 = vadd.xlane.f32.xlu2 %v1747_v17 }
0x11af   : > { %2848 = vpow2.f32 %v1919_v19 }
0x11b0   : > { %v1859_v21 = vpop.xlane.xlu1 %1858 }
0x11b1   : > { %v1860_v22 = vsub.f32 %v1856_v49, %v1859_v21 }
0x11b3   : > { %v1861_v24 = vmul.f32 1.442695, %v1860_v22  ;;  %v1754_v27 = vpop.permute.xlu0 %1753 }
0x11b4   : > { %v1759_v18 = vsel %vm956_vm5, %v1754_v27, 0 }
0x11b5   : > { %v2849_v20 = vpop.eup %2848  ;;  %2850 = vpow2.f32 %v1861_v24  ;;  %1768 = vmatpush.bf16.msra.mxu0 %v1759_v18 }
0x11b6   : > { %v1921_v33 = vsel %vm917_vm6, %v2849_v20, 0.0 }
0x11b7   : > { %1922 = vadd.xlane.f32.xlu2 %v1921_v33 }
0x11ba   : > { %1927 = vrot.lane.b32.xlu0 %v3800_v62, %s4043_s25 }
0x11bb   : > { %v2851_v38 = vpop.eup %2850 }
0x11bc   : > { %v1863_v29 = vsel %vm917_vm6, %v2851_v38, 0.0 }
0x11bf   : > { %1864 = vadd.xlane.f32.xlu2 %v1863_v29 }
0x11c8   : > { %v1812_v11 = vpop.permute.xlu1 %1811 }
0x11c9   : > { %v1817_v39 = vsel %vm956_vm5, %v1812_v11, 0 }
0x11ca   : > { %1826 = vmatpush.bf16.msra.mxu2 %v1817_v39 }
0x11d7   : > { %1869 = vrot.lane.b32.xlu2 %v3800_v62, %s4044_s28 }
0x1219   : > { %v1807_v12 = vpop.xlane.xlu0 %1806 }
0x121a   : > { %2852 = vrcp.f32 %v1807_v12 }
0x1220   : > { %v2853_v40 = vpop.eup %2852  ;;  %v1749_v41 = vpop.xlane.xlu2 %1748 }
0x1221   : > { %v1809_v23 = vmul.f32 %v2853_v40, %v2845_v63  ;;  %2854 = vrcp.f32 %v1749_v41 }
0x1223   : > { %v1810_v26 = vpack.c.bf16 %v1809_v23, %v1809_v23 }
0x1225   : > { %2615 = vmatmul.msk.bf16.vlgmr.msra.gmra.mxu2 %vm917_vm6, %v1810_v26 }
0x1227   : > { %v2855_v42 = vpop.eup %2854 }
0x1228   : > { %v1751_v35 = vmul.f32 %v2855_v42, %v2847_v6 }
0x122a   : > { %v1752_v44 = vpack.c.bf16 %v1751_v35, %v1751_v35  ;;  %v1923_v48 = vpop.xlane.xlu2 %1922 }
0x122b   : > { %2856 = vrcp.f32 %v1923_v48 }
0x122c   : > { %2613 = vmatmul.msk.bf16.vlgmr.msra.gmra.mxu0 %vm917_vm6, %v1752_v44  ;;  %v1928_v49 = vpop.permute.xlu0 %1927 }
0x122d   : > { %v1933_v51 = vsel %vm956_vm5, %v1928_v49, 0 }
0x122e   : > { %1942 = vmatpush.bf16.msrb.mxu2 %v1933_v51 }
0x1231   : > { %v2857_v62 = vpop.eup %2856 }
0x1232   : > { %2063 = vmatpush.bf16.msra.mxu2 %v3683_v56  ;;  %v1925_v52 = vmul.f32 %v2857_v62, %v2849_v20  ;;  %v1865_v53 = vpop.xlane.xlu2 %1864 }
0x1233   : > { %2858 = vrcp.f32 %v1865_v53 }
0x1234   : > { %v1926_v59 = vpack.c.bf16 %v1925_v52, %v1925_v52 }
0x1236   : > { %2619 = vmatmul.msk.bf16.vlgmr.msrb.gmra.mxu2 %vm917_vm6, %v1926_v59 }
0x1237   : > { %2160 = vmatpush.bf16.msrb.mxu2 %v3688_v2 }
0x1239   : > { %v2859_v61 = vpop.eup %2858 }
0x123a   : > { %v1867_v25 = vmul.f32 %v2859_v61, %v2851_v38  ;;  %v1870_v28 = vpop.permute.xlu2 %1869 }
0x123b   : > { %v1875_v32 = vsel %vm956_vm5, %v1870_v28, 0 }
0x123c   : > { %v1868_v63 = vpack.c.bf16 %v1867_v25, %v1867_v25  ;;  %1884 = vmatpush.bf16.msrb.mxu0 %v1875_v32 }
0x123f   : > { %2617 = vmatmul.msk.bf16.vlgmr.msrb.gmra.mxu0 %vm917_vm6, %v1868_v63 }
0x1240   : > { %2015 = vmatpush.bf16.msra.mxu0 %v3633_v47 }
0x1244   : > { %2016 = vmatpush.bf16.msra.mxu0 %v3639_v0 }
0x1248   : > { %2112 = vmatpush.bf16.msrb.mxu0 %v3699_v34 }
0x12a8   : > { %v1828_v56 = vpop.f32.mrf.mxu2 }
0x12a9   : > { %v1770_v46 = vpop.f32.mrf.mxu0  ;;  %1949 = vrot.lane.b32.xlu1 %v1828_v56, %s3224_s29 }
0x12b0   : > { %v1830_v2 = vpop.f32.mrf.mxu2 }
0x12b1   : > { %v1772_v3 = vpop.f32.mrf.mxu0 }
0x12b9   : > { %v1944_v6 = vpop.f32.mrf.mxu2 }
0x12ba   : > { %1957 = vrot.lane.b32.xlu1 %v1944_v6, %s3225_s21 }
0x12bc   : > { %v1886_v10 = vpop.f32.mrf.mxu0 }
0x12bd   : > { %1953 = vrot.lane.b32.xlu0 %v1886_v10, %s4045_s4 }
0x12c1   : > { %v1946_v17 = vpop.f32.mrf.mxu2 }
0x12c4   : > { %v1888_v47 = vpop.f32.mrf.mxu0 }
0x131b   : > { %v1950_v19 = vpop.permute.xlu1 %1949 }
0x131c   : > { %v1960_v21 = vsel %vm917_vm6, %v1770_v46, %v1950_v19 }
0x132c   : > { %v1958_v22 = vpop.permute.xlu1 %1957 }
0x132f   : > { %v1954_v0 = vpop.permute.xlu0 %1953 }
0x1330   : > { %v1961_v34 = vsel %vm1160_vm7, %v1960_v21, %v1954_v0 }
0x1331   : > { %v1962_v24 = vsel %vm1162_vm8, %v1961_v34, %v1958_v22 }
0x1332   : > { %v1963_v27 = vpack.c.bf16 %v1962_v24, %v1962_v24 }
0x1334   : > { %2620 = vmatmul.msk.bf16.vlgmr.msra.gmra.mxu3 %vm823_vm0, %v1963_v27 }
0x1335   : > { %2178 = vmatpush.bf16.xpose.msra.mxu3 %v3615_v36 }
0x13b7   : > { %v1976_v18 = vpop.f32.mrf.mxu3 }
0x13b8   : > { %v1977_v20 = vadd.f32 %v3619_v37, %v1976_v18 }
0x13ba   : > { %v3873_v33 = vadd.f32 %v1977_v20, %v3788_v16 }
0x13bc   : > { %v1981_v38 = vsel %vm823_vm0, %v3873_v33, 0.0 }
0x13bd   : > { %1982 = vadd.xlane.f32.xlu0 %v1981_v38 }
0x13bf   : > { %v1978_v29 = vpop.f32.mrf.mxu3 }
0x1430   : > { %v1983_v11 = vpop.xlane.xlu0 %1982 }
0x1431   : > { %v1984_v39 = vmul.f32 %v1983_v11, %v3470_v8 }
0x1433   : > { %v1985_v12 = vsub.f32 %v3873_v33, %v1984_v39 }
0x1435   : > { %v1986_v40 = vmul.f32 %v1985_v12, %v1985_v12 }
0x1437   : > { %v1987_v41 = vsel %vm823_vm0, %v1986_v40, 0.0 }
0x1438   : > { %1988 = vadd.xlane.f32.xlu1 %v1987_v41 }
0x14ab   : > { %v1989_v36 = vpop.xlane.xlu1 %1988 }
0x14ac   : > { %v1990_v37 = vmul.f32 %v1989_v36, %v3470_v8 }
0x14ae   : > { %v1991_v23 = vadd.f32 1e-06, %v1990_v37 }
0x14b0   : > { %2860 = vrsqrt.f32 %v1991_v23  ;;  %vm1998_vm10 = vweird.f32 %v1991_v23 }
0x14b6   : > { %v2861_v16 = vpop.eup %2860 }
0x14b7   : > { %v1993_v26 = vmul.f32 %v2861_v16, %v1991_v23  ;;  %vm1999_vm5 = vweird.f32 %v2861_v16 }
0x14b8   : > { %vm2000_vm11 = vmor %vm1998_vm10, %vm1999_vm5 }
0x14b9   : > { %v1994_v42 = vmul.f32 %v2861_v16, %v1993_v26 }
0x14bb   : > { %v1995_v35 = vmul.f32 0.5, %v1994_v42 }
0x14bd   : > { %v1996_v44 = vsub.f32 1.5, %v1995_v35 }
0x14bf   : > { %v1997_v48 = vmul.f32 %v2861_v16, %v1996_v44 }
0x14c1   : > { %v2001_v49 = vsel %vm2000_vm11, %v2861_v16, %v1997_v48 }
0x14c2   : > { %v2002_v51 = vmul.f32 %v2001_v49, %v1985_v12 }
0x14c4   : > { %v2003_v62 = vmul.f32 %v3643_v57, %v2002_v51 }
0x14c6   : > { %v2004_v52 = vadd.f32 %v3645_v60, %v2003_v62 }
0x14c8   : > { %v2005_v53 = vpack.c.bf16 %v2004_v52, %v2004_v52 }
0x14ca   : > { %2621 = vmatmul.msk.bf16.vlgmr.msra.gmra.mxu0 %vm823_vm0, %v2005_v53 }
0x14cb   : > { %2208 = vmatpush.bf16.msra.mxu0 %v3704_v43 }
0x1547   : > { %v2018_v59 = vpop.f32.mrf.mxu0 }
0x1548   : > { %v2019_v61 = vadd.f32 %v3653_v1, %v2018_v59 }
0x154a   : > { %v2022_v25 = vpack.c.bf16 %v2019_v61, %v2019_v61 }
0x154c   : > { %2070 = vrot.lane.b32.xlu2 %v2022_v25, %s3217_s24  ;;  %2622 = vmatmul.msk.bf16.vlgmr.msra.gmra.mxu1 %vm917_vm6, %v2022_v25  ;;  %s776_s24 = sand.u32 1, %s3194_s22  }
0x154d   : > { %2239 = vmatpush.bf16.msra.mxu1 %v3717_v15  ;;  %s2309_s27 = scalar_lea.sflag [#allocation4], %s776_s24 }
0x154f   : > { %v2020_v28 = vpop.f32.mrf.mxu0 }
0x1551   : > { %2240 = vmatpush.bf16.msra.mxu1 %v3723_v55 }
0x1554   : > { %2118 = vrot.lane.b32.xlu2 %v2022_v25, %s3218_s26  ;;  %s2518_s26 = sshll.u32 %s776_s24, 3 }
0x1555   : > { %s778_s23 = scalar_lea.vmem [#allocation16], %s2518_s26 }
0x1556   : > { %s2321_s7 = sshll.u32 %s778_s23, 4  ;;  %s2322_s7 = int_to_ptr.vmem [resolvable:$true] %s2321_s7 }
0x155c   : > { %2166 = vrot.lane.b32.xlu2 %v2022_v25, %s3220_s13  ;;  %s2634_s13 = sshll.u32 %s3353_s2, 3 }
0x155d   : > { %s2319_s3 = scalar_lea.hbm %s3989_s20, %s2634_s13 }
0x155e   : > { %s2323_s17 = sshll.u32 %s2319_s3, 4  ;;  %s2324_s17 = int_to_ptr.hbm [resolvable:$true] %s2323_s17 }
0x155f   : > { %s3134_s30 = sshra.s32 %s2324_s17, 4  ;;  %s3135_s30 = int_to_ptr.hbm [resolvable:$true] %s3134_s30 }
0x1560   : > { %s3136_s2 = scalar_lea.hbm %s3135_s30, 8  ;;  %p3141_p3 = scmp.lt.s32.totalorder %s3135_s30, %s3989_s20 }
0x1561   : > { %p3137_p0 = scmp.ne.s32.totalorder %s3135_s30, %s3136_s2 }
0x1563   : > { %p3138_p1 = pnand %p3137_p0, %p3370_p5 }
0x1565   : > { %p3139_p2 = pneg %p3138_p1 }
0x15a6   : > { %v2071_v57 = vpop.permute.xlu2 %2070 }
0x15a7   : > { %2624 = vmatmul.msk.bf16.vlgmr.msrb.gmra.mxu3 %vm917_vm6, %v2071_v57 }
0x15a8   : > { %2297 = vmatpush.bf16.msrb.mxu3 %v3752_v31 }
0x15ac   : > { %2298 = vmatpush.bf16.msrb.mxu3 %v3759_v9 }
0x15ae   : > { %v2119_v60 = vpop.permute.xlu2 %2118 }
0x15af   : > { %2626 = vmatmul.msk.bf16.vlgmr.msrb.gmra.mxu1 %vm917_vm6, %v2119_v60 }
0x15b0   : > { %2299 = vmatpush.bf16.msrb.mxu3 %v3772_v14 }
0x15b4   : > { %2300 = vmatpush.bf16.msrb.mxu3 %v3778_v54 }
0x15b6   : > { %v2167_v1 = vpop.permute.xlu2 %2166 }
0x15b7   : > { %2628 = vmatmul.msk.bf16.vlgmr.msra.gmra.mxu3 %vm917_vm6, %v2167_v1 }
0x15c9   : > { %v2035_v43 = vpop.f32.mrf.mxu1 }
0x15ca   : > { %v2039_v15 = vmul.f32 0.35355338, %v2035_v43 }
0x15cc   : > { %v2040_v55 = vadd.f32 %v2039_v15, %v3667_v13 }
0x15ce   : > { %v2041_v32 = vsel %vm1290_vm12, %v2040_v55, -inf }
0x15cf   : > { %2042 = vmax.xlane.f32.xlu2 %v2041_v32 }
0x15d1   : > { %v2037_v31 = vpop.f32.mrf.mxu1 }
0x162a   : > { %v2084_v63 = vpop.f32.mrf.mxu3 }
0x162b   : > { %v2088_v9 = vmul.f32 0.35355338, %v2084_v63 }
0x162c   : > { %v2132_v56 = vpop.f32.mrf.mxu1 }
0x162d   : > { %v2136_v46 = vmul.f32 0.35355338, %v2132_v56  ;;  %v2089_v2 = vadd.f32 %v2088_v9, %v3667_v13 }
0x162f   : > { %v2090_v14 = vsel %vm1290_vm12, %v2089_v2, -inf  ;;  %v2137_v54 = vadd.f32 %v2136_v46, %v3667_v13 }
0x1630   : > { %2091 = vmax.xlane.f32.xlu0 %v2090_v14 }
0x1631   : > { %v2138_v3 = vsel %vm1290_vm12, %v2137_v54, -inf }
0x1632   : > { %v2086_v6 = vpop.f32.mrf.mxu3  ;;  %2139 = vmax.xlane.f32.xlu1 %v2138_v3 }
0x1634   : > { %v2134_v10 = vpop.f32.mrf.mxu1 }
0x163a   : > { %v2180_v17 = vpop.f32.mrf.mxu3 }
0x163b   : > { %v2184_v47 = vmul.f32 0.35355338, %v2180_v17 }
0x163d   : > { %v2185_v19 = vadd.f32 %v2184_v47, %v3667_v13 }
0x163f   : > { %v2186_v21 = vsel %vm1290_vm12, %v2185_v19, -inf }
0x1640   : > { %2187 = vmax.xlane.f32.xlu0 %v2186_v21 }
0x1642   : > { %v2182_v0 = vpop.f32.mrf.mxu3  ;;  %v2043_v22 = vpop.xlane.xlu2 %2042 }
0x1643   : > { %v2044_v34 = vsub.f32 %v2040_v55, %v2043_v22 }
0x1645   : > { %v2045_v24 = vmul.f32 1.442695, %v2044_v34 }
0x1647   : > { %2862 = vpow2.f32 %v2045_v24 }
0x164d   : > { %v2863_v27 = vpop.eup %2862 }
0x164e   : > { %v2047_v18 = vsel %vm1290_vm12, %v2863_v27, 0.0 }
0x164f   : > { %2048 = vadd.xlane.f32.xlu1 %v2047_v18 }
0x16a3   : > { %v2092_v20 = vpop.xlane.xlu0 %2091 }
0x16a4   : > { %v2093_v38 = vsub.f32 %v2089_v2, %v2092_v20 }
0x16a5   : > { %v2140_v29 = vpop.xlane.xlu1 %2139 }
0x16a6   : > { %v2094_v11 = vmul.f32 1.442695, %v2093_v38  ;;  %v2141_v39 = vsub.f32 %v2137_v54, %v2140_v29 }
0x16a8   : > { %2864 = vpow2.f32 %v2094_v11  ;;  %v2142_v12 = vmul.f32 1.442695, %v2141_v39 }
0x16aa   : > { %2866 = vpow2.f32 %v2142_v12 }
0x16ae   : > { %v2865_v13 = vpop.eup %2864 }
0x16af   : > { %v2096_v40 = vsel %vm1290_vm12, %v2865_v13, 0.0 }
0x16b0   : > { %v2867_v41 = vpop.eup %2866  ;;  %2097 = vadd.xlane.f32.xlu0 %v2096_v40 }
0x16b1   : > { %v2144_v36 = vsel %vm1290_vm12, %v2867_v41, 0.0 }
0x16b2   : > { %2145 = vadd.xlane.f32.xlu1 %v2144_v36 }
0x16b3   : > { %v2188_v37 = vpop.xlane.xlu0 %2187 }
0x16b4   : > { %v2189_v23 = vsub.f32 %v2185_v19, %v2188_v37 }
0x16b6   : > { %v2190_v16 = vmul.f32 1.442695, %v2189_v23 }
0x16b8   : > { %2868 = vpow2.f32 %v2190_v16 }
0x16be   : > { %v2869_v26 = vpop.eup %2868 }
0x16bf   : > { %v2192_v42 = vsel %vm1290_vm12, %v2869_v26, 0.0 }
0x16c0   : > { %2193 = vadd.xlane.f32.xlu0 %v2192_v42 }
0x16c2   : > { %v2049_v35 = vpop.xlane.xlu1 %2048 }
0x16c3   : > { %2870 = vrcp.f32 %v2049_v35 }
0x16c9   : > { %v2871_v44 = vpop.eup %2870 }
0x16ca   : > { %v2051_v48 = vmul.f32 %v2871_v44, %v2863_v27 }
0x16cc   : > { %v2052_v49 = vpack.c.bf16 %v2051_v48, %v2051_v48 }
0x16ce   : > { %2623 = vmatmul.msk.bf16.vlgmr.msra.gmra.mxu2 %vm1290_vm12, %v2052_v49 }
0x16cf   : > { %2281 = vmatpush.bf16.msra.mxu2 %v3740_v30 }
0x16d3   : > { %2282 = vmatpush.bf16.msra.mxu2 %v3746_v7 }
0x1723   : > { %v2098_v51 = vpop.xlane.xlu0 %2097 }
0x1724   : > { %2872 = vrcp.f32 %v2098_v51 }
0x1725   : > { %v2146_v62 = vpop.xlane.xlu1 %2145 }
0x1726   : > { %2874 = vrcp.f32 %v2146_v62 }
0x172a   : > { %v2873_v52 = vpop.eup %2872 }
0x172b   : > { %v2100_v53 = vmul.f32 %v2873_v52, %v2865_v13 }
0x172c   : > { %v2875_v59 = vpop.eup %2874 }
0x172d   : > { %v2101_v61 = vpack.c.bf16 %v2100_v53, %v2100_v53  ;;  %v2148_v25 = vmul.f32 %v2875_v59, %v2867_v41 }
0x172f   : > { %v2149_v28 = vpack.c.bf16 %v2148_v25, %v2148_v25  ;;  %2625 = vmatmul.msk.bf16.vlgmr.msrb.gmra.mxu0 %vm1290_vm12, %v2101_v61 }
0x1731   : > { %2627 = vmatmul.msk.bf16.vlgmr.msrb.gmra.mxu2 %vm1290_vm12, %v2149_v28 }
0x1733   : > { %v2194_v57 = vpop.xlane.xlu0 %2193 }
0x1734   : > { %2876 = vrcp.f32 %v2194_v57 }
0x173a   : > { %v2877_v60 = vpop.eup %2876 }
0x173b   : > { %v2196_v30 = vmul.f32 %v2877_v60, %v2869_v26 }
0x173d   : > { %v2197_v1 = vpack.c.bf16 %v2196_v30, %v2196_v30 }
0x173f   : > { %2629 = vmatmul.msk.bf16.vlgmr.msra.gmra.mxu0 %vm1290_vm12, %v2197_v1 }
0x1751   : > { %v2065_v7 = vpop.f32.mrf.mxu2 }
0x1759   : > { %v2067_v43 = vpop.f32.mrf.mxu2 }
0x17ac   : > { %v2114_v15 = vpop.f32.mrf.mxu0 }
0x17ad   : > { %2215 = vrot.lane.b32.xlu1 %v2114_v15, %s3224_s29 }
0x17b4   : > { %v2116_v55 = vpop.f32.mrf.mxu0  ;;  %v2162_v32 = vpop.f32.mrf.mxu2 }
0x17b5   : > { %2219 = vrot.lane.b32.xlu2 %v2162_v32, %s4045_s4  ;;  %s3140_s4 = scalar_lea.hbm %s3989_s20, 16 }
0x17b6   : > { %p3142_p4 = scmp.lt.s32.totalorder %s3140_s4, %s3136_s2 }
0x17b8   : > { %p3143_p7 = por %p3142_p4, %p3141_p3 }
0x17ba   : > { %p3144_p8 = pnand %p3143_p7, %p3139_p2 }
0x17bc   : > { %v2164_v31 = vpop.f32.mrf.mxu2  ;;  %v2210_v63 = vpop.f32.mrf.mxu0 }
0x17bd   : > { %2223 = vrot.lane.b32.xlu0 %v2210_v63, %s3225_s21 }
0x17c4   : > { %v2212_v9 = vpop.f32.mrf.mxu0 }
0x180f   : > { %v2220_v2 = vpop.permute.xlu2 %2219 }
0x181f   : > { %v2216_v56 = vpop.permute.xlu1 %2215 }
0x1820   : > { %v2226_v46 = vsel %vm917_vm6, %v2065_v7, %v2216_v56 }
0x1821   : > { %v2227_v54 = vsel %vm1160_vm7, %v2226_v46, %v2220_v2 }
0x182f   : > { %v2224_v14 = vpop.permute.xlu0 %2223 }
0x1830   : > { %v2228_v3 = vsel %vm1162_vm8, %v2227_v54, %v2224_v14 }
0x1831   : > { %v2229_v6 = vpack.c.bf16 %v2228_v3, %v2228_v3 }
0x1833   : > { %2630 = vmatmul.msk.bf16.vlgmr.msra.gmra.mxu1 %vm823_vm0, %v2229_v6 }
0x18b0   : > { %v2242_v10 = vpop.f32.mrf.mxu1 }
0x18b1   : > { %v2243_v17 = vadd.f32 %v3730_v5, %v2242_v10 }
0x18b3   : > { %v2246_v47 = vadd.f32 %v2243_v17, %v3873_v33 }
0x18b5   : > { %v2247_v19 = vsel %vm823_vm0, %v2246_v47, 0.0 }
0x18b6   : > { %2248 = vadd.xlane.f32.xlu0 %v2247_v19 }
0x18b8   : > { %v2244_v21 = vpop.f32.mrf.mxu1 }
0x1929   : > { %v2249_v0 = vpop.xlane.xlu0 %2248 }
0x192a   : > { %v2250_v22 = vmul.f32 %v2249_v0, %v3470_v8 }
0x192c   : > { %v2251_v34 = vsub.f32 %v2246_v47, %v2250_v22 }
0x192e   : > { %v2252_v24 = vmul.f32 %v2251_v34, %v2251_v34 }
0x1930   : > { %v2253_v27 = vsel %vm823_vm0, %v2252_v24, 0.0 }
0x1931   : > { %2254 = vadd.xlane.f32.xlu1 %v2253_v27 }
0x19a4   : > { %v2255_v18 = vpop.xlane.xlu1 %2254 }
0x19a5   : > { %v2256_v20 = vmul.f32 %v2255_v18, %v3470_v8 }
0x19a7   : > { %v2257_v38 = vadd.f32 1e-06, %v2256_v20 }
0x19a9   : > { %2878 = vrsqrt.f32 %v2257_v38  ;;  %vm2264_vm7 = vweird.f32 %v2257_v38 }
0x19af   : > { %v2879_v5 = vpop.eup %2878 }
0x19b0   : > { %v2259_v29 = vmul.f32 %v2879_v5, %v2257_v38  ;;  %vm2265_vm6 = vweird.f32 %v2879_v5 }
0x19b1   : > { %vm2266_vm8 = vmor %vm2264_vm7, %vm2265_vm6 }
0x19b2   : > { %v2260_v33 = vmul.f32 %v2879_v5, %v2259_v29 }
0x19b4   : > { %v2261_v11 = vmul.f32 0.5, %v2260_v33 }
0x19b6   : > { %v2262_v39 = vsub.f32 1.5, %v2261_v11 }
0x19b8   : > { %v2263_v12 = vmul.f32 %v2879_v5, %v2262_v39 }
0x19ba   : > { %v2267_v13 = vsel %vm2266_vm8, %v2879_v5, %v2263_v12 }
0x19bb   : > { %v2268_v40 = vmul.f32 %v2267_v13, %v2251_v34 }
0x19bd   : > { %v2269_v41 = vmul.f32 %v3762_v45, %v2268_v40 }
0x19bf   : > { %v2270_v36 = vadd.f32 %v3764_v50, %v2269_v41 }
0x19c1   : > { %v2271_v8 = vpack.c.bf16 %v2270_v36, %v2270_v36 }
0x19c3   : > { %2631 = vmatmul.msk.bf16.vlgmr.msra.gmra.mxu2 %vm823_vm0, %v2271_v8 }
0x1a46   : > { %v2284_v37 = vpop.f32.mrf.mxu2 }
0x1a47   : > { %v2285_v23 = vadd.f32 %v3781_v58, %v2284_v37 }
0x1a49   : > { %v2288_v16 = vmax.f32 %v2285_v23, 0.0 }
0x1a4b   : > { %v2289_v26 = vpack.c.bf16 %v2288_v16, %v2288_v16 }
0x1a4d   : > { %2632 = vmatmul.msk.bf16.vlgmr.msrb.gmra.mxu3 %vm1657_vm2, %v2289_v26 }
0x1a4e   : > { %v2286_v42 = vpop.f32.mrf.mxu2 }
0x1ad0   : > { %v2302_v45 = vpop.f32.mrf.mxu3 }
0x1ad1   : > { %v2303_v50 = vadd.f32 %v3785_v4, %v2302_v45 }
0x1ad3   : > { %v2306_v58 = vadd.f32 %v2303_v50, %v2246_v47 }
0x1ad5   : > { %2307 = vst.msk [vmem:[%s778_s23] sm:$0xff] %vm823_vm0, %v2306_v58 }
0x1ad6   : > { %3147 = shalt.err (!%p3144_p8)
}
0x1ad7   : > { %2686 = dma.vmem_to_hbm [thread:$0]  (%p3370_p5), %s2322_s7, 128, %s2324_s17, %s2309_s27  }
0x1ad8   : > { %v2304_v4 = vpop.f32.mrf.mxu3 }
0x1ad9 PF: > { %s4047_s24 = sld [smem:[#allocation25_spill]] }
0x1ada   : > { %s4048_s29 = sld [smem:[#allocation23_spill]] }
0x1adf   : > { %p2733_p9 = scmp.ge.s32.totalorder %s4047_s24, 2 }
0x1ae0   : > { %s2335_s3 = sand.u32 1, %s4048_s29  }
0x1ae1   : > { %p2714_p10 = pnand %p2733_p9, %p3374_p6  ;;  %s2336_s23 = scalar_lea.sflag [#allocation4], %s2335_s3 }
0x1ae3   : > { %p2715_p11 = pneg %p2714_p10 }
0x1ae5   : > { %3185 = dma.done.wait (%p2715_p11), %s2336_s23, 128  }
0x1ae6   : > { %3187 = vsyncadd (%p2715_p11), %s2336_s23, 4294967168  ;;  %s4050_s24 = sld [smem:[#allocation26_spill]]  ;;  %s4053_s1 = smov %s3194_s22 }
0x1ae7   : > { %s4051_s30 = sld [smem:[#allocation24_spill]] }
0x1ae8   : > { %s4052_s23 = sld [smem:[#allocation27_spill]] }
0x1aec   : > { %p35_p12 = scmp.ge.s32.totalorder %s4050_s24, 4  }
0x1aed   : > { %s4054_s22 = smov %s4051_s30 }
0x1aee   :  { %37 = sbr.rel (!%p35_p12) target bundleno = 17 (0x11), region = 177 }
0x1af3   :  { %2342 = vsyncpa [#allocation3], 1 }
0x1af4   :  { %2344 = vsyncpa [#allocation3 + $0x1], 1 }
0x1af5   :  { %2345 = vsyncpa [#allocation6], 1 }
0x1af6   :  { %2346 = vsyncpa [#allocation9], 1 }
0x1af7   :  { %2347 = vsyncpa [#allocation12], 1 }
0x1af8   :  { %2348 = vsyncpa [#allocation15], 1 }
0x1af9   :  { %2349 = vsyncpa [#allocation4], 1 }
0x1afa   :  { %2351 = vsyncpa [#allocation4 + $0x1], 1 }

</bundles_post_ra>
